<compile_context>
chip_gen: v5e
topology: v5e:2x2
jax: 0.10.0
libtpu: 0.0.40
codegen_flags: <defaults>
</compile_context>

<pallas_src>
import functools

import jax
import jax.numpy as jnp
import numpy as np
from jax.experimental import pallas as pl
from jax.experimental.pallas import tpu as pltpu


def _fused_kernel(x_ref, w1_ref, b1_ref, w2_ref, b2_ref, out_ref,
                  s1_ref, stage_ref, *, n_cin, n_c1, n_c2, pix, n_i, n_j,
                  fold_transpose):
    """Fused conv1(1x1) + sigmoid + (reshape/permute) + conv2(1x1) + sigmoid.

    x_ref    : (B, n_cin*pix)     VMEM  flattened NCHW input, lane = c*pix + p
    w1_ref   : (n_c1, n_cin)      SMEM  conv1 weight (scalar reads)
    b1_ref   : (n_c1,)            SMEM  conv1 bias
    w2_ref   : (n_c2, B)          VMEM  conv2 weight (contracts the batch axis)
    b2_ref   : (n_c2, 1)          VMEM  conv2 bias
    out_ref  : (n_c2, n_j, n_i)   VMEM  final result            (fold_transpose)
               (n_c2, n_c1*pix)   VMEM  k-ordered result         (otherwise)
    s1_ref   : (B, n_c1*pix)      VMEM  scratch: sigmoid(conv1), k = c1*pix + p
    stage_ref: (n_i, n_c2, 128m)  VMEM  scratch: relayout staging (lane-padded)
    """

    def sigmoid(z):
        # Exact identity sigmoid(z) = 0.5*tanh(z/2) + 0.5: one EUP transcendental
        # + two VPU ops (the old exp + reciprocal form used two EUP pushes).
        return 0.5 * jnp.tanh(0.5 * z) + 0.5

    # ---- conv1 (1x1, K = n_cin): scalar-weight FMAs on the VPU --------------
    xc = [x_ref[:, c * pix:(c + 1) * pix] for c in range(n_cin)]   # (B, pix) each
    for c1 in range(n_c1):
        pre1 = b1_ref[c1] + w1_ref[c1, 0] * xc[0]
        for ci in range(1, n_cin):
            pre1 = pre1 + w1_ref[c1, ci] * xc[ci]
        s1_ref[:, c1 * pix:(c1 + 1) * pix] = sigmoid(pre1)

    # ---- conv2 (1x1 over the batch axis): one small MXU dot -----------------
    pre2 = jnp.dot(w2_ref[...], s1_ref[...],
                   preferred_element_type=jnp.float32) + b2_ref[...]
    sig2 = sigmoid(pre2)                                           # (n_c2, n_c1*pix)

    if fold_transpose:
        # out[o, j, i] = sig2[o, i*n_j + j]  (the reshape+permute of the graph).
        # Stage with the i axis leading so each write is an aligned slab, then
        # one small (n_i, 128)->(128, n_i) transpose per output channel.
        for i in range(n_i):
            stage_ref[i, :, 0:n_j] = sig2[:, i * n_j:(i + 1) * n_j]
        for o in range(n_c2):
            t = jnp.transpose(stage_ref[:, o, :])                  # (pad_j, n_i)
            out_ref[o] = t[0:n_j, :]                               # (n_j, n_i)
    else:
        out_ref[...] = sig2


def model_forward(x, conv1_w, conv1_b, conv2_w, conv2_b, *, fold_transpose=True):
    B, C, H, W = x.shape
    pix = H * W
    n_c1 = conv1_w.shape[0]                  # 3
    n_c2 = conv2_w.shape[0]                  # 16
    k_tot = n_c1 * pix                       # 768
    assert B == conv2_w.shape[1], "forward only defined when batch == conv2.in_channels"
    assert k_tot % 16 == 0
    n_i, n_j = 16, k_tot // 16               # the reshape(B, 16, -1) split
    pad_j = ((n_j + 127) // 128) * 128       # lane-pad the transpose staging buffer

    x_flat = x.reshape(B, C * pix).astype(jnp.float32)             # free NCHW flatten
    w1 = conv1_w.reshape(n_c1, C).astype(jnp.float32)
    b1 = conv1_b.astype(jnp.float32)
    w2 = conv2_w.reshape(n_c2, B).astype(jnp.float32)
    b2 = conv2_b.reshape(n_c2, 1).astype(jnp.float32)

    kernel = functools.partial(_fused_kernel, n_cin=C, n_c1=n_c1, n_c2=n_c2,
                               pix=pix, n_i=n_i, n_j=n_j,
                               fold_transpose=fold_transpose)

    if fold_transpose:
        out_shape = jax.ShapeDtypeStruct((n_c2, n_j, n_i), jnp.float32)
    else:
        out_shape = jax.ShapeDtypeStruct((n_c2, k_tot), jnp.float32)

    n_sig = (B + n_c2) * k_tot
    cost = pl.CostEstimate(
        flops=2 * B * n_c1 * C * pix + 2 * n_c2 * B * k_tot + 4 * n_sig,
        transcendentals=n_sig,
        bytes_accessed=4 * (B * C * pix + n_c1 * C + n_c1 + n_c2 * B + n_c2
                            + n_c2 * k_tot),
    )

    out = pl.pallas_call(
        kernel,
        out_shape=out_shape,
        in_specs=[
            pl.BlockSpec(memory_space=pltpu.MemorySpace.VMEM),   # x_flat
            pl.BlockSpec(memory_space=pltpu.MemorySpace.SMEM),   # conv1 weight (scalars)
            pl.BlockSpec(memory_space=pltpu.MemorySpace.SMEM),   # conv1 bias
            pl.BlockSpec(memory_space=pltpu.MemorySpace.VMEM),   # conv2 weight
            pl.BlockSpec(memory_space=pltpu.MemorySpace.VMEM),   # conv2 bias
        ],
        out_specs=pl.BlockSpec(memory_space=pltpu.MemorySpace.VMEM),
        scratch_shapes=[
            pltpu.VMEM((B, k_tot), jnp.float32),                 # sigmoid(conv1)
            pltpu.VMEM((n_i, n_c2, pad_j), jnp.float32),         # relayout staging
        ],
        cost_estimate=cost,
    )(x_flat, w1, b1, w2, b2)

    if fold_transpose:
        return out
    # Fallback layout: out[o, k] with k = i*n_j + j equals v6[o, j, i].
    return out.reshape(n_c2, n_i, n_j).transpose(0, 2, 1)


def reference_forward(x, conv1_w, conv1_b, conv2_w, conv2_b):
    """Pure-JAX reference with exactly the PyTorch semantics described above."""
    w1 = conv1_w.reshape(conv1_w.shape[0], -1)
    w2 = conv2_w.reshape(conv2_w.shape[0], -1)
    hp = jax.lax.Precision.HIGHEST
    v1 = jnp.einsum('oc,bchw->bohw', w1, x, precision=hp) + conv1_b[None, :, None, None]
    v2 = jax.nn.sigmoid(v1)
    v3 = v2.reshape(v2.shape[0], 16, -1)
    v4 = jnp.transpose(v3, (0, 2, 1))
    v5 = jnp.einsum('oc,chw->ohw', w2, v4, precision=hp) + conv2_b[:, None, None]
    return jax.nn.sigmoid(v5)


if __name__ == "__main__":
    key = jax.random.PRNGKey(0)
    kx, kw1, kb1, kw2, kb2 = jax.random.split(key, 5)

    # Batch must equal conv2.in_channels (=3) for the PyTorch forward to be well
    # defined; 16x16 spatial keeps shapes small (and 3*H*W % 16 == 0).
    B, C, H, W = 3, 3, 16, 16
    x = jax.random.normal(kx, (B, C, H, W), dtype=jnp.float32)
    w1 = 0.3 * jax.random.normal(kw1, (3, 3, 1, 1), dtype=jnp.float32)
    b1 = 0.3 * jax.random.normal(kb1, (3,), dtype=jnp.float32)
    w2 = 0.3 * jax.random.normal(kw2, (16, 3, 1, 1), dtype=jnp.float32)
    b2 = 0.3 * jax.random.normal(kb2, (16,), dtype=jnp.float32)

    ref = reference_forward(x, w1, b1, w2, b2)
    assert ref.shape == (16, 48, 16)

    out = None
    last_err = None
    # Preferred path folds the final reshape/permute into the kernel; if that
    # relayout fails to lower on this Mosaic version, fall back to the known-good
    # lane-dense (16, 768) output + free reshape + one small XLA transpose.
    for fold in (True, False):
        try:
            fwd = jax.jit(functools.partial(model_forward, fold_transpose=fold))
            cand = jax.block_until_ready(fwd(x, w1, b1, w2, b2))
            np.testing.assert_allclose(np.asarray(cand), np.asarray(ref),
                                       rtol=1e-4, atol=1e-4)
            out = cand
            break
        except Exception as e:  # lowering / compile failure on the fused path
            last_err = e
    if out is None:
        raise last_err

    assert out.shape == ref.shape == (16, 48, 16)
    print("KERNEL_OK")
</pallas_src>

<mosaic_0001>
module attributes {stable_mosaic.version = 11 : i64} {
  func.func @_fused_kernel(%arg0: memref<3x768xf32, #tpu.memory_space<vmem>>, %arg1: memref<3x3xf32, #tpu.memory_space<smem>>, %arg2: memref<3xf32, #tpu.memory_space<smem>>, %arg3: memref<16x3xf32, #tpu.memory_space<vmem>>, %arg4: memref<16x1xf32, #tpu.memory_space<vmem>>, %arg5: memref<16x48x16xf32, #tpu.memory_space<vmem>>, %arg6: memref<3x768xf32, #tpu.memory_space<vmem>>, %arg7: memref<16x16x128xf32, #tpu.memory_space<vmem>>) attributes {dimension_semantics = [], scalar_prefetch = 0 : i64, scratch_operands = 2 : i64, tpu.core_type = #tpu.core_type<tc>} {
    %c0 = arith.constant 0 : index
    %c0_0 = arith.constant 0 : index
    %0 = vector.load %arg0[%c0, %c0_0] : memref<3x768xf32, #tpu.memory_space<vmem>>, vector<3x256xf32>
    %c0_1 = arith.constant 0 : index
    %c256 = arith.constant 256 : index
    %1 = vector.load %arg0[%c0_1, %c256] : memref<3x768xf32, #tpu.memory_space<vmem>>, vector<3x256xf32>
    %c0_2 = arith.constant 0 : index
    %c512 = arith.constant 512 : index
    %2 = vector.load %arg0[%c0_2, %c512] : memref<3x768xf32, #tpu.memory_space<vmem>>, vector<3x256xf32>
    %c0_3 = arith.constant 0 : index
    %3 = memref.load %arg2[%c0_3] : memref<3xf32, #tpu.memory_space<smem>>
    %c0_4 = arith.constant 0 : index
    %c0_5 = arith.constant 0 : index
    %4 = memref.load %arg1[%c0_4, %c0_5] : memref<3x3xf32, #tpu.memory_space<smem>>
    %5 = vector.broadcast %4 : f32 to vector<3x256xf32>
    %6 = arith.mulf %5, %0 : vector<3x256xf32>
    %7 = vector.broadcast %3 : f32 to vector<3x256xf32>
    %8 = arith.addf %7, %6 : vector<3x256xf32>
    %c0_6 = arith.constant 0 : index
    %c1 = arith.constant 1 : index
    %9 = memref.load %arg1[%c0_6, %c1] : memref<3x3xf32, #tpu.memory_space<smem>>
    %10 = vector.broadcast %9 : f32 to vector<3x256xf32>
    %11 = arith.mulf %10, %1 : vector<3x256xf32>
    %12 = arith.addf %8, %11 : vector<3x256xf32>
    %c0_7 = arith.constant 0 : index
    %c2 = arith.constant 2 : index
    %13 = memref.load %arg1[%c0_7, %c2] : memref<3x3xf32, #tpu.memory_space<smem>>
    %14 = vector.broadcast %13 : f32 to vector<3x256xf32>
    %15 = arith.mulf %14, %2 : vector<3x256xf32>
    %16 = arith.addf %12, %15 : vector<3x256xf32>
    %cst = arith.constant 5.000000e-01 : f32
    %17 = vector.broadcast %cst : f32 to vector<3x256xf32>
    %18 = arith.mulf %17, %16 : vector<3x256xf32>
    %19 = math.tanh %18 : vector<3x256xf32>
    %cst_8 = arith.constant 5.000000e-01 : f32
    %20 = vector.broadcast %cst_8 : f32 to vector<3x256xf32>
    %21 = arith.mulf %20, %19 : vector<3x256xf32>
    %cst_9 = arith.constant 5.000000e-01 : f32
    %22 = vector.broadcast %cst_9 : f32 to vector<3x256xf32>
    %23 = arith.addf %21, %22 : vector<3x256xf32>
    %c0_10 = arith.constant 0 : index
    %c0_11 = arith.constant 0 : index
    %24 = vector.load %arg6[%c0_10, %c0_11] : memref<3x768xf32, #tpu.memory_space<vmem>>, vector<3x256xf32>
    tpu.vector_store %arg6[%c0_10, %c0_11], %23 {strides = array<i32>} : memref<3x768xf32, #tpu.memory_space<vmem>>, vector<3x256xf32>,
    %c1_12 = arith.constant 1 : index
    %25 = memref.load %arg2[%c1_12] : memref<3xf32, #tpu.memory_space<smem>>
    %c1_13 = arith.constant 1 : index
    %c0_14 = arith.constant 0 : index
    %26 = memref.load %arg1[%c1_13, %c0_14] : memref<3x3xf32, #tpu.memory_space<smem>>
    %27 = vector.broadcast %26 : f32 to vector<3x256xf32>
    %28 = arith.mulf %27, %0 : vector<3x256xf32>
    %29 = vector.broadcast %25 : f32 to vector<3x256xf32>
    %30 = arith.addf %29, %28 : vector<3x256xf32>
    %c1_15 = arith.constant 1 : index
    %c1_16 = arith.constant 1 : index
    %31 = memref.load %arg1[%c1_15, %c1_16] : memref<3x3xf32, #tpu.memory_space<smem>>
    %32 = vector.broadcast %31 : f32 to vector<3x256xf32>
    %33 = arith.mulf %32, %1 : vector<3x256xf32>
    %34 = arith.addf %30, %33 : vector<3x256xf32>
    %c1_17 = arith.constant 1 : index
    %c2_18 = arith.constant 2 : index
    %35 = memref.load %arg1[%c1_17, %c2_18] : memref<3x3xf32, #tpu.memory_space<smem>>
    %36 = vector.broadcast %35 : f32 to vector<3x256xf32>
    %37 = arith.mulf %36, %2 : vector<3x256xf32>
    %38 = arith.addf %34, %37 : vector<3x256xf32>
    %cst_19 = arith.constant 5.000000e-01 : f32
    %39 = vector.broadcast %cst_19 : f32 to vector<3x256xf32>
    %40 = arith.mulf %39, %38 : vector<3x256xf32>
    %41 = math.tanh %40 : vector<3x256xf32>
    %cst_20 = arith.constant 5.000000e-01 : f32
    %42 = vector.broadcast %cst_20 : f32 to vector<3x256xf32>
    %43 = arith.mulf %42, %41 : vector<3x256xf32>
    %cst_21 = arith.constant 5.000000e-01 : f32
    %44 = vector.broadcast %cst_21 : f32 to vector<3x256xf32>
    %45 = arith.addf %43, %44 : vector<3x256xf32>
    %c0_22 = arith.constant 0 : index
    %c256_23 = arith.constant 256 : index
    %46 = vector.load %arg6[%c0_22, %c256_23] : memref<3x768xf32, #tpu.memory_space<vmem>>, vector<3x256xf32>
    tpu.vector_store %arg6[%c0_22, %c256_23], %45 {strides = array<i32>} : memref<3x768xf32, #tpu.memory_space<vmem>>, vector<3x256xf32>,
    %c2_24 = arith.constant 2 : index
    %47 = memref.load %arg2[%c2_24] : memref<3xf32, #tpu.memory_space<smem>>
    %c2_25 = arith.constant 2 : index
    %c0_26 = arith.constant 0 : index
    %48 = memref.load %arg1[%c2_25, %c0_26] : memref<3x3xf32, #tpu.memory_space<smem>>
    %49 = vector.broadcast %48 : f32 to vector<3x256xf32>
    %50 = arith.mulf %49, %0 : vector<3x256xf32>
    %51 = vector.broadcast %47 : f32 to vector<3x256xf32>
    %52 = arith.addf %51, %50 : vector<3x256xf32>
    %c2_27 = arith.constant 2 : index
    %c1_28 = arith.constant 1 : index
    %53 = memref.load %arg1[%c2_27, %c1_28] : memref<3x3xf32, #tpu.memory_space<smem>>
    %54 = vector.broadcast %53 : f32 to vector<3x256xf32>
    %55 = arith.mulf %54, %1 : vector<3x256xf32>
    %56 = arith.addf %52, %55 : vector<3x256xf32>
    %c2_29 = arith.constant 2 : index
    %c2_30 = arith.constant 2 : index
    %57 = memref.load %arg1[%c2_29, %c2_30] : memref<3x3xf32, #tpu.memory_space<smem>>
    %58 = vector.broadcast %57 : f32 to vector<3x256xf32>
    %59 = arith.mulf %58, %2 : vector<3x256xf32>
    %60 = arith.addf %56, %59 : vector<3x256xf32>
    %cst_31 = arith.constant 5.000000e-01 : f32
    %61 = vector.broadcast %cst_31 : f32 to vector<3x256xf32>
    %62 = arith.mulf %61, %60 : vector<3x256xf32>
    %63 = math.tanh %62 : vector<3x256xf32>
    %cst_32 = arith.constant 5.000000e-01 : f32
    %64 = vector.broadcast %cst_32 : f32 to vector<3x256xf32>
    %65 = arith.mulf %64, %63 : vector<3x256xf32>
    %cst_33 = arith.constant 5.000000e-01 : f32
    %66 = vector.broadcast %cst_33 : f32 to vector<3x256xf32>
    %67 = arith.addf %65, %66 : vector<3x256xf32>
    %c0_34 = arith.constant 0 : index
    %c512_35 = arith.constant 512 : index
    %68 = vector.load %arg6[%c0_34, %c512_35] : memref<3x768xf32, #tpu.memory_space<vmem>>, vector<3x256xf32>
    tpu.vector_store %arg6[%c0_34, %c512_35], %67 {strides = array<i32>} : memref<3x768xf32, #tpu.memory_space<vmem>>, vector<3x256xf32>,
    %c0_36 = arith.constant 0 : index
    %c0_37 = arith.constant 0 : index
    %69 = vector.load %arg3[%c0_36, %c0_37] : memref<16x3xf32, #tpu.memory_space<vmem>>, vector<16x3xf32>
    %c0_38 = arith.constant 0 : index
    %c0_39 = arith.constant 0 : index
    %70 = vector.load %arg6[%c0_38, %c0_39] : memref<3x768xf32, #tpu.memory_space<vmem>>, vector<3x768xf32>
    %cst_40 = arith.constant dense<0.000000e+00> : vector<16x768xf32>
    %71 = tpu.matmul %69, %70, %cst_40 {dimension_numbers = #tpu.dot_dimension_numbers<[1], [0], [0], [1], [0, 0, 1, 1], [], []>} : vector<16x3xf32>, vector<3x768xf32>, vector<16x768xf32> -> vector<16x768xf32>
    %c0_41 = arith.constant 0 : index
    %c0_42 = arith.constant 0 : index
    %72 = vector.load %arg4[%c0_41, %c0_42] : memref<16x1xf32, #tpu.memory_space<vmem>>, vector<16x1xf32>
    %73 = vector.broadcast %72 : vector<16x1xf32> to vector<16x768xf32>
    %74 = arith.addf %71, %73 : vector<16x768xf32>
    %cst_43 = arith.constant 5.000000e-01 : f32
    %75 = vector.broadcast %cst_43 : f32 to vector<16x768xf32>
    %76 = arith.mulf %75, %74 : vector<16x768xf32>
    %77 = math.tanh %76 : vector<16x768xf32>
    %cst_44 = arith.constant 5.000000e-01 : f32
    %78 = vector.broadcast %cst_44 : f32 to vector<16x768xf32>
    %79 = arith.mulf %78, %77 : vector<16x768xf32>
    %cst_45 = arith.constant 5.000000e-01 : f32
    %80 = vector.broadcast %cst_45 : f32 to vector<16x768xf32>
    %81 = arith.addf %79, %80 : vector<16x768xf32>
    %82 = vector.extract_strided_slice %81 {offsets = [0, 0], sizes = [16, 48], strides = [1, 1]} : vector<16x768xf32> to vector<16x48xf32>
    %c0_46 = arith.constant 0 : index
    %c0_47 = arith.constant 0 : index
    %c0_48 = arith.constant 0 : index
    %83 = vector.load %arg7[%c0_46, %c0_47, %c0_48] : memref<16x16x128xf32, #tpu.memory_space<vmem>>, vector<1x16x48xf32>
    %84 = vector.shape_cast %83 : vector<1x16x48xf32> to vector<16x48xf32>
    %85 = vector.shape_cast %82 : vector<16x48xf32> to vector<1x16x48xf32>
    tpu.vector_store %arg7[%c0_46, %c0_47, %c0_48], %85 {strides = array<i32>} : memref<16x16x128xf32, #tpu.memory_space<vmem>>, vector<1x16x48xf32>,
    %86 = vector.extract_strided_slice %81 {offsets = [0, 48], sizes = [16, 48], strides = [1, 1]} : vector<16x768xf32> to vector<16x48xf32>
    %c1_49 = arith.constant 1 : index
    %c0_50 = arith.constant 0 : index
    %c0_51 = arith.constant 0 : index
    %87 = vector.load %arg7[%c1_49, %c0_50, %c0_51] : memref<16x16x128xf32, #tpu.memory_space<vmem>>, vector<1x16x48xf32>
    %88 = vector.shape_cast %87 : vector<1x16x48xf32> to vector<16x48xf32>
    %89 = vector.shape_cast %86 : vector<16x48xf32> to vector<1x16x48xf32>
    tpu.vector_store %arg7[%c1_49, %c0_50, %c0_51], %89 {strides = array<i32>} : memref<16x16x128xf32, #tpu.memory_space<vmem>>, vector<1x16x48xf32>,
    %90 = vector.extract_strided_slice %81 {offsets = [0, 96], sizes = [16, 48], strides = [1, 1]} : vector<16x768xf32> to vector<16x48xf32>
    %c2_52 = arith.constant 2 : index
    %c0_53 = arith.constant 0 : index
    %c0_54 = arith.constant 0 : index
    %91 = vector.load %arg7[%c2_52, %c0_53, %c0_54] : memref<16x16x128xf32, #tpu.memory_space<vmem>>, vector<1x16x48xf32>
    %92 = vector.shape_cast %91 : vector<1x16x48xf32> to vector<16x48xf32>
    %93 = vector.shape_cast %90 : vector<16x48xf32> to vector<1x16x48xf32>
    tpu.vector_store %arg7[%c2_52, %c0_53, %c0_54], %93 {strides = array<i32>} : memref<16x16x128xf32, #tpu.memory_space<vmem>>, vector<1x16x48xf32>,
    %94 = vector.extract_strided_slice %81 {offsets = [0, 144], sizes = [16, 48], strides = [1, 1]} : vector<16x768xf32> to vector<16x48xf32>
    %c3 = arith.constant 3 : index
    %c0_55 = arith.constant 0 : index
    %c0_56 = arith.constant 0 : index
    %95 = vector.load %arg7[%c3, %c0_55, %c0_56] : memref<16x16x128xf32, #tpu.memory_space<vmem>>, vector<1x16x48xf32>
    %96 = vector.shape_cast %95 : vector<1x16x48xf32> to vector<16x48xf32>
    %97 = vector.shape_cast %94 : vector<16x48xf32> to vector<1x16x48xf32>
    tpu.vector_store %arg7[%c3, %c0_55, %c0_56], %97 {strides = array<i32>} : memref<16x16x128xf32, #tpu.memory_space<vmem>>, vector<1x16x48xf32>,
    %98 = vector.extract_strided_slice %81 {offsets = [0, 192], sizes = [16, 48], strides = [1, 1]} : vector<16x768xf32> to vector<16x48xf32>
    %c4 = arith.constant 4 : index
    %c0_57 = arith.constant 0 : index
    %c0_58 = arith.constant 0 : index
    %99 = vector.load %arg7[%c4, %c0_57, %c0_58] : memref<16x16x128xf32, #tpu.memory_space<vmem>>, vector<1x16x48xf32>
    %100 = vector.shape_cast %99 : vector<1x16x48xf32> to vector<16x48xf32>
    %101 = vector.shape_cast %98 : vector<16x48xf32> to vector<1x16x48xf32>
    tpu.vector_store %arg7[%c4, %c0_57, %c0_58], %101 {strides = array<i32>} : memref<16x16x128xf32, #tpu.memory_space<vmem>>, vector<1x16x48xf32>,
    %102 = vector.extract_strided_slice %81 {offsets = [0, 240], sizes = [16, 48], strides = [1, 1]} : vector<16x768xf32> to vector<16x48xf32>
    %c5 = arith.constant 5 : index
    %c0_59 = arith.constant 0 : index
    %c0_60 = arith.constant 0 : index
    %103 = vector.load %arg7[%c5, %c0_59, %c0_60] : memref<16x16x128xf32, #tpu.memory_space<vmem>>, vector<1x16x48xf32>
    %104 = vector.shape_cast %103 : vector<1x16x48xf32> to vector<16x48xf32>
    %105 = vector.shape_cast %102 : vector<16x48xf32> to vector<1x16x48xf32>
    tpu.vector_store %arg7[%c5, %c0_59, %c0_60], %105 {strides = array<i32>} : memref<16x16x128xf32, #tpu.memory_space<vmem>>, vector<1x16x48xf32>,
    %106 = vector.extract_strided_slice %81 {offsets = [0, 288], sizes = [16, 48], strides = [1, 1]} : vector<16x768xf32> to vector<16x48xf32>
    %c6 = arith.constant 6 : index
    %c0_61 = arith.constant 0 : index
    %c0_62 = arith.constant 0 : index
    %107 = vector.load %arg7[%c6, %c0_61, %c0_62] : memref<16x16x128xf32, #tpu.memory_space<vmem>>, vector<1x16x48xf32>
    %108 = vector.shape_cast %107 : vector<1x16x48xf32> to vector<16x48xf32>
    %109 = vector.shape_cast %106 : vector<16x48xf32> to vector<1x16x48xf32>
    tpu.vector_store %arg7[%c6, %c0_61, %c0_62], %109 {strides = array<i32>} : memref<16x16x128xf32, #tpu.memory_space<vmem>>, vector<1x16x48xf32>,
    %110 = vector.extract_strided_slice %81 {offsets = [0, 336], sizes = [16, 48], strides = [1, 1]} : vector<16x768xf32> to vector<16x48xf32>
    %c7 = arith.constant 7 : index
    %c0_63 = arith.constant 0 : index
    %c0_64 = arith.constant 0 : index
    %111 = vector.load %arg7[%c7, %c0_63, %c0_64] : memref<16x16x128xf32, #tpu.memory_space<vmem>>, vector<1x16x48xf32>
    %112 = vector.shape_cast %111 : vector<1x16x48xf32> to vector<16x48xf32>
    %113 = vector.shape_cast %110 : vector<16x48xf32> to vector<1x16x48xf32>
    tpu.vector_store %arg7[%c7, %c0_63, %c0_64], %113 {strides = array<i32>} : memref<16x16x128xf32, #tpu.memory_space<vmem>>, vector<1x16x48xf32>,
    %114 = vector.extract_strided_slice %81 {offsets = [0, 384], sizes = [16, 48], strides = [1, 1]} : vector<16x768xf32> to vector<16x48xf32>
    %c8 = arith.constant 8 : index
    %c0_65 = arith.constant 0 : index
    %c0_66 = arith.constant 0 : index
    %115 = vector.load %arg7[%c8, %c0_65, %c0_66] : memref<16x16x128xf32, #tpu.memory_space<vmem>>, vector<1x16x48xf32>
    %116 = vector.shape_cast %115 : vector<1x16x48xf32> to vector<16x48xf32>
    %117 = vector.shape_cast %114 : vector<16x48xf32> to vector<1x16x48xf32>
    tpu.vector_store %arg7[%c8, %c0_65, %c0_66], %117 {strides = array<i32>} : memref<16x16x128xf32, #tpu.memory_space<vmem>>, vector<1x16x48xf32>,
    %118 = vector.extract_strided_slice %81 {offsets = [0, 432], sizes = [16, 48], strides = [1, 1]} : vector<16x768xf32> to vector<16x48xf32>
    %c9 = arith.constant 9 : index
    %c0_67 = arith.constant 0 : index
    %c0_68 = arith.constant 0 : index
    %119 = vector.load %arg7[%c9, %c0_67, %c0_68] : memref<16x16x128xf32, #tpu.memory_space<vmem>>, vector<1x16x48xf32>
    %120 = vector.shape_cast %119 : vector<1x16x48xf32> to vector<16x48xf32>
    %121 = vector.shape_cast %118 : vector<16x48xf32> to vector<1x16x48xf32>
    tpu.vector_store %arg7[%c9, %c0_67, %c0_68], %121 {strides = array<i32>} : memref<16x16x128xf32, #tpu.memory_space<vmem>>, vector<1x16x48xf32>,
    %122 = vector.extract_strided_slice %81 {offsets = [0, 480], sizes = [16, 48], strides = [1, 1]} : vector<16x768xf32> to vector<16x48xf32>
    %c10 = arith.constant 10 : index
    %c0_69 = arith.constant 0 : index
    %c0_70 = arith.constant 0 : index
    %123 = vector.load %arg7[%c10, %c0_69, %c0_70] : memref<16x16x128xf32, #tpu.memory_space<vmem>>, vector<1x16x48xf32>
    %124 = vector.shape_cast %123 : vector<1x16x48xf32> to vector<16x48xf32>
    %125 = vector.shape_cast %122 : vector<16x48xf32> to vector<1x16x48xf32>
    tpu.vector_store %arg7[%c10, %c0_69, %c0_70], %125 {strides = array<i32>} : memref<16x16x128xf32, #tpu.memory_space<vmem>>, vector<1x16x48xf32>,
    %126 = vector.extract_strided_slice %81 {offsets = [0, 528], sizes = [16, 48], strides = [1, 1]} : vector<16x768xf32> to vector<16x48xf32>
    %c11 = arith.constant 11 : index
    %c0_71 = arith.constant 0 : index
    %c0_72 = arith.constant 0 : index
    %127 = vector.load %arg7[%c11, %c0_71, %c0_72] : memref<16x16x128xf32, #tpu.memory_space<vmem>>, vector<1x16x48xf32>
    %128 = vector.shape_cast %127 : vector<1x16x48xf32> to vector<16x48xf32>
    %129 = vector.shape_cast %126 : vector<16x48xf32> to vector<1x16x48xf32>
    tpu.vector_store %arg7[%c11, %c0_71, %c0_72], %129 {strides = array<i32>} : memref<16x16x128xf32, #tpu.memory_space<vmem>>, vector<1x16x48xf32>,
    %130 = vector.extract_strided_slice %81 {offsets = [0, 576], sizes = [16, 48], strides = [1, 1]} : vector<16x768xf32> to vector<16x48xf32>
    %c12 = arith.constant 12 : index
    %c0_73 = arith.constant 0 : index
    %c0_74 = arith.constant 0 : index
    %131 = vector.load %arg7[%c12, %c0_73, %c0_74] : memref<16x16x128xf32, #tpu.memory_space<vmem>>, vector<1x16x48xf32>
    %132 = vector.shape_cast %131 : vector<1x16x48xf32> to vector<16x48xf32>
    %133 = vector.shape_cast %130 : vector<16x48xf32> to vector<1x16x48xf32>
    tpu.vector_store %arg7[%c12, %c0_73, %c0_74], %133 {strides = array<i32>} : memref<16x16x128xf32, #tpu.memory_space<vmem>>, vector<1x16x48xf32>,
    %134 = vector.extract_strided_slice %81 {offsets = [0, 624], sizes = [16, 48], strides = [1, 1]} : vector<16x768xf32> to vector<16x48xf32>
    %c13 = arith.constant 13 : index
    %c0_75 = arith.constant 0 : index
    %c0_76 = arith.constant 0 : index
    %135 = vector.load %arg7[%c13, %c0_75, %c0_76] : memref<16x16x128xf32, #tpu.memory_space<vmem>>, vector<1x16x48xf32>
    %136 = vector.shape_cast %135 : vector<1x16x48xf32> to vector<16x48xf32>
    %137 = vector.shape_cast %134 : vector<16x48xf32> to vector<1x16x48xf32>
    tpu.vector_store %arg7[%c13, %c0_75, %c0_76], %137 {strides = array<i32>} : memref<16x16x128xf32, #tpu.memory_space<vmem>>, vector<1x16x48xf32>,
    %138 = vector.extract_strided_slice %81 {offsets = [0, 672], sizes = [16, 48], strides = [1, 1]} : vector<16x768xf32> to vector<16x48xf32>
    %c14 = arith.constant 14 : index
    %c0_77 = arith.constant 0 : index
    %c0_78 = arith.constant 0 : index
    %139 = vector.load %arg7[%c14, %c0_77, %c0_78] : memref<16x16x128xf32, #tpu.memory_space<vmem>>, vector<1x16x48xf32>
    %140 = vector.shape_cast %139 : vector<1x16x48xf32> to vector<16x48xf32>
    %141 = vector.shape_cast %138 : vector<16x48xf32> to vector<1x16x48xf32>
    tpu.vector_store %arg7[%c14, %c0_77, %c0_78], %141 {strides = array<i32>} : memref<16x16x128xf32, #tpu.memory_space<vmem>>, vector<1x16x48xf32>,
    %142 = vector.extract_strided_slice %81 {offsets = [0, 720], sizes = [16, 48], strides = [1, 1]} : vector<16x768xf32> to vector<16x48xf32>
    %c15 = arith.constant 15 : index
    %c0_79 = arith.constant 0 : index
    %c0_80 = arith.constant 0 : index
    %143 = vector.load %arg7[%c15, %c0_79, %c0_80] : memref<16x16x128xf32, #tpu.memory_space<vmem>>, vector<1x16x48xf32>
    %144 = vector.shape_cast %143 : vector<1x16x48xf32> to vector<16x48xf32>
    %145 = vector.shape_cast %142 : vector<16x48xf32> to vector<1x16x48xf32>
    tpu.vector_store %arg7[%c15, %c0_79, %c0_80], %145 {strides = array<i32>} : memref<16x16x128xf32, #tpu.memory_space<vmem>>, vector<1x16x48xf32>,
    %c0_81 = arith.constant 0 : index
    %c0_82 = arith.constant 0 : index
    %c0_83 = arith.constant 0 : index
    %146 = vector.load %arg7[%c0_81, %c0_82, %c0_83] : memref<16x16x128xf32, #tpu.memory_space<vmem>>, vector<16x1x128xf32>
    %147 = vector.shape_cast %146 : vector<16x1x128xf32> to vector<16x128xf32>
    %148 = tpu.transpose %147, [1, 0] : vector<16x128xf32> -> vector<128x16xf32>
    %149 = vector.extract_strided_slice %148 {offsets = [0, 0], sizes = [48, 16], strides = [1, 1]} : vector<128x16xf32> to vector<48x16xf32>
    %c0_84 = arith.constant 0 : index
    %c0_85 = arith.constant 0 : index
    %c0_86 = arith.constant 0 : index
    %150 = vector.load %arg5[%c0_84, %c0_85, %c0_86] : memref<16x48x16xf32, #tpu.memory_space<vmem>>, vector<1x48x16xf32>
    %151 = vector.shape_cast %150 : vector<1x48x16xf32> to vector<48x16xf32>
    %152 = vector.shape_cast %149 : vector<48x16xf32> to vector<1x48x16xf32>
    tpu.vector_store %arg5[%c0_84, %c0_85, %c0_86], %152 {strides = array<i32>} : memref<16x48x16xf32, #tpu.memory_space<vmem>>, vector<1x48x16xf32>,
    %c0_87 = arith.constant 0 : index
    %c1_88 = arith.constant 1 : index
    %c0_89 = arith.constant 0 : index
    %153 = vector.load %arg7[%c0_87, %c1_88, %c0_89] : memref<16x16x128xf32, #tpu.memory_space<vmem>>, vector<16x1x128xf32>
    %154 = vector.shape_cast %153 : vector<16x1x128xf32> to vector<16x128xf32>
    %155 = tpu.transpose %154, [1, 0] : vector<16x128xf32> -> vector<128x16xf32>
    %156 = vector.extract_strided_slice %155 {offsets = [0, 0], sizes = [48, 16], strides = [1, 1]} : vector<128x16xf32> to vector<48x16xf32>
    %c1_90 = arith.constant 1 : index
    %c0_91 = arith.constant 0 : index
    %c0_92 = arith.constant 0 : index
    %157 = vector.load %arg5[%c1_90, %c0_91, %c0_92] : memref<16x48x16xf32, #tpu.memory_space<vmem>>, vector<1x48x16xf32>
    %158 = vector.shape_cast %157 : vector<1x48x16xf32> to vector<48x16xf32>
    %159 = vector.shape_cast %156 : vector<48x16xf32> to vector<1x48x16xf32>
    tpu.vector_store %arg5[%c1_90, %c0_91, %c0_92], %159 {strides = array<i32>} : memref<16x48x16xf32, #tpu.memory_space<vmem>>, vector<1x48x16xf32>,
    %c0_93 = arith.constant 0 : index
    %c2_94 = arith.constant 2 : index
    %c0_95 = arith.constant 0 : index
    %160 = vector.load %arg7[%c0_93, %c2_94, %c0_95] : memref<16x16x128xf32, #tpu.memory_space<vmem>>, vector<16x1x128xf32>
    %161 = vector.shape_cast %160 : vector<16x1x128xf32> to vector<16x128xf32>
    %162 = tpu.transpose %161, [1, 0] : vector<16x128xf32> -> vector<128x16xf32>
    %163 = vector.extract_strided_slice %162 {offsets = [0, 0], sizes = [48, 16], strides = [1, 1]} : vector<128x16xf32> to vector<48x16xf32>
    %c2_96 = arith.constant 2 : index
    %c0_97 = arith.constant 0 : index
    %c0_98 = arith.constant 0 : index
    %164 = vector.load %arg5[%c2_96, %c0_97, %c0_98] : memref<16x48x16xf32, #tpu.memory_space<vmem>>, vector<1x48x16xf32>
    %165 = vector.shape_cast %164 : vector<1x48x16xf32> to vector<48x16xf32>
    %166 = vector.shape_cast %163 : vector<48x16xf32> to vector<1x48x16xf32>
    tpu.vector_store %arg5[%c2_96, %c0_97, %c0_98], %166 {strides = array<i32>} : memref<16x48x16xf32, #tpu.memory_space<vmem>>, vector<1x48x16xf32>,
    %c0_99 = arith.constant 0 : index
    %c3_100 = arith.constant 3 : index
    %c0_101 = arith.constant 0 : index
    %167 = vector.load %arg7[%c0_99, %c3_100, %c0_101] : memref<16x16x128xf32, #tpu.memory_space<vmem>>, vector<16x1x128xf32>
    %168 = vector.shape_cast %167 : vector<16x1x128xf32> to vector<16x128xf32>
    %169 = tpu.transpose %168, [1, 0] : vector<16x128xf32> -> vector<128x16xf32>
    %170 = vector.extract_strided_slice %169 {offsets = [0, 0], sizes = [48, 16], strides = [1, 1]} : vector<128x16xf32> to vector<48x16xf32>
    %c3_102 = arith.constant 3 : index
    %c0_103 = arith.constant 0 : index
    %c0_104 = arith.constant 0 : index
    %171 = vector.load %arg5[%c3_102, %c0_103, %c0_104] : memref<16x48x16xf32, #tpu.memory_space<vmem>>, vector<1x48x16xf32>
    %172 = vector.shape_cast %171 : vector<1x48x16xf32> to vector<48x16xf32>
    %173 = vector.shape_cast %170 : vector<48x16xf32> to vector<1x48x16xf32>
    tpu.vector_store %arg5[%c3_102, %c0_103, %c0_104], %173 {strides = array<i32>} : memref<16x48x16xf32, #tpu.memory_space<vmem>>, vector<1x48x16xf32>,
    %c0_105 = arith.constant 0 : index
    %c4_106 = arith.constant 4 : index
    %c0_107 = arith.constant 0 : index
    %174 = vector.load %arg7[%c0_105, %c4_106, %c0_107] : memref<16x16x128xf32, #tpu.memory_space<vmem>>, vector<16x1x128xf32>
    %175 = vector.shape_cast %174 : vector<16x1x128xf32> to vector<16x128xf32>
    %176 = tpu.transpose %175, [1, 0] : vector<16x128xf32> -> vector<128x16xf32>
    %177 = vector.extract_strided_slice %176 {offsets = [0, 0], sizes = [48, 16], strides = [1, 1]} : vector<128x16xf32> to vector<48x16xf32>
    %c4_108 = arith.constant 4 : index
    %c0_109 = arith.constant 0 : index
    %c0_110 = arith.constant 0 : index
    %178 = vector.load %arg5[%c4_108, %c0_109, %c0_110] : memref<16x48x16xf32, #tpu.memory_space<vmem>>, vector<1x48x16xf32>
    %179 = vector.shape_cast %178 : vector<1x48x16xf32> to vector<48x16xf32>
    %180 = vector.shape_cast %177 : vector<48x16xf32> to vector<1x48x16xf32>
    tpu.vector_store %arg5[%c4_108, %c0_109, %c0_110], %180 {strides = array<i32>} : memref<16x48x16xf32, #tpu.memory_space<vmem>>, vector<1x48x16xf32>,
    %c0_111 = arith.constant 0 : index
    %c5_112 = arith.constant 5 : index
    %c0_113 = arith.constant 0 : index
    %181 = vector.load %arg7[%c0_111, %c5_112, %c0_113] : memref<16x16x128xf32, #tpu.memory_space<vmem>>, vector<16x1x128xf32>
    %182 = vector.shape_cast %181 : vector<16x1x128xf32> to vector<16x128xf32>
    %183 = tpu.transpose %182, [1, 0] : vector<16x128xf32> -> vector<128x16xf32>
    %184 = vector.extract_strided_slice %183 {offsets = [0, 0], sizes = [48, 16], strides = [1, 1]} : vector<128x16xf32> to vector<48x16xf32>
    %c5_114 = arith.constant 5 : index
    %c0_115 = arith.constant 0 : index
    %c0_116 = arith.constant 0 : index
    %185 = vector.load %arg5[%c5_114, %c0_115, %c0_116] : memref<16x48x16xf32, #tpu.memory_space<vmem>>, vector<1x48x16xf32>
    %186 = vector.shape_cast %185 : vector<1x48x16xf32> to vector<48x16xf32>
    %187 = vector.shape_cast %184 : vector<48x16xf32> to vector<1x48x16xf32>
    tpu.vector_store %arg5[%c5_114, %c0_115, %c0_116], %187 {strides = array<i32>} : memref<16x48x16xf32, #tpu.memory_space<vmem>>, vector<1x48x16xf32>,
    %c0_117 = arith.constant 0 : index
    %c6_118 = arith.constant 6 : index
    %c0_119 = arith.constant 0 : index
    %188 = vector.load %arg7[%c0_117, %c6_118, %c0_119] : memref<16x16x128xf32, #tpu.memory_space<vmem>>, vector<16x1x128xf32>
    %189 = vector.shape_cast %188 : vector<16x1x128xf32> to vector<16x128xf32>
    %190 = tpu.transpose %189, [1, 0] : vector<16x128xf32> -> vector<128x16xf32>
    %191 = vector.extract_strided_slice %190 {offsets = [0, 0], sizes = [48, 16], strides = [1, 1]} : vector<128x16xf32> to vector<48x16xf32>
    %c6_120 = arith.constant 6 : index
    %c0_121 = arith.constant 0 : index
    %c0_122 = arith.constant 0 : index
    %192 = vector.load %arg5[%c6_120, %c0_121, %c0_122] : memref<16x48x16xf32, #tpu.memory_space<vmem>>, vector<1x48x16xf32>
    %193 = vector.shape_cast %192 : vector<1x48x16xf32> to vector<48x16xf32>
    %194 = vector.shape_cast %191 : vector<48x16xf32> to vector<1x48x16xf32>
    tpu.vector_store %arg5[%c6_120, %c0_121, %c0_122], %194 {strides = array<i32>} : memref<16x48x16xf32, #tpu.memory_space<vmem>>, vector<1x48x16xf32>,
    %c0_123 = arith.constant 0 : index
    %c7_124 = arith.constant 7 : index
    %c0_125 = arith.constant 0 : index
    %195 = vector.load %arg7[%c0_123, %c7_124, %c0_125] : memref<16x16x128xf32, #tpu.memory_space<vmem>>, vector<16x1x128xf32>
    %196 = vector.shape_cast %195 : vector<16x1x128xf32> to vector<16x128xf32>
    %197 = tpu.transpose %196, [1, 0] : vector<16x128xf32> -> vector<128x16xf32>
    %198 = vector.extract_strided_slice %197 {offsets = [0, 0], sizes = [48, 16], strides = [1, 1]} : vector<128x16xf32> to vector<48x16xf32>
    %c7_126 = arith.constant 7 : index
    %c0_127 = arith.constant 0 : index
    %c0_128 = arith.constant 0 : index
    %199 = vector.load %arg5[%c7_126, %c0_127, %c0_128] : memref<16x48x16xf32, #tpu.memory_space<vmem>>, vector<1x48x16xf32>
    %200 = vector.shape_cast %199 : vector<1x48x16xf32> to vector<48x16xf32>
    %201 = vector.shape_cast %198 : vector<48x16xf32> to vector<1x48x16xf32>
    tpu.vector_store %arg5[%c7_126, %c0_127, %c0_128], %201 {strides = array<i32>} : memref<16x48x16xf32, #tpu.memory_space<vmem>>, vector<1x48x16xf32>,
    %c0_129 = arith.constant 0 : index
    %c8_130 = arith.constant 8 : index
    %c0_131 = arith.constant 0 : index
    %202 = vector.load %arg7[%c0_129, %c8_130, %c0_131] : memref<16x16x128xf32, #tpu.memory_space<vmem>>, vector<16x1x128xf32>
    %203 = vector.shape_cast %202 : vector<16x1x128xf32> to vector<16x128xf32>
    %204 = tpu.transpose %203, [1, 0] : vector<16x128xf32> -> vector<128x16xf32>
    %205 = vector.extract_strided_slice %204 {offsets = [0, 0], sizes = [48, 16], strides = [1, 1]} : vector<128x16xf32> to vector<48x16xf32>
    %c8_132 = arith.constant 8 : index
    %c0_133 = arith.constant 0 : index
    %c0_134 = arith.constant 0 : index
    %206 = vector.load %arg5[%c8_132, %c0_133, %c0_134] : memref<16x48x16xf32, #tpu.memory_space<vmem>>, vector<1x48x16xf32>
    %207 = vector.shape_cast %206 : vector<1x48x16xf32> to vector<48x16xf32>
    %208 = vector.shape_cast %205 : vector<48x16xf32> to vector<1x48x16xf32>
    tpu.vector_store %arg5[%c8_132, %c0_133, %c0_134], %208 {strides = array<i32>} : memref<16x48x16xf32, #tpu.memory_space<vmem>>, vector<1x48x16xf32>,
    %c0_135 = arith.constant 0 : index
    %c9_136 = arith.constant 9 : index
    %c0_137 = arith.constant 0 : index
    %209 = vector.load %arg7[%c0_135, %c9_136, %c0_137] : memref<16x16x128xf32, #tpu.memory_space<vmem>>, vector<16x1x128xf32>
    %210 = vector.shape_cast %209 : vector<16x1x128xf32> to vector<16x128xf32>
    %211 = tpu.transpose %210, [1, 0] : vector<16x128xf32> -> vector<128x16xf32>
    %212 = vector.extract_strided_slice %211 {offsets = [0, 0], sizes = [48, 16], strides = [1, 1]} : vector<128x16xf32> to vector<48x16xf32>
    %c9_138 = arith.constant 9 : index
    %c0_139 = arith.constant 0 : index
    %c0_140 = arith.constant 0 : index
    %213 = vector.load %arg5[%c9_138, %c0_139, %c0_140] : memref<16x48x16xf32, #tpu.memory_space<vmem>>, vector<1x48x16xf32>
    %214 = vector.shape_cast %213 : vector<1x48x16xf32> to vector<48x16xf32>
    %215 = vector.shape_cast %212 : vector<48x16xf32> to vector<1x48x16xf32>
    tpu.vector_store %arg5[%c9_138, %c0_139, %c0_140], %215 {strides = array<i32>} : memref<16x48x16xf32, #tpu.memory_space<vmem>>, vector<1x48x16xf32>,
    %c0_141 = arith.constant 0 : index
    %c10_142 = arith.constant 10 : index
    %c0_143 = arith.constant 0 : index
    %216 = vector.load %arg7[%c0_141, %c10_142, %c0_143] : memref<16x16x128xf32, #tpu.memory_space<vmem>>, vector<16x1x128xf32>
    %217 = vector.shape_cast %216 : vector<16x1x128xf32> to vector<16x128xf32>
    %218 = tpu.transpose %217, [1, 0] : vector<16x128xf32> -> vector<128x16xf32>
    %219 = vector.extract_strided_slice %218 {offsets = [0, 0], sizes = [48, 16], strides = [1, 1]} : vector<128x16xf32> to vector<48x16xf32>
    %c10_144 = arith.constant 10 : index
    %c0_145 = arith.constant 0 : index
    %c0_146 = arith.constant 0 : index
    %220 = vector.load %arg5[%c10_144, %c0_145, %c0_146] : memref<16x48x16xf32, #tpu.memory_space<vmem>>, vector<1x48x16xf32>
    %221 = vector.shape_cast %220 : vector<1x48x16xf32> to vector<48x16xf32>
    %222 = vector.shape_cast %219 : vector<48x16xf32> to vector<1x48x16xf32>
    tpu.vector_store %arg5[%c10_144, %c0_145, %c0_146], %222 {strides = array<i32>} : memref<16x48x16xf32, #tpu.memory_space<vmem>>, vector<1x48x16xf32>,
    %c0_147 = arith.constant 0 : index
    %c11_148 = arith.constant 11 : index
    %c0_149 = arith.constant 0 : index
    %223 = vector.load %arg7[%c0_147, %c11_148, %c0_149] : memref<16x16x128xf32, #tpu.memory_space<vmem>>, vector<16x1x128xf32>
    %224 = vector.shape_cast %223 : vector<16x1x128xf32> to vector<16x128xf32>
    %225 = tpu.transpose %224, [1, 0] : vector<16x128xf32> -> vector<128x16xf32>
    %226 = vector.extract_strided_slice %225 {offsets = [0, 0], sizes = [48, 16], strides = [1, 1]} : vector<128x16xf32> to vector<48x16xf32>
    %c11_150 = arith.constant 11 : index
    %c0_151 = arith.constant 0 : index
    %c0_152 = arith.constant 0 : index
    %227 = vector.load %arg5[%c11_150, %c0_151, %c0_152] : memref<16x48x16xf32, #tpu.memory_space<vmem>>, vector<1x48x16xf32>
    %228 = vector.shape_cast %227 : vector<1x48x16xf32> to vector<48x16xf32>
    %229 = vector.shape_cast %226 : vector<48x16xf32> to vector<1x48x16xf32>
    tpu.vector_store %arg5[%c11_150, %c0_151, %c0_152], %229 {strides = array<i32>} : memref<16x48x16xf32, #tpu.memory_space<vmem>>, vector<1x48x16xf32>,
    %c0_153 = arith.constant 0 : index
    %c12_154 = arith.constant 12 : index
    %c0_155 = arith.constant 0 : index
    %230 = vector.load %arg7[%c0_153, %c12_154, %c0_155] : memref<16x16x128xf32, #tpu.memory_space<vmem>>, vector<16x1x128xf32>
    %231 = vector.shape_cast %230 : vector<16x1x128xf32> to vector<16x128xf32>
    %232 = tpu.transpose %231, [1, 0] : vector<16x128xf32> -> vector<128x16xf32>
    %233 = vector.extract_strided_slice %232 {offsets = [0, 0], sizes = [48, 16], strides = [1, 1]} : vector<128x16xf32> to vector<48x16xf32>
    %c12_156 = arith.constant 12 : index
    %c0_157 = arith.constant 0 : index
    %c0_158 = arith.constant 0 : index
    %234 = vector.load %arg5[%c12_156, %c0_157, %c0_158] : memref<16x48x16xf32, #tpu.memory_space<vmem>>, vector<1x48x16xf32>
    %235 = vector.shape_cast %234 : vector<1x48x16xf32> to vector<48x16xf32>
    %236 = vector.shape_cast %233 : vector<48x16xf32> to vector<1x48x16xf32>
    tpu.vector_store %arg5[%c12_156, %c0_157, %c0_158], %236 {strides = array<i32>} : memref<16x48x16xf32, #tpu.memory_space<vmem>>, vector<1x48x16xf32>,
    %c0_159 = arith.constant 0 : index
    %c13_160 = arith.constant 13 : index
    %c0_161 = arith.constant 0 : index
    %237 = vector.load %arg7[%c0_159, %c13_160, %c0_161] : memref<16x16x128xf32, #tpu.memory_space<vmem>>, vector<16x1x128xf32>
    %238 = vector.shape_cast %237 : vector<16x1x128xf32> to vector<16x128xf32>
    %239 = tpu.transpose %238, [1, 0] : vector<16x128xf32> -> vector<128x16xf32>
    %240 = vector.extract_strided_slice %239 {offsets = [0, 0], sizes = [48, 16], strides = [1, 1]} : vector<128x16xf32> to vector<48x16xf32>
    %c13_162 = arith.constant 13 : index
    %c0_163 = arith.constant 0 : index
    %c0_164 = arith.constant 0 : index
    %241 = vector.load %arg5[%c13_162, %c0_163, %c0_164] : memref<16x48x16xf32, #tpu.memory_space<vmem>>, vector<1x48x16xf32>
    %242 = vector.shape_cast %241 : vector<1x48x16xf32> to vector<48x16xf32>
    %243 = vector.shape_cast %240 : vector<48x16xf32> to vector<1x48x16xf32>
    tpu.vector_store %arg5[%c13_162, %c0_163, %c0_164], %243 {strides = array<i32>} : memref<16x48x16xf32, #tpu.memory_space<vmem>>, vector<1x48x16xf32>,
    %c0_165 = arith.constant 0 : index
    %c14_166 = arith.constant 14 : index
    %c0_167 = arith.constant 0 : index
    %244 = vector.load %arg7[%c0_165, %c14_166, %c0_167] : memref<16x16x128xf32, #tpu.memory_space<vmem>>, vector<16x1x128xf32>
    %245 = vector.shape_cast %244 : vector<16x1x128xf32> to vector<16x128xf32>
    %246 = tpu.transpose %245, [1, 0] : vector<16x128xf32> -> vector<128x16xf32>
    %247 = vector.extract_strided_slice %246 {offsets = [0, 0], sizes = [48, 16], strides = [1, 1]} : vector<128x16xf32> to vector<48x16xf32>
    %c14_168 = arith.constant 14 : index
    %c0_169 = arith.constant 0 : index
    %c0_170 = arith.constant 0 : index
    %248 = vector.load %arg5[%c14_168, %c0_169, %c0_170] : memref<16x48x16xf32, #tpu.memory_space<vmem>>, vector<1x48x16xf32>
    %249 = vector.shape_cast %248 : vector<1x48x16xf32> to vector<48x16xf32>
    %250 = vector.shape_cast %247 : vector<48x16xf32> to vector<1x48x16xf32>
    tpu.vector_store %arg5[%c14_168, %c0_169, %c0_170], %250 {strides = array<i32>} : memref<16x48x16xf32, #tpu.memory_space<vmem>>, vector<1x48x16xf32>,
    %c0_171 = arith.constant 0 : index
    %c15_172 = arith.constant 15 : index
    %c0_173 = arith.constant 0 : index
    %251 = vector.load %arg7[%c0_171, %c15_172, %c0_173] : memref<16x16x128xf32, #tpu.memory_space<vmem>>, vector<16x1x128xf32>
    %252 = vector.shape_cast %251 : vector<16x1x128xf32> to vector<16x128xf32>
    %253 = tpu.transpose %252, [1, 0] : vector<16x128xf32> -> vector<128x16xf32>
    %254 = vector.extract_strided_slice %253 {offsets = [0, 0], sizes = [48, 16], strides = [1, 1]} : vector<128x16xf32> to vector<48x16xf32>
    %c15_174 = arith.constant 15 : index
    %c0_175 = arith.constant 0 : index
    %c0_176 = arith.constant 0 : index
    %255 = vector.load %arg5[%c15_174, %c0_175, %c0_176] : memref<16x48x16xf32, #tpu.memory_space<vmem>>, vector<1x48x16xf32>
    %256 = vector.shape_cast %255 : vector<1x48x16xf32> to vector<48x16xf32>
    %257 = vector.shape_cast %254 : vector<48x16xf32> to vector<1x48x16xf32>
    tpu.vector_store %arg5[%c15_174, %c0_175, %c0_176], %257 {strides = array<i32>} : memref<16x48x16xf32, #tpu.memory_space<vmem>>, vector<1x48x16xf32>,
    return
  }
}

module attributes {stable_mosaic.version = 11 : i64} {
  func.func @_fused_kernel(%arg0: memref<3x768xf32, #tpu.memory_space<vmem>>, %arg1: memref<3x3xf32, #tpu.memory_space<smem>>, %arg2: memref<3xf32, #tpu.memory_space<smem>>, %arg3: memref<16x3xf32, #tpu.memory_space<vmem>>, %arg4: memref<16x1xf32, #tpu.memory_space<vmem>>, %arg5: memref<16x768xf32, #tpu.memory_space<vmem>>, %arg6: memref<3x768xf32, #tpu.memory_space<vmem>>, %arg7: memref<16x16x128xf32, #tpu.memory_space<vmem>>) attributes {dimension_semantics = [], scalar_prefetch = 0 : i64, scratch_operands = 2 : i64, tpu.core_type = #tpu.core_type<tc>} {
    %c0 = arith.constant 0 : index
    %c0_0 = arith.constant 0 : index
    %0 = vector.load %arg0[%c0, %c0_0] : memref<3x768xf32, #tpu.memory_space<vmem>>, vector<3x256xf32>
    %c0_1 = arith.constant 0 : index
    %c256 = arith.constant 256 : index
    %1 = vector.load %arg0[%c0_1, %c256] : memref<3x768xf32, #tpu.memory_space<vmem>>, vector<3x256xf32>
    %c0_2 = arith.constant 0 : index
    %c512 = arith.constant 512 : index
    %2 = vector.load %arg0[%c0_2, %c512] : memref<3x768xf32, #tpu.memory_space<vmem>>, vector<3x256xf32>
    %c0_3 = arith.constant 0 : index
    %3 = memref.load %arg2[%c0_3] : memref<3xf32, #tpu.memory_space<smem>>
    %c0_4 = arith.constant 0 : index
    %c0_5 = arith.constant 0 : index
    %4 = memref.load %arg1[%c0_4, %c0_5] : memref<3x3xf32, #tpu.memory_space<smem>>
    %5 = vector.broadcast %4 : f32 to vector<3x256xf32>
    %6 = arith.mulf %5, %0 : vector<3x256xf32>
    %7 = vector.broadcast %3 : f32 to vector<3x256xf32>
    %8 = arith.addf %7, %6 : vector<3x256xf32>
    %c0_6 = arith.constant 0 : index
    %c1 = arith.constant 1 : index
    %9 = memref.load %arg1[%c0_6, %c1] : memref<3x3xf32, #tpu.memory_space<smem>>
    %10 = vector.broadcast %9 : f32 to vector<3x256xf32>
    %11 = arith.mulf %10, %1 : vector<3x256xf32>
    %12 = arith.addf %8, %11 : vector<3x256xf32>
    %c0_7 = arith.constant 0 : index
    %c2 = arith.constant 2 : index
    %13 = memref.load %arg1[%c0_7, %c2] : memref<3x3xf32, #tpu.memory_space<smem>>
    %14 = vector.broadcast %13 : f32 to vector<3x256xf32>
    %15 = arith.mulf %14, %2 : vector<3x256xf32>
    %16 = arith.addf %12, %15 : vector<3x256xf32>
    %cst = arith.constant 5.000000e-01 : f32
    %17 = vector.broadcast %cst : f32 to vector<3x256xf32>
    %18 = arith.mulf %17, %16 : vector<3x256xf32>
    %19 = math.tanh %18 : vector<3x256xf32>
    %cst_8 = arith.constant 5.000000e-01 : f32
    %20 = vector.broadcast %cst_8 : f32 to vector<3x256xf32>
    %21 = arith.mulf %20, %19 : vector<3x256xf32>
    %cst_9 = arith.constant 5.000000e-01 : f32
    %22 = vector.broadcast %cst_9 : f32 to vector<3x256xf32>
    %23 = arith.addf %21, %22 : vector<3x256xf32>
    %c0_10 = arith.constant 0 : index
    %c0_11 = arith.constant 0 : index
    %24 = vector.load %arg6[%c0_10, %c0_11] : memref<3x768xf32, #tpu.memory_space<vmem>>, vector<3x256xf32>
    tpu.vector_store %arg6[%c0_10, %c0_11], %23 {strides = array<i32>} : memref<3x768xf32, #tpu.memory_space<vmem>>, vector<3x256xf32>,
    %c1_12 = arith.constant 1 : index
    %25 = memref.load %arg2[%c1_12] : memref<3xf32, #tpu.memory_space<smem>>
    %c1_13 = arith.constant 1 : index
    %c0_14 = arith.constant 0 : index
    %26 = memref.load %arg1[%c1_13, %c0_14] : memref<3x3xf32, #tpu.memory_space<smem>>
    %27 = vector.broadcast %26 : f32 to vector<3x256xf32>
    %28 = arith.mulf %27, %0 : vector<3x256xf32>
    %29 = vector.broadcast %25 : f32 to vector<3x256xf32>
    %30 = arith.addf %29, %28 : vector<3x256xf32>
    %c1_15 = arith.constant 1 : index
    %c1_16 = arith.constant 1 : index
    %31 = memref.load %arg1[%c1_15, %c1_16] : memref<3x3xf32, #tpu.memory_space<smem>>
    %32 = vector.broadcast %31 : f32 to vector<3x256xf32>
    %33 = arith.mulf %32, %1 : vector<3x256xf32>
    %34 = arith.addf %30, %33 : vector<3x256xf32>
    %c1_17 = arith.constant 1 : index
    %c2_18 = arith.constant 2 : index
    %35 = memref.load %arg1[%c1_17, %c2_18] : memref<3x3xf32, #tpu.memory_space<smem>>
    %36 = vector.broadcast %35 : f32 to vector<3x256xf32>
    %37 = arith.mulf %36, %2 : vector<3x256xf32>
    %38 = arith.addf %34, %37 : vector<3x256xf32>
    %cst_19 = arith.constant 5.000000e-01 : f32
    %39 = vector.broadcast %cst_19 : f32 to vector<3x256xf32>
    %40 = arith.mulf %39, %38 : vector<3x256xf32>
    %41 = math.tanh %40 : vector<3x256xf32>
    %cst_20 = arith.constant 5.000000e-01 : f32
    %42 = vector.broadcast %cst_20 : f32 to vector<3x256xf32>
    %43 = arith.mulf %42, %41 : vector<3x256xf32>
    %cst_21 = arith.constant 5.000000e-01 : f32
    %44 = vector.broadcast %cst_21 : f32 to vector<3x256xf32>
    %45 = arith.addf %43, %44 : vector<3x256xf32>
    %c0_22 = arith.constant 0 : index
    %c256_23 = arith.constant 256 : index
    %46 = vector.load %arg6[%c0_22, %c256_23] : memref<3x768xf32, #tpu.memory_space<vmem>>, vector<3x256xf32>
    tpu.vector_store %arg6[%c0_22, %c256_23], %45 {strides = array<i32>} : memref<3x768xf32, #tpu.memory_space<vmem>>, vector<3x256xf32>,
    %c2_24 = arith.constant 2 : index
    %47 = memref.load %arg2[%c2_24] : memref<3xf32, #tpu.memory_space<smem>>
    %c2_25 = arith.constant 2 : index
    %c0_26 = arith.constant 0 : index
    %48 = memref.load %arg1[%c2_25, %c0_26] : memref<3x3xf32, #tpu.memory_space<smem>>
    %49 = vector.broadcast %48 : f32 to vector<3x256xf32>
    %50 = arith.mulf %49, %0 : vector<3x256xf32>
    %51 = vector.broadcast %47 : f32 to vector<3x256xf32>
    %52 = arith.addf %51, %50 : vector<3x256xf32>
    %c2_27 = arith.constant 2 : index
    %c1_28 = arith.constant 1 : index
    %53 = memref.load %arg1[%c2_27, %c1_28] : memref<3x3xf32, #tpu.memory_space<smem>>
    %54 = vector.broadcast %53 : f32 to vector<3x256xf32>
    %55 = arith.mulf %54, %1 : vector<3x256xf32>
    %56 = arith.addf %52, %55 : vector<3x256xf32>
    %c2_29 = arith.constant 2 : index
    %c2_30 = arith.constant 2 : index
    %57 = memref.load %arg1[%c2_29, %c2_30] : memref<3x3xf32, #tpu.memory_space<smem>>
    %58 = vector.broadcast %57 : f32 to vector<3x256xf32>
    %59 = arith.mulf %58, %2 : vector<3x256xf32>
    %60 = arith.addf %56, %59 : vector<3x256xf32>
    %cst_31 = arith.constant 5.000000e-01 : f32
    %61 = vector.broadcast %cst_31 : f32 to vector<3x256xf32>
    %62 = arith.mulf %61, %60 : vector<3x256xf32>
    %63 = math.tanh %62 : vector<3x256xf32>
    %cst_32 = arith.constant 5.000000e-01 : f32
    %64 = vector.broadcast %cst_32 : f32 to vector<3x256xf32>
    %65 = arith.mulf %64, %63 : vector<3x256xf32>
    %cst_33 = arith.constant 5.000000e-01 : f32
    %66 = vector.broadcast %cst_33 : f32 to vector<3x256xf32>
    %67 = arith.addf %65, %66 : vector<3x256xf32>
    %c0_34 = arith.constant 0 : index
    %c512_35 = arith.constant 512 : index
    %68 = vector.load %arg6[%c0_34, %c512_35] : memref<3x768xf32, #tpu.memory_space<vmem>>, vector<3x256xf32>
    tpu.vector_store %arg6[%c0_34, %c512_35], %67 {strides = array<i32>} : memref<3x768xf32, #tpu.memory_space<vmem>>, vector<3x256xf32>,
    %c0_36 = arith.constant 0 : index
    %c0_37 = arith.constant 0 : index
    %69 = vector.load %arg3[%c0_36, %c0_37] : memref<16x3xf32, #tpu.memory_space<vmem>>, vector<16x3xf32>
    %c0_38 = arith.constant 0 : index
    %c0_39 = arith.constant 0 : index
    %70 = vector.load %arg6[%c0_38, %c0_39] : memref<3x768xf32, #tpu.memory_space<vmem>>, vector<3x768xf32>
    %cst_40 = arith.constant dense<0.000000e+00> : vector<16x768xf32>
    %71 = tpu.matmul %69, %70, %cst_40 {dimension_numbers = #tpu.dot_dimension_numbers<[1], [0], [0], [1], [0, 0, 1, 1], [], []>} : vector<16x3xf32>, vector<3x768xf32>, vector<16x768xf32> -> vector<16x768xf32>
    %c0_41 = arith.constant 0 : index
    %c0_42 = arith.constant 0 : index
    %72 = vector.load %arg4[%c0_41, %c0_42] : memref<16x1xf32, #tpu.memory_space<vmem>>, vector<16x1xf32>
    %73 = vector.broadcast %72 : vector<16x1xf32> to vector<16x768xf32>
    %74 = arith.addf %71, %73 : vector<16x768xf32>
    %cst_43 = arith.constant 5.000000e-01 : f32
    %75 = vector.broadcast %cst_43 : f32 to vector<16x768xf32>
    %76 = arith.mulf %75, %74 : vector<16x768xf32>
    %77 = math.tanh %76 : vector<16x768xf32>
    %cst_44 = arith.constant 5.000000e-01 : f32
    %78 = vector.broadcast %cst_44 : f32 to vector<16x768xf32>
    %79 = arith.mulf %78, %77 : vector<16x768xf32>
    %cst_45 = arith.constant 5.000000e-01 : f32
    %80 = vector.broadcast %cst_45 : f32 to vector<16x768xf32>
    %81 = arith.addf %79, %80 : vector<16x768xf32>
    %c0_46 = arith.constant 0 : index
    %c0_47 = arith.constant 0 : index
    %82 = vector.load %arg5[%c0_46, %c0_47] : memref<16x768xf32, #tpu.memory_space<vmem>>, vector<16x768xf32>
    tpu.vector_store %arg5[%c0_46, %c0_47], %81 {strides = array<i32>} : memref<16x768xf32, #tpu.memory_space<vmem>>, vector<16x768xf32>,
    return
  }
}

</mosaic_0001>

<bundles_post_ra>
// kernel: model_forward.1
= control target key start
LH: loop header
LB: loop body
LE: loop exit
PB: predicated region body
PF: predicated region fallthrough
CT: control target
= control target key end

     0   :  { %10 = vsyncpa [#allocation5], 0  ;;  %s3168_s0 = inlined_call_operand.vmem [shape: f32[3,768], index: 0, kind: input, shape index: {}]   ;;  %s3169_s1 = inlined_call_operand.vmem [shape: f32[3,3], index: 1, kind: input, shape index: {}]   ;;  %s3170_s2 = inlined_call_operand.vmem [shape: f32[3], index: 2, kind: input, shape index: {}]   ;;  %s3171_s3 = inlined_call_operand.vmem [shape: f32[16,3], index: 3, kind: input, shape index: {}]   ;;  %s3172_s4 = inlined_call_operand.vmem [shape: f32[16,1], index: 4, kind: input, shape index: {}]   ;;  %s3173_s5 = inlined_call_operand.vmem [shape: f32[16,48,16], index: 5, kind: output, shape index: {}]  }
   0x1   :  { %s19_s20 = sshll.u32 %s3169_s1, 4  ;;  %s20_s20 = int_to_ptr.vmem [resolvable:$true] %s19_s20 }
   0x2   :  { %11 = vsyncpa [#allocation7], 0  ;;  %s28_s23 = sshll.u32 %s3170_s2, 4  ;;  %s2330_s24 = smov [#allocation4]   ;;  %s29_s23 = int_to_ptr.vmem [resolvable:$true] %s28_s23 }
   0x3   :  { %22 = dma.vmem_to_smem %s20_s20, 64, %s2330_s24, [#allocation5]  }
   0x4   :  { %s2331_s25 = smov [#allocation6]  }
   0x5   :  { %31 = dma.vmem_to_smem %s29_s23, 16, %s2331_s25, [#allocation7]  }
   0x6   :  { %2326 = dma.done.wait [#allocation5], 64  }
   0x7   :  { %2327 = vsyncadd [#allocation5], 4294967232 }
   0x8   :  { %2328 = dma.done.wait [#allocation7], 16  }
   0x9   :  { %2329 = vsyncadd [#allocation7], 4294967280 }
   0xa   :  { %44 = sfence }
   0xb   :  { %s48_s26 = sld [smem:[#allocation6]]  ;;  %v45_v0 = vld [vmem:[%s3168_s0] sm:$0x77]  ;;  %v46_v1 = vld [vmem:[%s3168_s0 + $0x8] sm:$0x77]  ;;  %v2332_v27 = vmov 0  }
   0xc   :  { %s49_s27 = sld [smem:[#allocation4]]  ;;  %v47_v2 = vld [vmem:[%s3168_s0 + $0x10] sm:$0x77]  ;;  %v110_v24 = vld [vmem:[%s3172_s4] sm:$0xff]  ;;  %2271 = vset.pattern.permute.xlu0 %v2332_v27  ;;  %v111_v39 = vld [vmem:[%s3172_s4 + $0x8] sm:$0xff]  ;;  %vm143_vm0 = vcmask 1042432  }
   0xd   :  { %s2140_s28 = sld [smem:[#allocation4 + $0x1]]  ;;  %114 = vperm.xlu0 %2271, %v110_v24   ;;  %v105_v50 = vld [vmem:[%s3171_s3] sm:$0xff]  ;;  %vm136_vm1 = vcmask 23552   ;;  %v106_v51 = vld [vmem:[%s3171_s3 + $0x8] sm:$0xff]  ;;  %vm342_vm2 = vcmask 392192   ;;  %s2333_s3 = smov 32  }
   0xe   :  { %s2141_s1 = sld [smem:[#allocation4 + $0x2]]  ;;  %s2334_s23 = smov 80   ;;  %vm366_vm3 = vcmask 261120   ;;  %vm402_vm4 = vcmask 130048   ;;  %vm545_vm5 = vcmask 1041409   ;;  %vm548_vm6 = vcmask 1042434  }
   0xf   :  { %s2142_s29 = sld [smem:[#allocation6 + $0x1]]  ;;  %s2335_s24 = smov 16   ;;  %vm551_vm7 = vcmask 1043459   ;;  %vm554_vm8 = vcmask 1044484   ;;  %vm557_vm9 = vcmask 1045509   ;;  %vm560_vm10 = vcmask 1046534  }
  0x10   :  { %s2143_s2 = sld [smem:[#allocation4 + $0x80]]  ;;  %s2336_s25 = smov 64   ;;  %vm563_vm11 = vcmask 1047559  }
  0x11   :  { %s2144_s9 = sld [smem:[#allocation4 + $0x81]]  ;;  %v52_v4 = vstv %s48_s26  ;;  %s2337_s26 = smov 112  }
  0x12   :  { %v50_v3 = vstv %s49_s27  ;;  %s2145_s12 = sld [smem:[#allocation4 + $0x82]]  ;;  %s2338_s27 = smov 48  }
  0x13   :  { %v51_v5 = vmul.f32 %v50_v3, %v45_v0  ;;  %v55_v6 = vstv %s2140_s28  ;;  %s2385_s13 = sld [smem:[#allocation6 + $0x2]]  ;;  %s2339_s28 = smov 96  }
  0x14   :  { %v56_v7 = vmul.f32 %v55_v6, %v46_v1  ;;  %v59_v8 = vstv %s2141_s1  ;;  %s2147_s14 = sld [smem:[#allocation4 + $0x100]] }
  0x15   :  { %v53_v9 = vadd.f32 %v52_v4, %v51_v5  ;;  %v60_v10 = vmul.f32 %v59_v8, %v47_v2  ;;  %s2148_s15 = sld [smem:[#allocation4 + $0x101]]  ;;  %v71_v12 = vstv %s2142_s29  ;;  %119 = vperm.xlu0 %2271, %v111_v39  }
  0x16   :  { %v69_v11 = vstv %s2143_s2  ;;  %s2149_s16 = sld [smem:[#allocation4 + $0x102]] }
  0x17   :  { %v57_v13 = vadd.f32 %v56_v7, %v53_v9  ;;  %v70_v14 = vmul.f32 %v69_v11, %v45_v0  ;;  %v74_v15 = vstv %s2144_s9 }
  0x18   :  { %v75_v16 = vmul.f32 %v74_v15, %v46_v1  ;;  %v78_v17 = vstv %s2145_s12 }
  0x19   :  { %v61_v18 = vadd.f32 %v60_v10, %v57_v13  ;;  %v72_v19 = vadd.f32 %v71_v12, %v70_v14  ;;  %v79_v20 = vmul.f32 %v78_v17, %v47_v2  ;;  %v90_v22 = vstv %s2385_s13 }
  0x1a   :  { %v88_v21 = vstv %s2147_s14 }
  0x1b   :  { %v62_v23 = vmul.f32 0.5, %v61_v18  ;;  %v76_v25 = vadd.f32 %v75_v16, %v72_v19  ;;  %v89_v26 = vmul.f32 %v88_v21, %v45_v0  ;;  %v93_v28 = vstv %s2148_s15 }
  0x1c   :  { %v97_v29 = vstv %s2149_s16  ;;  %v94_v32 = vmul.f32 %v93_v28, %v46_v1 }
  0x1d   :  { %2272 = vtanh.f32 %v62_v23  ;;  %v80_v30 = vadd.f32 %v79_v20, %v76_v25  ;;  %v91_v31 = vadd.f32 %v90_v22, %v89_v26  ;;  %v98_v33 = vmul.f32 %v97_v29, %v47_v2 }
  0x1f   :  { %v81_v34 = vmul.f32 0.5, %v80_v30  ;;  %v95_v35 = vadd.f32 %v94_v32, %v91_v31 }
  0x21   :  { %2274 = vtanh.f32 %v81_v34  ;;  %v99_v36 = vadd.f32 %v98_v33, %v95_v35 }
  0x23   :  { %v2273_v37 = vpop.eup %2272  ;;  %v100_v38 = vmul.f32 0.5, %v99_v36 }
  0x24   :  { %v64_v40 = vmul.f32 0.5, %v2273_v37 }
  0x25   :  { %2276 = vtanh.f32 %v100_v38 }
  0x26   :  { %v65_v41 = vadd.f32 0.5, %v64_v40 }
  0x27   :  { %v2275_v42 = vpop.eup %2274 }
  0x28   :  { %66 = vst [vmem:[#allocation2 + $0x10] sm:$0x77] %v65_v41  ;;  %v83_v43 = vmul.f32 0.5, %v2275_v42 }
  0x2a   :  { %v84_v44 = vadd.f32 0.5, %v83_v43 }
  0x2b   :  { %v2277_v45 = vpop.eup %2276 }
  0x2c   :  { %85 = vst [vmem:[#allocation2] sm:$0x77] %v84_v44  ;;  %v102_v46 = vmul.f32 0.5, %v2277_v45 }
  0x2e   :  { %v103_v47 = vadd.f32 0.5, %v102_v46 }
  0x2f   :  { %v107_v48 = vld [vmem:[#allocation2 + $0x10] sm:$0x77] }
  0x30   :  { %125 = vst [vmem:[#allocation1] ss:$2 sm:$0xff] %v107_v48 }
  0x31   :  { %104 = vst [vmem:[#allocation2 + $0x8] sm:$0x77] %v103_v47 }
  0x33   :  { %v108_v49 = vld [vmem:[#allocation2] sm:$0x77] }
  0x34   :  { %127 = vst [vmem:[#allocation1 + $0x10] ss:$2 sm:$0xff] %v108_v49 }
  0x37   :  { %v130_v52 = vld.sshfl [vmem:[#allocation1] sm:$0xff pattern:$0x75316420]  ;;  %v131_v53 = vld.sshfl [vmem:[#allocation1 + $0x8] sm:$0xff pattern:$0x75316420] }
  0x38   :  { %2150 = vmatpush.msk.msra.mxu0 %vm143_vm0, %v130_v52  ;;  %2258 = vmatpush.msk.msra.mxu2 %vm143_vm0, %v130_v52  ;;  %v109_v54 = vld [vmem:[#allocation2 + $0x8] sm:$0x77] }
  0x39   :  { %2153 = vmatpush.msk.msra.mxu1 %vm143_vm0, %v131_v53  ;;  %2259 = vmatpush.msk.msra.mxu3 %vm143_vm0, %v131_v53  ;;  %129 = vst [vmem:[#allocation1 + $0x20] ss:$2 sm:$0xff] %v109_v54 }
  0x3a   :  { %2151 = vmatmul.msk.f32.vlgmr.msra.gmra.mxu0 %vm136_vm1, %v105_v50  ;;  %2152 = vmatmul.msk.f32.vlgmr.msra.gmra.mxu2 %vm136_vm1, %v106_v51 }
  0x3b   :  { %2154 = vmatmul.msk.f32.vlgmr.msra.gmra.mxu1 %vm136_vm1, %v105_v50  ;;  %2155 = vmatmul.msk.f32.vlgmr.msra.gmra.mxu3 %vm136_vm1, %v106_v51  ;;  %v132_v55 = vld.sshfl [vmem:[#allocation1 + $0x10] sm:$0xff pattern:$0x75316420]  ;;  %v133_v56 = vld.sshfl [vmem:[#allocation1 + $0x18] sm:$0xff pattern:$0x75316420] }
  0x3c   :  { %2156 = vmatpush.msk.msrb.mxu2 %vm143_vm0, %v132_v55  ;;  %2159 = vmatpush.msk.msrb.mxu3 %vm143_vm0, %v133_v56 }
  0x40   :  { %v134_v57 = vld.sshfl [vmem:[#allocation1 + $0x20] sm:$0xff pattern:$0x75316420]  ;;  %v135_v58 = vld.sshfl [vmem:[#allocation1 + $0x28] sm:$0xff pattern:$0x75316420] }
  0x41   :  { %2162 = vmatpush.msk.msrb.mxu0 %vm143_vm0, %v134_v57  ;;  %2165 = vmatpush.msk.msrb.mxu1 %vm143_vm0, %v135_v58 }
  0x42   :  { %2157 = vmatmul.msk.f32.vlgmr.msrb.gmra.mxu2 %vm136_vm1, %v105_v50  ;;  %2163 = vmatmul.msk.f32.vlgmr.msrb.gmra.mxu0 %vm136_vm1, %v105_v50 }
  0x43   :  { %2160 = vmatmul.msk.f32.vlgmr.msrb.gmra.mxu3 %vm136_vm1, %v105_v50  ;;  %2166 = vmatmul.msk.f32.vlgmr.msrb.gmra.mxu1 %vm136_vm1, %v105_v50 }
  0x4a   :  { %2158 = vmatmul.msk.f32.gmra.mxu2 %vm136_vm1, %v106_v51  ;;  %2164 = vmatmul.msk.f32.gmra.mxu0 %vm136_vm1, %v106_v51 }
  0x4b   :  { %2161 = vmatmul.msk.f32.gmra.mxu3 %vm136_vm1, %v106_v51  ;;  %2167 = vmatmul.msk.f32.gmra.mxu1 %vm136_vm1, %v106_v51 }
  0x7f   :  { %v2420_v59 = vpop.permute.xlu0 %114 }
  0x87   :  { %v2424_v2 = vpop.permute.xlu0 %119 }
  0xb7   :  { %v173_v60 = vpop.f32.mrf.mxu0 }
  0xb8   :  { %v174_v61 = vadd.f32 %v173_v60, %v2420_v59  ;;  %v196_v62 = vpop.f32.mrf.mxu1 }
  0xb9   :  { %v197_v63 = vadd.f32 %v196_v62, %v2420_v59 }
  0xba   :  { %v294_v0 = vmul.f32 0.5, %v174_v61 }
  0xbb   :  { %v295_v1 = vmul.f32 0.5, %v197_v63 }
  0xbc   :  { %2278 = vtanh.f32 %v294_v0 }
  0xbd   :  { %2280 = vtanh.f32 %v295_v1  ;;  %v176_v3 = vpop.f32.mrf.mxu2 }
  0xbe   :  { %v177_v4 = vadd.f32 %v176_v3, %v2424_v2  ;;  %v199_v5 = vpop.f32.mrf.mxu3 }
  0xbf   :  { %v200_v7 = vadd.f32 %v199_v5, %v2424_v2  ;;  %v265_v15 = vpop.f32.mrf.mxu0 }
  0xc0   :  { %v300_v6 = vmul.f32 0.5, %v177_v4  ;;  %v266_v20 = vadd.f32 %v265_v15, %v2420_v59  ;;  %v288_v24 = vpop.f32.mrf.mxu1 }
  0xc1   :  { %v301_v13 = vmul.f32 0.5, %v200_v7  ;;  %v289_v29 = vadd.f32 %v288_v24, %v2420_v59 }
  0xc2   :  { %v2279_v8 = vpop.eup %2278  ;;  %2282 = vtanh.f32 %v300_v6  ;;  %v298_v23 = vmul.f32 0.5, %v266_v20 }
  0xc3   :  { %v2281_v9 = vpop.eup %2280  ;;  %v318_v10 = vmul.f32 0.5, %v2279_v8  ;;  %2284 = vtanh.f32 %v301_v13  ;;  %v299_v34 = vmul.f32 0.5, %v289_v29 }
  0xc4   :  { %v319_v11 = vmul.f32 0.5, %v2281_v9 }
  0xc5   :  { %v330_v12 = vadd.f32 0.5, %v318_v10  ;;  %v219_v36 = vpop.f32.mrf.mxu2 }
  0xc6   :  { %v331_v14 = vadd.f32 0.5, %v319_v11  ;;  %v242_v16 = vpop.f32.mrf.mxu3  ;;  %v220_v39 = vadd.f32 %v219_v36, %v2420_v59 }
  0xc7   :  { %343 = vst.msk [vmem:[#allocation3] sm:$0xff] %vm342_vm2, %v330_v12  ;;  %v243_v17 = vadd.f32 %v242_v16, %v2420_v59  ;;  %358 = vrot.lane.b32.xlu2 %v330_v12, %s2333_s3  ;;  %347 = vrot.lane.b32.xlu1 %v330_v12, %s2334_s23  ;;  %v268_v45 = vpop.f32.mrf.mxu0 }
  0xc8   :  { %v2283_v18 = vpop.eup %2282  ;;  %394 = vrot.lane.b32.xlu0 %v331_v14, %s2335_s24  ;;  %v296_v43 = vmul.f32 0.5, %v220_v39  ;;  %v269_v47 = vadd.f32 %v268_v45, %v2424_v2  ;;  %v291_v51 = vpop.f32.mrf.mxu1 }
  0xc9   :  { %v324_v19 = vmul.f32 0.5, %v2283_v18  ;;  %v297_v21 = vmul.f32 0.5, %v243_v17  ;;  %v2285_v26 = vpop.eup %2284  ;;  %v292_v53 = vadd.f32 %v291_v51, %v2424_v2 }
  0xca   :  { %v325_v31 = vmul.f32 0.5, %v2285_v26  ;;  %v304_v49 = vmul.f32 0.5, %v269_v47 }
  0xcb   :  { %v336_v22 = vadd.f32 0.5, %v324_v19  ;;  %2286 = vtanh.f32 %v297_v21  ;;  %v305_v55 = vmul.f32 0.5, %v292_v53 }
  0xcc   :  { %2288 = vtanh.f32 %v298_v23  ;;  %v337_v35 = vadd.f32 0.5, %v325_v31 }
  0xcd   :  { %344 = vst.msk [vmem:[#allocation3 + $0x8] sm:$0xff] %vm342_vm2, %v336_v22  ;;  %v222_v57 = vpop.f32.mrf.mxu2 }
  0xce   :  { %v245_v25 = vpop.f32.mrf.mxu3  ;;  %v223_v59 = vadd.f32 %v222_v57, %v2424_v2  ;;  %v619_v45 = vld [vmem:[#allocation3 + $0x1] sm:$0x1]  ;;  %v512_v47 = vld [vmem:[#allocation3] sm:$0x1] }
  0xcf   :  { %v246_v27 = vadd.f32 %v245_v25, %v2424_v2  ;;  %360 = vrot.lane.b32.xlu2 %v331_v14, %s2333_s3  ;;  %383 = vrot.lane.b32.xlu1 %v331_v14, %s2336_s25 }
  0xd0   :  { %362 = vrot.lane.b32.xlu0 %v336_v22, %s2333_s3  ;;  %v302_v61 = vmul.f32 0.5, %v223_v59 }
  0xd1   :  { %v2287_v28 = vpop.eup %2286  ;;  %v303_v30 = vmul.f32 0.5, %v246_v27 }
  0xd2   :  { %v321_v32 = vmul.f32 0.5, %v2287_v28  ;;  %v2289_v37 = vpop.eup %2288 }
  0xd3   :  { %2290 = vtanh.f32 %v303_v30  ;;  %v322_v40 = vmul.f32 0.5, %v2289_v37 }
  0xd4   :  { %v2440_v33 = vadd.f32 0.5, %v321_v32  ;;  %2292 = vtanh.f32 %v299_v34 }
  0xd5   :  { %v334_v44 = vadd.f32 0.5, %v322_v40  ;;  %2294 = vtanh.f32 %v296_v43 }
  0xd6   :  { %429 = vst.msk [vmem:[#allocation3 + $0x80] sm:$0xff] %vm342_vm2, %v2440_v33  ;;  %2296 = vtanh.f32 %v304_v49 }
  0xd7   :  { %374 = vrot.lane.b32.xlu2 %v331_v14, %s2337_s26  ;;  %349 = vrot.lane.b32.xlu1 %v336_v22, %s2334_s23  ;;  %2298 = vtanh.f32 %v305_v55 }
  0xd8   :  { %376 = vrot.lane.b32.xlu0 %v337_v35, %s2337_s26  ;;  %2300 = vtanh.f32 %v302_v61 }
  0xd9   :  { %v2291_v38 = vpop.eup %2290 }
  0xda   :  { %v327_v41 = vmul.f32 0.5, %v2291_v38  ;;  %v2293_v46 = vpop.eup %2292 }
  0xdb   :  { %v323_v48 = vmul.f32 0.5, %v2293_v46  ;;  %v2295_v52 = vpop.eup %2294 }
  0xdc   :  { %v339_v42 = vadd.f32 0.5, %v327_v41  ;;  %v320_v54 = vmul.f32 0.5, %v2295_v52  ;;  %v2297_v58 = vpop.eup %2296 }
  0xdd   :  { %v335_v50 = vadd.f32 0.5, %v323_v48  ;;  %v328_v60 = vmul.f32 0.5, %v2297_v58  ;;  %v2299_v63 = vpop.eup %2298 }
  0xde   :  { %430 = vst.msk [vmem:[#allocation3 + $0x88] sm:$0xff] %vm342_vm2, %v339_v42  ;;  %v332_v56 = vadd.f32 0.5, %v320_v54  ;;  %v329_v0 = vmul.f32 0.5, %v2299_v63  ;;  %v2301_v3 = vpop.eup %2300 }
  0xdf   :  { %385 = vrot.lane.b32.xlu2 %v337_v35, %s2336_s25  ;;  %364 = vrot.lane.b32.xlu1 %v337_v35, %s2333_s3  ;;  %v340_v62 = vadd.f32 0.5, %v328_v60  ;;  %v326_v2 = vmul.f32 0.5, %v2301_v3 }
  0xe0   :  { %479 = vrot.lane.b32.xlu0 %v334_v44, %s2335_s24  ;;  %v341_v1 = vadd.f32 0.5, %v329_v0 }
  0xe1   :  { %v338_v4 = vadd.f32 0.5, %v326_v2 }
  0xe7   :  { %398 = vrot.lane.b32.xlu2 %v337_v35, %s2335_s24  ;;  %468 = vrot.lane.b32.xlu1 %v334_v44, %s2336_s25 }
  0xe8   :  { %503 = vrot.lane.b32.xlu0 %v335_v50, %s2338_s27 }
  0xef   :  { %446 = vrot.lane.b32.xlu2 %v334_v44, %s2333_s3  ;;  %481 = vrot.lane.b32.xlu1 %v335_v50, %s2335_s24 }
  0xf0   :  { %419 = vrot.lane.b32.xlu0 %v332_v56, %s2338_s27 }
  0xf7   :  { %459 = vrot.lane.b32.xlu2 %v334_v44, %s2337_s26  ;;  %494 = vrot.lane.b32.xlu1 %v335_v50, %s2339_s28  ;;  %v720_v44 = vld [vmem:[#allocation3 + $0x2] sm:$0x1] }
  0xf8   :  { %461 = vrot.lane.b32.xlu0 %v340_v62, %s2337_s26 }
  0xff   :  { %433 = vrot.lane.b32.xlu2 %v2440_v33, %s2334_s23  ;;  %396 = vrot.lane.b32.xlu1 %v332_v56, %s2335_s24 }
 0x100   :  { %485 = vrot.lane.b32.xlu0 %v341_v1, %s2335_s24 }
 0x107   :  { %470 = vrot.lane.b32.xlu2 %v340_v62, %s2336_s25  ;;  %410 = vrot.lane.b32.xlu1 %v332_v56, %s2339_s28 }
 0x108   :  { %400 = vrot.lane.b32.xlu0 %v338_v4, %s2335_s24 }
 0x10f   :  { %483 = vrot.lane.b32.xlu2 %v340_v62, %s2335_s24  ;;  %444 = vrot.lane.b32.xlu1 %v2440_v33, %s2333_s3 }
 0x110   :  { %435 = vrot.lane.b32.xlu0 %v339_v42, %s2334_s23 }
 0x117   :  { %496 = vrot.lane.b32.xlu2 %v341_v1, %s2339_s28  ;;  %450 = vrot.lane.b32.xlu1 %v340_v62, %s2333_s3 }
 0x118   :  { %448 = vrot.lane.b32.xlu0 %v339_v42, %s2333_s3 }
 0x11f   :  { %412 = vrot.lane.b32.xlu2 %v338_v4, %s2339_s28  ;;  %505 = vrot.lane.b32.xlu1 %v341_v1, %s2338_s27 }
 0x121   :  { %v359_v5 = vpop.permute.xlu2 %358 }
 0x127   :  { %421 = vrot.lane.b32.xlu1 %v338_v4, %s2338_s27 }
 0x129   :  { %v361_v6 = vpop.permute.xlu2 %360 }
 0x12a   :  { %v367_v7 = vsel %vm366_vm3, %v359_v5, %v361_v6 }
 0x12b   :  { %372 = vst.msk [vmem:[#allocation3 + $0x20] sm:$0xff] %vm342_vm2, %v367_v7 }
 0x131   :  { %v375_v8 = vpop.permute.xlu2 %374 }
 0x132   :  { %381 = vst.msk [vmem:[#allocation3 + $0x30] sm:$0xff] %vm342_vm2, %v375_v8  ;;  %v722_v42 = vld [vmem:[#allocation3 + $0x22] sm:$0x1]  ;;  %v621_v46 = vld [vmem:[#allocation3 + $0x21] sm:$0x1] }
 0x133   :  { %v514_v48 = vld [vmem:[#allocation3 + $0x20] sm:$0x1]  ;;  %v754_v53 = vrot.slane %v722_v42, 6  ;;  %v653_v58 = vrot.slane %v621_v46, 6 }
 0x134   :  { %v547_v0 = vrot.slane %v514_v48, 6 }
 0x139   :  { %v386_v9 = vpop.permute.xlu2 %385  ;;  %v348_v10 = vpop.permute.xlu1 %347  ;;  %v723_v51 = vld [vmem:[#allocation3 + $0x32] sm:$0x1]  ;;  %v622_v54 = vld [vmem:[#allocation3 + $0x31] sm:$0x1]  ;;  %v515_v59 = vld [vmem:[#allocation3 + $0x30] sm:$0x1] }
 0x13a   :  { %v395_v11 = vpop.permute.xlu0 %394  ;;  %391 = vst.msk [vmem:[#allocation3 + $0x48] sm:$0xff] %vm342_vm2, %v386_v9  ;;  %v756_v3 = vrot.slane %v723_v51, 5  ;;  %v655_v4 = vrot.slane %v622_v54, 5 }
 0x13b   :  { %354 = vst.msk [vmem:[#allocation3 + $0x10] sm:$0xff] %vm342_vm2, %v348_v10 }
 0x141   :  { %v2482_v12 = vpop.permute.xlu2 %398  ;;  %v384_v13 = vpop.permute.xlu1 %383 }
 0x142   :  { %v363_v14 = vpop.permute.xlu0 %362  ;;  %390 = vst.msk [vmem:[#allocation3 + $0x40] sm:$0xff] %vm342_vm2, %v384_v13  ;;  %v721_v36 = vld [vmem:[#allocation3 + $0x12] sm:$0x1]  ;;  %v620_v37 = vld [vmem:[#allocation3 + $0x11] sm:$0x1] }
 0x143   :  { %v513_v39 = vld [vmem:[#allocation3 + $0x10] sm:$0x1]  ;;  %v752_v40 = vrot.slane %v721_v36, 7  ;;  %v651_v41 = vrot.slane %v620_v37, 7 }
 0x144   :  { %v544_v43 = vrot.slane %v513_v39, 7 }
 0x145   :  { %v753_v52 = vsel %vm545_vm5, %v752_v40, %v720_v44  ;;  %v652_v55 = vsel %vm545_vm5, %v651_v41, %v619_v45 }
 0x146   :  { %v546_v60 = vsel %vm545_vm5, %v544_v43, %v512_v47  ;;  %v755_v1 = vsel %vm548_vm6, %v754_v53, %v753_v52  ;;  %v654_v2 = vsel %vm548_vm6, %v653_v58, %v652_v55 }
 0x147   :  { %v549_v8 = vsel %vm548_vm6, %v547_v0, %v546_v60  ;;  %v728_v60 = vld [vmem:[#allocation3 + $0x82] sm:$0x1] }
 0x149   :  { %v2485_v15 = vpop.permute.xlu2 %446  ;;  %v350_v16 = vpop.permute.xlu1 %349  ;;  %v724_v57 = vld [vmem:[#allocation3 + $0x42] sm:$0x1]  ;;  %v623_v62 = vld [vmem:[#allocation3 + $0x41] sm:$0x1]  ;;  %v516_v63 = vld [vmem:[#allocation3 + $0x40] sm:$0x1] }
 0x14a   :  { %v377_v17 = vpop.permute.xlu0 %376  ;;  %355 = vst.msk [vmem:[#allocation3 + $0x18] sm:$0xff] %vm342_vm2, %v350_v16  ;;  %v758_v10 = vrot.slane %v724_v57, 4  ;;  %v553_v13 = vrot.slane %v516_v63, 4  ;;  %v656_v16 = vsel %vm551_vm7, %v655_v4, %v654_v2  ;;  %v627_v2 = vld [vmem:[#allocation3 + $0x81] sm:$0x1] }
 0x14b   :  { %382 = vst.msk [vmem:[#allocation3 + $0x38] sm:$0xff] %vm342_vm2, %v377_v17 }
 0x151   :  { %v460_v18 = vpop.permute.xlu2 %459  ;;  %v365_v19 = vpop.permute.xlu1 %364 }
 0x152   :  { %v480_v20 = vpop.permute.xlu0 %479  ;;  %466 = vst.msk [vmem:[#allocation3 + $0xb0] sm:$0xff] %vm342_vm2, %v460_v18  ;;  %v368_v21 = vsel %vm366_vm3, %v363_v14, %v365_v19  ;;  %v757_v14 = vsel %vm551_vm7, %v756_v3, %v755_v1 }
 0x153   :  { %373 = vst.msk [vmem:[#allocation3 + $0x28] sm:$0xff] %vm342_vm2, %v368_v21 }
 0x159   :  { %v434_v22 = vpop.permute.xlu2 %433  ;;  %v469_v23 = vpop.permute.xlu1 %468 }
 0x15a   :  { %v504_v24 = vpop.permute.xlu0 %503  ;;  %440 = vst.msk [vmem:[#allocation3 + $0x90] sm:$0xff] %vm342_vm2, %v434_v22 }
 0x15b   :  { %510 = vst.msk [vmem:[#allocation3 + $0xf0] sm:$0xff] %vm342_vm2, %v504_v24 }
 0x15c   :  { %475 = vst.msk [vmem:[#allocation3 + $0xc0] sm:$0xff] %vm342_vm2, %v469_v23 }
 0x161   :  { %v471_v25 = vpop.permute.xlu2 %470  ;;  %v482_v26 = vpop.permute.xlu1 %481  ;;  %v729_v43 = vld [vmem:[#allocation3 + $0x92] sm:$0x1]  ;;  %v628_v44 = vld [vmem:[#allocation3 + $0x91] sm:$0x1] }
 0x162   :  { %v420_v27 = vpop.permute.xlu0 %419  ;;  %476 = vst.msk [vmem:[#allocation3 + $0xc8] sm:$0xff] %vm342_vm2, %v471_v25  ;;  %v487_v28 = vsel %vm402_vm4, %v480_v20, %v482_v26  ;;  %v2544_v55 = vld [vmem:[#allocation3 + $0xf1] sm:$0x1]  ;;  %v766_v57 = vrot.slane %v729_v43, 7  ;;  %v665_v63 = vrot.slane %v628_v44, 7 }
 0x163   :  { %426 = vst.msk [vmem:[#allocation3 + $0x70] sm:$0xff] %vm342_vm2, %v420_v27  ;;  %v732_v48 = vld [vmem:[#allocation3 + $0xc2] sm:$0x1]  ;;  %v631_v54 = vld [vmem:[#allocation3 + $0xc1] sm:$0x1] }
 0x164   :  { %492 = vst.msk [vmem:[#allocation3 + $0xd0] sm:$0xff] %vm342_vm2, %v487_v28  ;;  %v759_v28 = vsel %vm554_vm8, %v758_v10, %v757_v14  ;;  %v671_v4 = vrot.slane %v631_v54, 4  ;;  %v923_v54 = vld [vmem:[#allocation3 + $0x14] sm:$0x1] }
 0x169   :  { %v484_v29 = vpop.permute.xlu2 %483  ;;  %v495_v30 = vpop.permute.xlu1 %494 }
 0x16a   :  { %v462_v31 = vpop.permute.xlu0 %461  ;;  %501 = vst.msk [vmem:[#allocation3 + $0xe0] sm:$0xff] %vm342_vm2, %v495_v30  ;;  %v727_v9 = vld [vmem:[#allocation3 + $0x72] sm:$0x1]  ;;  %v626_v18 = vld [vmem:[#allocation3 + $0x71] sm:$0x1] }
 0x16b   :  { %467 = vst.msk [vmem:[#allocation3 + $0xb8] sm:$0xff] %vm342_vm2, %v462_v31  ;;  %v764_v23 = vrot.slane %v727_v9, 1  ;;  %v519_v24 = vld [vmem:[#allocation3 + $0x70] sm:$0x1]  ;;  %v663_v37 = vrot.slane %v626_v18, 1 }
 0x16c   :  { %v562_v42 = vrot.slane %v519_v24, 1  ;;  %v733_v3 = vld [vmem:[#allocation3 + $0xd2] sm:$0x1]  ;;  %v632_v10 = vld [vmem:[#allocation3 + $0xd1] sm:$0x1] }
 0x16d   :  { %v774_v24 = vrot.slane %v733_v3, 3  ;;  %v922_v3 = vld [vmem:[#allocation3 + $0x4] sm:$0x1] }
 0x171   :  { %v497_v32 = vpop.permute.xlu2 %496  ;;  %v397_v33 = vpop.permute.xlu1 %396  ;;  %v734_v9 = vld [vmem:[#allocation3 + $0xe2] sm:$0x1] }
 0x172   :  { %v486_v34 = vpop.permute.xlu0 %485  ;;  %502 = vst.msk [vmem:[#allocation3 + $0xe8] sm:$0xff] %vm342_vm2, %v497_v32  ;;  %v403_v35 = vsel %vm402_vm4, %v395_v11, %v397_v33  ;;  %v657_v11 = vrot.slane %v623_v62, 4  ;;  %v2525_v33 = vld [vmem:[#allocation3 + $0xb2] sm:$0x1] }
 0x173   :  { %v488_v38 = vsel %vm402_vm4, %v484_v29, %v486_v34  ;;  %408 = vst.msk [vmem:[#allocation3 + $0x50] sm:$0xff] %vm342_vm2, %v403_v35  ;;  %v2527_v34 = vld [vmem:[#allocation3 + $0xb1] sm:$0x1]  ;;  %v770_v58 = vrot.slane %v2525_v33, 5 }
 0x174   :  { %493 = vst.msk [vmem:[#allocation3 + $0xd8] sm:$0xff] %vm342_vm2, %v488_v38  ;;  %v658_v30 = vsel %vm554_vm8, %v657_v11, %v656_v16  ;;  %v520_v11 = vld [vmem:[#allocation3 + $0x80] sm:$0x1]  ;;  %v767_v16 = vsel %vm545_vm5, %v766_v57, %v728_v60  ;;  %v924_v57 = vld [vmem:[#allocation3 + $0x24] sm:$0x1] }
 0x175   :  { %v823_v60 = vld [vmem:[#allocation3 + $0x23] sm:$0x1] }
 0x179   :  { %v413_v49 = vpop.permute.xlu2 %412  ;;  %v411_v50 = vpop.permute.xlu1 %410 }
 0x17a   :  { %v401_v56 = vpop.permute.xlu0 %400  ;;  %418 = vst.msk [vmem:[#allocation3 + $0x68] sm:$0xff] %vm342_vm2, %v413_v49  ;;  %v725_v5 = vld [vmem:[#allocation3 + $0x52] sm:$0x1]  ;;  %v624_v6 = vld [vmem:[#allocation3 + $0x51] sm:$0x1] }
 0x17b   :  { %v404_v61 = vsel %vm402_vm4, %v2482_v12, %v401_v56  ;;  %417 = vst.msk [vmem:[#allocation3 + $0x60] sm:$0xff] %vm342_vm2, %v411_v50  ;;  %v517_v7 = vld [vmem:[#allocation3 + $0x50] sm:$0x1]  ;;  %v550_v12 = vrot.slane %v515_v59, 5  ;;  %v760_v17 = vrot.slane %v725_v5, 3  ;;  %v659_v19 = vrot.slane %v624_v6, 3 }
 0x17c   :  { %409 = vst.msk [vmem:[#allocation3 + $0x58] sm:$0xff] %vm342_vm2, %v404_v61  ;;  %v556_v21 = vrot.slane %v517_v7, 3  ;;  %v2539_v49 = vld [vmem:[#allocation3 + $0xf2] sm:$0x1]  ;;  %v521_v50 = vld [vmem:[#allocation3 + $0x90] sm:$0x1] }
 0x17d   :  { %v552_v20 = vsel %vm551_vm7, %v550_v12, %v549_v8  ;;  %v761_v39 = vsel %vm557_vm9, %v760_v17, %v759_v28  ;;  %v660_v40 = vsel %vm557_vm9, %v659_v19, %v658_v30  ;;  %v524_v56 = vld [vmem:[#allocation3 + $0xc0] sm:$0x1]  ;;  %v669_v59 = vrot.slane %v2527_v34, 5  ;;  %v525_v12 = vld [vmem:[#allocation3 + $0xd0] sm:$0x1] }
 0x17e   :  { %v555_v32 = vsel %vm554_vm8, %v553_v13, %v552_v20  ;;  %v772_v61 = vrot.slane %v732_v48, 4  ;;  %v778_v62 = vrot.slane %v2539_v49, 1  ;;  %v677_v5 = vrot.slane %v2544_v55, 1  ;;  %v633_v20 = vld [vmem:[#allocation3 + $0xe1] sm:$0x1] }
 0x17f   :  { %v558_v41 = vsel %vm557_vm9, %v556_v21, %v555_v32  ;;  %v565_v6 = vrot.slane %v521_v50, 7  ;;  %v571_v7 = vrot.slane %v524_v56, 4  ;;  %v666_v21 = vsel %vm545_vm5, %v665_v63, %v627_v2  ;;  %v527_v32 = vld [vmem:[#allocation3 + $0xf0] sm:$0x1]  ;;  %v822_v55 = vld [vmem:[#allocation3 + $0x13] sm:$0x1] }
 0x180   :  { %v573_v28 = vrot.slane %v525_v12, 3  ;;  %v776_v30 = vrot.slane %v734_v9, 2  ;;  %v1025_v56 = vld [vmem:[#allocation3 + $0x25] sm:$0x1]  ;;  %v824_v63 = vld [vmem:[#allocation3 + $0x33] sm:$0x1] }
 0x181   :  { %v445_v22 = vpop.permute.xlu1 %444  ;;  %v1057_v2 = vrot.slane %v1025_v56, 6  ;;  %v857_v12 = vrot.slane %v824_v63, 5 }
 0x182   :  { %v436_v25 = vpop.permute.xlu0 %435  ;;  %v452_v26 = vsel %vm366_vm3, %v445_v22, %v2485_v15  ;;  %v726_v27 = vld [vmem:[#allocation3 + $0x62] sm:$0x1]  ;;  %v625_v29 = vld [vmem:[#allocation3 + $0x61] sm:$0x1]  ;;  %v518_v31 = vld [vmem:[#allocation3 + $0x60] sm:$0x1] }
 0x183   :  { %441 = vst.msk [vmem:[#allocation3 + $0x98] sm:$0xff] %vm342_vm2, %v436_v25  ;;  %v762_v35 = vrot.slane %v726_v27, 2  ;;  %v661_v36 = vrot.slane %v625_v29, 2  ;;  %v559_v38 = vrot.slane %v518_v31, 2  ;;  %v2530_v15 = vld [vmem:[#allocation3 + $0xb0] sm:$0x1]  ;;  %v566_v27 = vsel %vm545_vm5, %v565_v6, %v520_v11 }
 0x184   :  { %457 = vst.msk [vmem:[#allocation3 + $0xa0] sm:$0xff] %vm342_vm2, %v452_v26  ;;  %v569_v0 = vrot.slane %v2530_v15, 5  ;;  %v673_v25 = vrot.slane %v632_v10, 3  ;;  %v526_v26 = vld [vmem:[#allocation3 + $0xe0] sm:$0x1] }
 0x185   :  { %v763_v45 = vsel %vm560_vm10, %v762_v35, %v761_v39  ;;  %v662_v46 = vsel %vm560_vm10, %v661_v36, %v660_v40  ;;  %v561_v47 = vsel %vm560_vm10, %v559_v38, %v558_v41  ;;  %v675_v36 = vrot.slane %v633_v20, 2  ;;  %v821_v6 = vld [vmem:[#allocation3 + $0x3] sm:$0x1]  ;;  %v2579_v10 = vld [vmem:[#allocation3 + $0x44] sm:$0x1] }
 0x186   :  { %v765_v51 = vsel %vm563_vm11, %v764_v23, %v763_v45  ;;  %v664_v52 = vsel %vm563_vm11, %v663_v37, %v662_v46  ;;  %v564_v53 = vsel %vm563_vm11, %v562_v42, %v561_v47  ;;  %v575_v40 = vrot.slane %v526_v26, 2  ;;  %v933_v20 = vld [vmem:[#allocation3 + $0xb4] sm:$0x1] }
 0x187   :  { %782 = vxpose.xlu1.b32.start [1/2] (short) (narrow) %v765_v51, 48  ;;  %681 = vxpose.xlu0.b32.start [1/2] (short) (narrow) %v664_v52, 48  ;;  %v577_v45 = vrot.slane %v527_v32, 1  ;;  %v832_v32 = vld [vmem:[#allocation3 + $0xb3] sm:$0x1] }
 0x188   :  { %581 = vxpose.xlu2.b32.start [1/2] (short) (narrow) %v564_v53, 48  ;;  %v1024_v53 = vld [vmem:[#allocation3 + $0x15] sm:$0x1] }
 0x189   :  { %v451_v1 = vpop.permute.xlu1 %450 }
 0x18a   :  { %v449_v8 = vpop.permute.xlu0 %448 }
 0x18b   :  { %v453_v13 = vsel %vm366_vm3, %v449_v8, %v451_v1  ;;  %v730_v14 = vld [vmem:[#allocation3 + $0xa2] sm:$0x1]  ;;  %v629_v17 = vld [vmem:[#allocation3 + $0xa1] sm:$0x1]  ;;  %v522_v18 = vld [vmem:[#allocation3 + $0xa0] sm:$0x1] }
 0x18c   :  { %458 = vst.msk [vmem:[#allocation3 + $0xa8] sm:$0xff] %vm342_vm2, %v453_v13  ;;  %v768_v19 = vrot.slane %v730_v14, 6  ;;  %v667_v22 = vrot.slane %v629_v17, 6  ;;  %v567_v23 = vrot.slane %v522_v18, 6  ;;  %v1023_v1 = vld [vmem:[#allocation3 + $0x5] sm:$0x1] }
 0x18d   :  { %v2576_v8 = vld [vmem:[#allocation3 + $0x45] sm:$0x1]  ;;  %v825_v14 = vld [vmem:[#allocation3 + $0x43] sm:$0x1]  ;;  %v1032_v17 = vld [vmem:[#allocation3 + $0x95] sm:$0x1] }
 0x18e   :  { %v769_v29 = vsel %vm548_vm6, %v768_v19, %v767_v16  ;;  %v668_v31 = vsel %vm548_vm6, %v667_v22, %v666_v21  ;;  %v568_v33 = vsel %vm548_vm6, %v567_v23, %v566_v27  ;;  %v931_v18 = vld [vmem:[#allocation3 + $0x94] sm:$0x1]  ;;  %v1034_v19 = vld [vmem:[#allocation3 + $0xb5] sm:$0x1]  ;;  %v830_v21 = vld [vmem:[#allocation3 + $0x93] sm:$0x1] }
 0x18f   :  { %v771_v34 = vsel %vm551_vm7, %v770_v58, %v769_v29  ;;  %v670_v35 = vsel %vm551_vm7, %v669_v59, %v668_v31  ;;  %v570_v37 = vsel %vm551_vm7, %v569_v0, %v568_v33  ;;  %v1026_v58 = vld [vmem:[#allocation3 + $0x35] sm:$0x1]  ;;  %v1055_v59 = vrot.slane %v1024_v53, 7  ;;  %v932_v26 = vld [vmem:[#allocation3 + $0xa4] sm:$0x1] }
 0x190   :  { %v773_v38 = vsel %vm554_vm8, %v772_v61, %v771_v34  ;;  %v672_v15 = vsel %vm554_vm8, %v671_v4, %v670_v35  ;;  %v572_v39 = vsel %vm554_vm8, %v571_v7, %v570_v37  ;;  %v925_v61 = vld [vmem:[#allocation3 + $0x34] sm:$0x1]  ;;  %v853_v0 = vrot.slane %v822_v55, 7  ;;  %v831_v31 = vld [vmem:[#allocation3 + $0xa3] sm:$0x1] }
 0x191   :  { %v506_v41 = vpop.permute.xlu1 %505  ;;  %v775_v42 = vsel %vm557_vm9, %v774_v24, %v773_v38  ;;  %v674_v43 = vsel %vm557_vm9, %v673_v25, %v672_v15  ;;  %v574_v44 = vsel %vm557_vm9, %v573_v28, %v572_v39  ;;  %v1059_v4 = vrot.slane %v1026_v58, 5  ;;  %v1033_v25 = vld [vmem:[#allocation3 + $0xa5] sm:$0x1]  ;;  %v1028_v33 = vld [vmem:[#allocation3 + $0x55] sm:$0x1] }
 0x192   :  { %511 = vst.msk [vmem:[#allocation3 + $0xf8] sm:$0xff] %vm342_vm2, %v506_v41  ;;  %v777_v46 = vsel %vm560_vm10, %v776_v30, %v775_v42  ;;  %v676_v47 = vsel %vm560_vm10, %v675_v36, %v674_v43  ;;  %v576_v48 = vsel %vm560_vm10, %v575_v40, %v574_v44  ;;  %v855_v7 = vrot.slane %v823_v60, 6  ;;  %v1031_v35 = vld [vmem:[#allocation3 + $0x85] sm:$0x1]  ;;  %v930_v37 = vld [vmem:[#allocation3 + $0x84] sm:$0x1] }
 0x193   :  { %v779_v49 = vsel %vm563_vm11, %v778_v62, %v777_v46  ;;  %v678_v50 = vsel %vm563_vm11, %v677_v5, %v676_v47  ;;  %v578_v51 = vsel %vm563_vm11, %v577_v45, %v576_v48  ;;  %v954_v62 = vrot.slane %v923_v54, 7  ;;  %v927_v39 = vld [vmem:[#allocation3 + $0x54] sm:$0x1]  ;;  %v826_v40 = vld [vmem:[#allocation3 + $0x53] sm:$0x1] }
 0x194   :  { %783 = vxpose.xlu1.b32.end [2/2] (short) (narrow) %v779_v49, 48  ;;  %682 = vxpose.xlu0.b32.end [2/2] (short) (narrow) %v678_v50, 48  ;;  %v956_v5 = vrot.slane %v924_v57, 6  ;;  %v1056_v9 = vsel %vm545_vm5, %v1055_v59, %v1023_v1  ;;  %v958_v11 = vrot.slane %v925_v61, 5  ;;  %v854_v16 = vsel %vm545_vm5, %v853_v0, %v821_v6  ;;  %v829_v43 = vld [vmem:[#allocation3 + $0x83] sm:$0x1] }
 0x195   :  { %582 = vxpose.xlu2.b32.end [2/2] (short) (narrow) %v578_v51, 48  ;;  %v955_v13 = vsel %vm545_vm5, %v954_v62, %v922_v3  ;;  %v1058_v22 = vsel %vm548_vm6, %v1057_v2, %v1056_v9  ;;  %v1061_v23 = vrot.slane %v2576_v8, 4  ;;  %v960_v24 = vrot.slane %v2579_v10, 4  ;;  %v1029_v44 = vld [vmem:[#allocation3 + $0x65] sm:$0x1] }
 0x196   :  { %v957_v27 = vsel %vm548_vm6, %v956_v5, %v955_v13  ;;  %v856_v28 = vsel %vm548_vm6, %v855_v7, %v854_v16  ;;  %v1069_v29 = vrot.slane %v1032_v17, 7  ;;  %v968_v30 = vrot.slane %v931_v18, 7  ;;  %v928_v46 = vld [vmem:[#allocation3 + $0x64] sm:$0x1]  ;;  %v827_v50 = vld [vmem:[#allocation3 + $0x63] sm:$0x1] }
 0x197   :  { %v859_v34 = vrot.slane %v825_v14, 4  ;;  %v1073_v36 = vrot.slane %v1034_v19, 5  ;;  %v972_v38 = vrot.slane %v933_v20, 5  ;;  %v867_v15 = vrot.slane %v830_v21, 7  ;;  %v934_v54 = vld [vmem:[#allocation3 + $0xc4] sm:$0x1] }
 0x198   :  { %v1071_v41 = vrot.slane %v1033_v25, 6  ;;  %v970_v42 = vrot.slane %v932_v26, 6  ;;  %v1060_v45 = vsel %vm551_vm7, %v1059_v4, %v1058_v22  ;;  %v869_v47 = vrot.slane %v831_v31, 6  ;;  %v1030_v4 = vld [vmem:[#allocation3 + $0x75] sm:$0x1] }
 0x199   :  { %v422_v52 = vpop.permute.xlu1 %421  ;;  %v871_v48 = vrot.slane %v832_v32, 5  ;;  %v959_v49 = vsel %vm551_vm7, %v958_v11, %v957_v27  ;;  %v858_v51 = vsel %vm551_vm7, %v857_v12, %v856_v28  ;;  %v1070_v53 = vsel %vm545_vm5, %v1069_v29, %v1031_v35  ;;  %v929_v6 = vld [vmem:[#allocation3 + $0x74] sm:$0x1]  ;;  %v833_v9 = vld [vmem:[#allocation3 + $0xc3] sm:$0x1] }
 0x19a   :  { %427 = vst.msk [vmem:[#allocation3 + $0x78] sm:$0xff] %vm342_vm2, %v422_v52  ;;  %v1035_v52 = vld [vmem:[#allocation3 + $0xc5] sm:$0x1]  ;;  %v969_v55 = vsel %vm545_vm5, %v968_v30, %v930_v37  ;;  %v1063_v56 = vrot.slane %v1028_v33, 3  ;;  %v962_v57 = vrot.slane %v927_v39, 3  ;;  %v861_v58 = vrot.slane %v826_v40, 3 }
 0x19b   :  { %v868_v59 = vsel %vm545_vm5, %v867_v15, %v829_v43  ;;  %v1065_v60 = vrot.slane %v1029_v44, 2  ;;  %v964_v61 = vrot.slane %v928_v46, 2  ;;  %v1072_v62 = vsel %vm548_vm6, %v1071_v41, %v1070_v53  ;;  %v828_v12 = vld [vmem:[#allocation3 + $0x73] sm:$0x1]  ;;  %v1036_v13 = vld [vmem:[#allocation3 + $0xd5] sm:$0x1] }
 0x19c   :  { %v971_v63 = vsel %vm548_vm6, %v970_v42, %v969_v55  ;;  %v863_v0 = vrot.slane %v827_v50, 2  ;;  %v1075_v1 = vrot.slane %v1035_v52, 4  ;;  %v974_v3 = vrot.slane %v934_v54, 4  ;;  %v935_v20 = vld [vmem:[#allocation3 + $0xd4] sm:$0x1] }
 0x19d   :  { %v870_v2 = vsel %vm548_vm6, %v869_v47, %v868_v59  ;;  %v1062_v5 = vsel %vm554_vm8, %v1061_v23, %v1060_v45  ;;  %v961_v7 = vsel %vm554_vm8, %v960_v24, %v959_v49  ;;  %v860_v8 = vsel %vm554_vm8, %v859_v34, %v858_v51  ;;  %v834_v25 = vld [vmem:[#allocation3 + $0xd3] sm:$0x1]  ;;  %v1037_v33 = vld [vmem:[#allocation3 + $0xe5] sm:$0x1]  ;;  %v936_v34 = vld [vmem:[#allocation3 + $0xe4] sm:$0x1] }
 0x19e   :  { %v1064_v10 = vsel %vm557_vm9, %v1063_v56, %v1062_v5  ;;  %v963_v11 = vsel %vm557_vm9, %v962_v57, %v961_v7  ;;  %v1074_v14 = vsel %vm551_vm7, %v1073_v36, %v1072_v62  ;;  %v973_v16 = vsel %vm551_vm7, %v972_v38, %v971_v63  ;;  %v835_v38 = vld [vmem:[#allocation3 + $0xe3] sm:$0x1]  ;;  %v1038_v41 = vld [vmem:[#allocation3 + $0xf5] sm:$0x1]  ;;  %v937_v43 = vld [vmem:[#allocation3 + $0xf4] sm:$0x1] }
 0x19f   :  { %v1066_v17 = vsel %vm560_vm10, %v1065_v60, %v1064_v10  ;;  %v965_v18 = vsel %vm560_vm10, %v964_v61, %v963_v11  ;;  %v862_v19 = vsel %vm557_vm9, %v861_v58, %v860_v8  ;;  %v872_v21 = vsel %vm551_vm7, %v871_v48, %v870_v2  ;;  %v836_v46 = vld [vmem:[#allocation3 + $0xf3] sm:$0x1]  ;;  %v1226_v57 = vld [vmem:[#allocation3 + $0x17] sm:$0x1]  ;;  %v1125_v58 = vld [vmem:[#allocation3 + $0x16] sm:$0x1] }
 0x1a0   :  { %v1067_v22 = vrot.slane %v1030_v4, 1  ;;  %v966_v23 = vrot.slane %v929_v6, 1  ;;  %v864_v24 = vsel %vm560_vm10, %v863_v0, %v862_v19  ;;  %v873_v26 = vrot.slane %v833_v9, 4  ;;  %v1227_v59 = vld [vmem:[#allocation3 + $0x27] sm:$0x1] }
 0x1a1   :  { %v865_v27 = vrot.slane %v828_v12, 1  ;;  %v1076_v28 = vsel %vm554_vm8, %v1075_v1, %v1074_v14  ;;  %v1077_v29 = vrot.slane %v1036_v13, 3  ;;  %v975_v30 = vsel %vm554_vm8, %v974_v3, %v973_v16  ;;  %v1327_v62 = vld [vmem:[#allocation3 + $0x18] sm:$0x1]  ;;  %v1225_v63 = vld [vmem:[#allocation3 + $0x7] sm:$0x1] }
 0x1a2   :  { %v1068_v31 = vsel %vm563_vm11, %v1067_v22, %v1066_v17  ;;  %v967_v32 = vsel %vm563_vm11, %v966_v23, %v965_v18  ;;  %v976_v35 = vrot.slane %v935_v20, 3  ;;  %v874_v36 = vsel %vm554_vm8, %v873_v26, %v872_v21  ;;  %v1126_v0 = vld [vmem:[#allocation3 + $0x26] sm:$0x1]  ;;  %v1328_v1 = vld [vmem:[#allocation3 + $0x28] sm:$0x1] }
 0x1a3   :  { %v866_v37 = vsel %vm563_vm11, %v865_v27, %v864_v24  ;;  %v875_v15 = vrot.slane %v834_v25, 3  ;;  %v1078_v39 = vsel %vm557_vm9, %v1077_v29, %v1076_v28  ;;  %v1079_v42 = vrot.slane %v1037_v33, 2  ;;  %v1228_v3 = vld [vmem:[#allocation3 + $0x37] sm:$0x1]  ;;  %v1124_v2 = vld [vmem:[#allocation3 + $0x6] sm:$0x1] }
 0x1a4   :  { %v977_v40 = vsel %vm557_vm9, %v976_v35, %v975_v30  ;;  %v978_v44 = vrot.slane %v936_v34, 2  ;;  %v877_v47 = vrot.slane %v835_v38, 2  ;;  %v1081_v50 = vrot.slane %v1038_v41, 1  ;;  %v2624_v4 = vld [vmem:[#allocation3 + $0x48] sm:$0x1] }
 0x1a5   :  { %v876_v45 = vsel %vm557_vm9, %v875_v15, %v874_v36  ;;  %v1080_v48 = vsel %vm560_vm10, %v1079_v42, %v1078_v39  ;;  %v980_v51 = vrot.slane %v937_v43, 1  ;;  %v879_v53 = vrot.slane %v836_v46, 1  ;;  %v1127_v6 = vld [vmem:[#allocation3 + $0x36] sm:$0x1]  ;;  %v1229_v8 = vld [vmem:[#allocation3 + $0x47] sm:$0x1] }
 0x1a6   :  { %v979_v49 = vsel %vm560_vm10, %v978_v44, %v977_v40  ;;  %v878_v52 = vsel %vm560_vm10, %v877_v47, %v876_v45  ;;  %v1082_v54 = vsel %vm563_vm11, %v1081_v50, %v1080_v48  ;;  %v1257_v60 = vrot.slane %v1226_v57, 7  ;;  %v1128_v10 = vld [vmem:[#allocation3 + $0x46] sm:$0x1]  ;;  %v1326_v13 = vld [vmem:[#allocation3 + $0x8] sm:$0x1] }
 0x1a7   :  { %v981_v55 = vsel %vm563_vm11, %v980_v51, %v979_v49  ;;  %v880_v56 = vsel %vm563_vm11, %v879_v53, %v878_v52  ;;  %v1156_v61 = vrot.slane %v1125_v58, 7  ;;  %v1259_v5 = vrot.slane %v1227_v59, 6  ;;  %v1329_v14 = vld [vmem:[#allocation3 + $0x38] sm:$0x1]  ;;  %v1234_v18 = vld [vmem:[#allocation3 + $0x97] sm:$0x1] }
 0x1a8   :  { %v1358_v7 = vrot.slane %v1327_v62, 7  ;;  %v1258_v9 = vsel %vm545_vm5, %v1257_v60, %v1225_v63  ;;  %v1158_v12 = vrot.slane %v1126_v0, 6  ;;  %v1360_v16 = vrot.slane %v1328_v1, 6  ;;  %v1235_v21 = vld [vmem:[#allocation3 + $0xa7] sm:$0x1] }
 0x1a9   :  { %v1157_v11 = vsel %vm545_vm5, %v1156_v61, %v1124_v2  ;;  %v1261_v17 = vrot.slane %v1228_v3, 5  ;;  %v1364_v19 = vrot.slane %v2624_v4, 4  ;;  %v1160_v20 = vrot.slane %v1127_v6, 5  ;;  %v1133_v22 = vld [vmem:[#allocation3 + $0x96] sm:$0x1] }
 0x1aa   :  { %v1260_v23 = vsel %vm548_vm6, %v1259_v5, %v1258_v9  ;;  %v1263_v24 = vrot.slane %v1229_v8, 4  ;;  %v1159_v25 = vsel %vm548_vm6, %v1158_v12, %v1157_v11  ;;  %v1162_v26 = vrot.slane %v1128_v10, 4  ;;  %v1335_v27 = vld [vmem:[#allocation3 + $0x98] sm:$0x1]  ;;  %v1134_v28 = vld [vmem:[#allocation3 + $0xa6] sm:$0x1] }
 0x1ab   :  { %v1359_v29 = vsel %vm545_vm5, %v1358_v7, %v1326_v13  ;;  %v1362_v30 = vrot.slane %v1329_v14, 5  ;;  %v1271_v33 = vrot.slane %v1234_v18, 7  ;;  %v1331_v34 = vld [vmem:[#allocation3 + $0x58] sm:$0x1]  ;;  %v1230_v36 = vld [vmem:[#allocation3 + $0x57] sm:$0x1]  ;;  %v1262_v40 = vsel %vm551_vm7, %v1261_v17, %v1260_v23 }
 0x1ac   :  { %v1361_v35 = vsel %vm548_vm6, %v1360_v16, %v1359_v29  ;;  %v1273_v38 = vrot.slane %v1235_v21, 6  ;;  %v1170_v15 = vrot.slane %v1133_v22, 7  ;;  %v1231_v39 = vld [vmem:[#allocation3 + $0x67] sm:$0x1]  ;;  %v1129_v41 = vld [vmem:[#allocation3 + $0x56] sm:$0x1]  ;;  %v1161_v42 = vsel %vm551_vm7, %v1160_v20, %v1159_v25 }
 0x1ad   :  { %v1372_v43 = vrot.slane %v1335_v27, 7  ;;  %v1132_v44 = vld [vmem:[#allocation3 + $0x86] sm:$0x1]  ;;  %v1172_v45 = vrot.slane %v1134_v28, 6  ;;  %v1264_v46 = vsel %vm554_vm8, %v1263_v24, %v1262_v40  ;;  %v1163_v48 = vsel %vm554_vm8, %v1162_v26, %v1161_v42  ;;  %v1135_v51 = vld [vmem:[#allocation3 + $0xb6] sm:$0x1] }
 0x1ae   :  { %v1130_v47 = vld [vmem:[#allocation3 + $0x66] sm:$0x1]  ;;  %v1363_v52 = vsel %vm551_vm7, %v1362_v30, %v1361_v35  ;;  %v1366_v53 = vrot.slane %v1331_v34, 3  ;;  %v1333_v58 = vld [vmem:[#allocation3 + $0x78] sm:$0x1]  ;;  %v1267_v59 = vrot.slane %v1231_v39, 2  ;;  %v1171_v63 = vsel %vm545_vm5, %v1170_v15, %v1132_v44 }
 0x1af   :  { %v1164_v60 = vrot.slane %v1129_v41, 3  ;;  %v1334_v61 = vld [vmem:[#allocation3 + $0x88] sm:$0x1]  ;;  %v1166_v1 = vrot.slane %v1130_v47, 2  ;;  %v1173_v2 = vsel %vm548_vm6, %v1172_v45, %v1171_v63  ;;  %v1174_v4 = vrot.slane %v1135_v51, 5 }
 0x1b0   :  { %v1332_v0 = vld [vmem:[#allocation3 + $0x68] sm:$0x1]  ;;  %v1373_v3 = vsel %vm545_vm5, %v1372_v43, %v1334_v61  ;;  %v1365_v5 = vsel %vm554_vm8, %v1364_v19, %v1363_v52  ;;  %v1232_v6 = vld [vmem:[#allocation3 + $0x77] sm:$0x1]  ;;  %v1136_v10 = vld [vmem:[#allocation3 + $0xc6] sm:$0x1] }
 0x1b1   :  { %v1367_v11 = vsel %vm557_vm9, %v1366_v53, %v1365_v5  ;;  %v1370_v12 = vrot.slane %v1333_v58, 1  ;;  %v1131_v14 = vld [vmem:[#allocation3 + $0x76] sm:$0x1]  ;;  %v1338_v16 = vld [vmem:[#allocation3 + $0xc8] sm:$0x1]  ;;  %v1368_v18 = vrot.slane %v1332_v0, 2  ;;  %v1165_v19 = vsel %vm557_vm9, %v1164_v60, %v1163_v48 }
 0x1b2   :  { %v1238_v21 = vld [vmem:[#allocation3 + $0xd7] sm:$0x1]  ;;  %v1175_v22 = vsel %vm551_vm7, %v1174_v4, %v1173_v2  ;;  %v1269_v23 = vrot.slane %v1232_v6, 1  ;;  %v1167_v24 = vsel %vm560_vm10, %v1166_v1, %v1165_v19  ;;  %v1137_v26 = vld [vmem:[#allocation3 + $0xd6] sm:$0x1]  ;;  %v1176_v27 = vrot.slane %v1136_v10, 4 }
 0x1b3   :  { %v1369_v28 = vsel %vm560_vm10, %v1368_v18, %v1367_v11  ;;  %v1168_v29 = vrot.slane %v1131_v14, 1  ;;  %v1339_v30 = vld [vmem:[#allocation3 + $0xd8] sm:$0x1]  ;;  %v1239_v35 = vld [vmem:[#allocation3 + $0xe7] sm:$0x1]  ;;  %v1178_v41 = vrot.slane %v1137_v26, 3 }
 0x1b4   :  { %v1341_v39 = vld [vmem:[#allocation3 + $0xf8] sm:$0x1]  ;;  %v1340_v42 = vld [vmem:[#allocation3 + $0xe8] sm:$0x1]  ;;  %v1380_v43 = vrot.slane %v1339_v30, 3 }
 0x1b5   :  { %v1169_v15 = vsel %vm563_vm11, %v1168_v29, %v1167_v24  ;;  %v1240_v45 = vld [vmem:[#allocation3 + $0xf7] sm:$0x1]  ;;  %v1382_v52 = vrot.slane %v1340_v42, 2  ;;  %v1630_v61 = vld [vmem:[#allocation3 + $0x1b] sm:$0x1] }
 0x1b6   :  { %v1661_v63 = vrot.slane %v1630_v61, 7  ;;  %v1529_v0 = vld [vmem:[#allocation3 + $0x1a] sm:$0x1]  ;;  %v1428_v2 = vld [vmem:[#allocation3 + $0x19] sm:$0x1] }
 0x1b7   :  { %v1429_v4 = vld [vmem:[#allocation3 + $0x29] sm:$0x1]  ;;  %v1629_v5 = vld [vmem:[#allocation3 + $0xb] sm:$0x1]  ;;  %v1632_v6 = vld [vmem:[#allocation3 + $0x3b] sm:$0x1] }
 0x1b8   :  { %v1532_v10 = vld [vmem:[#allocation3 + $0x4a] sm:$0x1]  ;;  %v1634_v18 = vld [vmem:[#allocation3 + $0x5b] sm:$0x1]  ;;  %v1430_v19 = vld [vmem:[#allocation3 + $0x39] sm:$0x1] }
 0x1b9   :  { %v1528_v14 = vld [vmem:[#allocation3 + $0xa] sm:$0x1]  ;;  %v1427_v24 = vld [vmem:[#allocation3 + $0x9] sm:$0x1]  ;;  %v1669_v30 = vrot.slane %v1634_v18, 3 }
 0x1ba   :  { %v1432_v42 = vld [vmem:[#allocation3 + $0x59] sm:$0x1]  ;;  %v1535_v61 = vld [vmem:[#allocation3 + $0x7a] sm:$0x1]  ;;  %v1439_v18 = vld [vmem:[#allocation3 + $0xc9] sm:$0x1] }
 0x1bc   :  { %1085 = vxpose.xlu1.b32.start [1/2] (short) (narrow) %v1068_v31, 48  ;;  %984 = vxpose.xlu0.b32.start [1/2] (short) (narrow) %v967_v32, 48  ;;  %v1336_v31 = vld [vmem:[#allocation3 + $0xa8] sm:$0x1]  ;;  %v1236_v32 = vld [vmem:[#allocation3 + $0xb7] sm:$0x1] }
 0x1bd   :  { %883 = vxpose.xlu2.b32.start [1/2] (short) (narrow) %v866_v37, 48  ;;  %v1233_v37 = vld [vmem:[#allocation3 + $0x87] sm:$0x1]  ;;  %v1374_v49 = vrot.slane %v1336_v31, 6  ;;  %v1275_v50 = vrot.slane %v1236_v32, 5  ;;  %v1378_v31 = vrot.slane %v1338_v16, 4 }
 0x1be   :  { %v1272_v57 = vsel %vm545_vm5, %v1271_v33, %v1233_v37  ;;  %v1371_v33 = vsel %vm563_vm11, %v1370_v12, %v1369_v28  ;;  %v1138_v37 = vld [vmem:[#allocation3 + $0xe6] sm:$0x1]  ;;  %v1459_v12 = vrot.slane %v1428_v2, 7  ;;  %v1531_v16 = vld [vmem:[#allocation3 + $0x3a] sm:$0x1] }
 0x1bf   :  { %v1274_v62 = vsel %vm548_vm6, %v1273_v38, %v1272_v57  ;;  %v1375_v7 = vsel %vm548_vm6, %v1374_v49, %v1373_v3  ;;  %v1177_v38 = vsel %vm554_vm8, %v1176_v27, %v1175_v22  ;;  %v1384_v49 = vrot.slane %v1341_v39, 1  ;;  %v1530_v3 = vld [vmem:[#allocation3 + $0x2a] sm:$0x1]  ;;  %v1431_v28 = vld [vmem:[#allocation3 + $0x49] sm:$0x1] }
 0x1c0   :  { %v1276_v17 = vsel %vm551_vm7, %v1275_v50, %v1274_v62  ;;  %v1179_v47 = vsel %vm557_vm9, %v1178_v41, %v1177_v38  ;;  %v1139_v50 = vld [vmem:[#allocation3 + $0xf6] sm:$0x1]  ;;  %v1180_v51 = vrot.slane %v1138_v37, 2  ;;  %v1631_v62 = vld [vmem:[#allocation3 + $0x2b] sm:$0x1]  ;;  %v1562_v11 = vrot.slane %v1530_v3, 6 }
 0x1c1   :  { %v1182_v57 = vrot.slane %v1139_v50, 1  ;;  %v1663_v1 = vrot.slane %v1631_v62, 6  ;;  %v1564_v27 = vrot.slane %v1531_v16, 5  ;;  %v1460_v29 = vsel %vm545_vm5, %v1459_v12, %v1427_v24  ;;  %v1436_v37 = vld [vmem:[#allocation3 + $0x99] sm:$0x1] }
 0x1c2   :  { %v1635_v38 = vld [vmem:[#allocation3 + $0x6b] sm:$0x1]  ;;  %v1533_v39 = vld [vmem:[#allocation3 + $0x5a] sm:$0x1]  ;;  %v1437_v41 = vld [vmem:[#allocation3 + $0xa9] sm:$0x1] }
 0x1c3   :  { %v1434_v3 = vld [vmem:[#allocation3 + $0x79] sm:$0x1]  ;;  %v1572_v16 = vrot.slane %v1535_v61, 1 }
 0x1c4   :  { %1086 = vxpose.xlu1.b32.end [2/2] (short) (narrow) %v1082_v54, 48  ;;  %985 = vxpose.xlu0.b32.end [2/2] (short) (narrow) %v981_v55, 48  ;;  %v1265_v54 = vrot.slane %v1230_v36, 3  ;;  %v1337_v55 = vld [vmem:[#allocation3 + $0xb8] sm:$0x1]  ;;  %v1279_v36 = vrot.slane %v1238_v21, 3 }
 0x1c5   :  { %884 = vxpose.xlu2.b32.end [2/2] (short) (narrow) %v880_v56, 48  ;;  %v1237_v56 = vld [vmem:[#allocation3 + $0xc7] sm:$0x1]  ;;  %v1376_v8 = vrot.slane %v1337_v55, 5  ;;  %v1181_v55 = vsel %vm560_vm10, %v1180_v51, %v1179_v47  ;;  %v1536_v51 = vld [vmem:[#allocation3 + $0x8a] sm:$0x1] }
 0x1c6   :  { %v1277_v9 = vrot.slane %v1237_v56, 4  ;;  %v1266_v13 = vsel %vm557_vm9, %v1265_v54, %v1264_v46  ;;  %v1281_v46 = vrot.slane %v1239_v35, 2  ;;  %v1283_v54 = vrot.slane %v1240_v45, 1  ;;  %v1639_v35 = vld [vmem:[#allocation3 + $0xab] sm:$0x1] }
 0x1c7   :  { %v1268_v20 = vsel %vm560_vm10, %v1267_v59, %v1266_v13  ;;  %v1377_v25 = vsel %vm551_vm7, %v1376_v8, %v1375_v7  ;;  %v1183_v60 = vsel %vm563_vm11, %v1182_v57, %v1181_v55  ;;  %v1560_v7 = vrot.slane %v1529_v0, 7  ;;  %v1633_v8 = vld [vmem:[#allocation3 + $0x4b] sm:$0x1]  ;;  %v1534_v55 = vld [vmem:[#allocation3 + $0x6a] sm:$0x1] }
 0x1c8   :  { %v1278_v32 = vsel %vm554_vm8, %v1277_v9, %v1276_v17  ;;  %v1270_v34 = vsel %vm563_vm11, %v1269_v23, %v1268_v20  ;;  %v1379_v40 = vsel %vm554_vm8, %v1378_v31, %v1377_v25  ;;  %v1662_v9 = vsel %vm545_vm5, %v1661_v63, %v1629_v5  ;;  %v1539_v57 = vld [vmem:[#allocation3 + $0xba] sm:$0x1] }
 0x1c9   :  { %v1280_v44 = vsel %vm557_vm9, %v1279_v36, %v1278_v32  ;;  %v1381_v48 = vsel %vm557_vm9, %v1380_v43, %v1379_v40  ;;  %v1664_v13 = vsel %vm548_vm6, %v1663_v1, %v1662_v9  ;;  %v1461_v17 = vrot.slane %v1429_v4, 6  ;;  %v1538_v36 = vld [vmem:[#allocation3 + $0xaa] sm:$0x1] }
 0x1ca   :  { %v1282_v53 = vsel %vm560_vm10, %v1281_v46, %v1280_v44  ;;  %v1383_v56 = vsel %vm560_vm10, %v1382_v52, %v1381_v48  ;;  %v1665_v20 = vrot.slane %v1632_v6, 5  ;;  %v1667_v21 = vrot.slane %v1633_v8, 4  ;;  %v1637_v48 = vld [vmem:[#allocation3 + $0x8b] sm:$0x1]  ;;  %v1438_v6 = vld [vmem:[#allocation3 + $0xb9] sm:$0x1] }
 0x1cb   :  { %v1385_v58 = vsel %vm563_vm11, %v1384_v49, %v1383_v56  ;;  %v1284_v59 = vsel %vm563_vm11, %v1283_v54, %v1282_v53  ;;  %v1561_v22 = vsel %vm545_vm5, %v1560_v7, %v1528_v14  ;;  %v1566_v23 = vrot.slane %v1532_v10, 4  ;;  %v1640_v49 = vld [vmem:[#allocation3 + $0xbb] sm:$0x1]  ;;  %v1433_v7 = vld [vmem:[#allocation3 + $0x69] sm:$0x1] }
 0x1cc   :  { %v1666_v25 = vsel %vm551_vm7, %v1665_v20, %v1664_v13  ;;  %v1563_v26 = vsel %vm548_vm6, %v1562_v11, %v1561_v22  ;;  %v1462_v31 = vsel %vm548_vm6, %v1461_v17, %v1460_v29  ;;  %v1463_v32 = vrot.slane %v1430_v19, 5  ;;  %v1641_v8 = vld [vmem:[#allocation3 + $0xcb] sm:$0x1]  ;;  %v1540_v17 = vld [vmem:[#allocation3 + $0xca] sm:$0x1] }
 0x1cd   :  { %v1565_v40 = vsel %vm551_vm7, %v1564_v27, %v1563_v26  ;;  %v1465_v44 = vrot.slane %v1431_v28, 4  ;;  %v1677_v50 = vrot.slane %v1639_v35, 6  ;;  %v1576_v52 = vrot.slane %v1538_v36, 6  ;;  %v1642_v29 = vld [vmem:[#allocation3 + $0xdb] sm:$0x1] }
 0x1ce   :  { %v1464_v43 = vsel %vm551_vm7, %v1463_v32, %v1462_v31  ;;  %v1473_v53 = vrot.slane %v1436_v37, 7  ;;  %v1671_v54 = vrot.slane %v1635_v38, 2  ;;  %v1568_v56 = vrot.slane %v1533_v39, 3  ;;  %v1643_v37 = vld [vmem:[#allocation3 + $0xeb] sm:$0x1] }
 0x1cf   :  { %v1567_v62 = vsel %vm554_vm8, %v1566_v23, %v1565_v40  ;;  %v1466_v63 = vsel %vm554_vm8, %v1465_v44, %v1464_v43  ;;  %v1467_v0 = vrot.slane %v1432_v42, 3  ;;  %v1679_v4 = vrot.slane %v1640_v49, 5  ;;  %v1542_v38 = vld [vmem:[#allocation3 + $0xea] sm:$0x1]  ;;  %v1644_v40 = vld [vmem:[#allocation3 + $0xfb] sm:$0x1] }
 0x1d0   :  { %v1578_v11 = vrot.slane %v1539_v57, 5  ;;  %v1569_v14 = vsel %vm557_vm9, %v1568_v56, %v1567_v62  ;;  %v1570_v19 = vrot.slane %v1534_v55, 2  ;;  %v1471_v22 = vrot.slane %v1434_v3, 1  ;;  %v1543_v42 = vld [vmem:[#allocation3 + $0xfa] sm:$0x1] }
 0x1d1   :  { %v1477_v23 = vrot.slane %v1438_v6, 5  ;;  %v1469_v24 = vrot.slane %v1433_v7, 2  ;;  %v1681_v26 = vrot.slane %v1641_v8, 4  ;;  %v1580_v31 = vrot.slane %v1540_v17, 4  ;;  %v1934_v8 = vld [vmem:[#allocation3 + $0x2e] sm:$0x1] }
 0x1d2   :  { %v1571_v28 = vsel %vm560_vm10, %v1570_v19, %v1569_v14  ;;  %v1683_v44 = vrot.slane %v1642_v29, 3  ;;  %v1584_v55 = vrot.slane %v1542_v38, 2  ;;  %v2727_v14 = vld [vmem:[#allocation3 + $0x4e] sm:$0x1]  ;;  %v1966_v17 = vrot.slane %v1934_v8, 6 }
 0x1d3   :  { %v1573_v35 = vsel %vm563_vm11, %v1572_v16, %v1571_v28  ;;  %v2729_v16 = vld [vmem:[#allocation3 + $0x4d] sm:$0x1]  ;;  %v1970_v29 = vrot.slane %v2727_v14, 4  ;;  %v2741_v38 = vld [vmem:[#allocation3 + $0xce] sm:$0x1] }
 0x1d4   :  { %v1939_v8 = vld [vmem:[#allocation3 + $0x7e] sm:$0x1]  ;;  %v1837_v14 = vld [vmem:[#allocation3 + $0x6d] sm:$0x1] }
 0x1ec   :  { %1388 = vxpose.xlu1.b32.start [1/2] (short) (narrow) %v1371_v33, 48  ;;  %1287 = vxpose.xlu0.b32.start [1/2] (short) (narrow) %v1270_v34, 48  ;;  %v1638_v33 = vld [vmem:[#allocation3 + $0x9b] sm:$0x1]  ;;  %v1537_v34 = vld [vmem:[#allocation3 + $0x9a] sm:$0x1] }
 0x1ed   :  { %1186 = vxpose.xlu2.b32.start [1/2] (short) (narrow) %v1169_v15, 48  ;;  %v1668_v15 = vsel %vm554_vm8, %v1667_v21, %v1666_v25  ;;  %v1675_v45 = vrot.slane %v1638_v33, 7  ;;  %v1574_v46 = vrot.slane %v1537_v34, 7  ;;  %v1468_v21 = vsel %vm557_vm9, %v1467_v0, %v1466_v63 }
 0x1ee   :  { %v1670_v47 = vsel %vm557_vm9, %v1669_v30, %v1668_v15  ;;  %v1541_v30 = vld [vmem:[#allocation3 + $0xda] sm:$0x1]  ;;  %v1479_v33 = vrot.slane %v1439_v18, 4  ;;  %v1470_v36 = vsel %vm560_vm10, %v1469_v24, %v1468_v21  ;;  %v1440_v15 = vld [vmem:[#allocation3 + $0xd9] sm:$0x1] }
 0x1ef   :  { %v1672_v1 = vsel %vm560_vm10, %v1671_v54, %v1670_v47  ;;  %v1676_v2 = vsel %vm545_vm5, %v1675_v45, %v1637_v48  ;;  %v1575_v5 = vsel %vm545_vm5, %v1574_v46, %v1536_v51  ;;  %v1472_v39 = vsel %vm563_vm11, %v1471_v22, %v1470_v36  ;;  %v1442_v46 = vld [vmem:[#allocation3 + $0xf9] sm:$0x1]  ;;  %v1441_v48 = vld [vmem:[#allocation3 + $0xe9] sm:$0x1]  ;;  %v1834_v18 = vld [vmem:[#allocation3 + $0x3d] sm:$0x1] }
 0x1f0   :  { %v1678_v9 = vsel %vm548_vm6, %v1677_v50, %v1676_v2  ;;  %v1577_v10 = vsel %vm548_vm6, %v1576_v52, %v1575_v5  ;;  %v1582_v45 = vrot.slane %v1541_v30, 3  ;;  %v1481_v49 = vrot.slane %v1440_v15, 3  ;;  %v1933_v2 = vld [vmem:[#allocation3 + $0x1e] sm:$0x1]  ;;  %v1932_v21 = vld [vmem:[#allocation3 + $0xe] sm:$0x1] }
 0x1f1   :  { %v1680_v25 = vsel %vm551_vm7, %v1679_v4, %v1678_v9  ;;  %v1579_v27 = vsel %vm551_vm7, %v1578_v11, %v1577_v10  ;;  %v1687_v51 = vrot.slane %v1644_v40, 1  ;;  %v1685_v54 = vrot.slane %v1643_v37, 2  ;;  %v1832_v4 = vld [vmem:[#allocation3 + $0x1d] sm:$0x1]  ;;  %v1731_v9 = vld [vmem:[#allocation3 + $0x1c] sm:$0x1] }
 0x1f2   :  { %v1581_v43 = vsel %vm554_vm8, %v1580_v31, %v1579_v27  ;;  %v1485_v57 = vrot.slane %v1442_v46, 1  ;;  %v1935_v10 = vld [vmem:[#allocation3 + $0x3e] sm:$0x1]  ;;  %v1964_v11 = vrot.slane %v1933_v2, 7  ;;  %v1762_v19 = vrot.slane %v1731_v9, 7 }
 0x1f3   :  { %v1583_v52 = vsel %vm557_vm9, %v1582_v45, %v1581_v43  ;;  %v1733_v27 = vld [vmem:[#allocation3 + $0x3c] sm:$0x1]  ;;  %v1968_v28 = vrot.slane %v1935_v10, 5  ;;  %v1867_v30 = vrot.slane %v1834_v18, 5  ;;  %v1869_v31 = vrot.slane %v2729_v16, 4 }
 0x1f4   :  { %1389 = vxpose.xlu1.b32.end [2/2] (short) (narrow) %v1385_v58, 48  ;;  %1288 = vxpose.xlu0.b32.end [2/2] (short) (narrow) %v1284_v59, 48  ;;  %v1435_v58 = vld [vmem:[#allocation3 + $0x89] sm:$0x1]  ;;  %v1475_v59 = vrot.slane %v1437_v41, 6  ;;  %v1682_v41 = vsel %vm554_vm8, %v1681_v26, %v1680_v25  ;;  %v1965_v24 = vsel %vm545_vm5, %v1964_v11, %v1932_v21  ;;  %v1766_v43 = vrot.slane %v1733_v27, 5 }
 0x1f5   :  { %1187 = vxpose.xlu2.b32.end [2/2] (short) (narrow) %v1183_v60, 48  ;;  %v1636_v60 = vld [vmem:[#allocation3 + $0x7b] sm:$0x1]  ;;  %v1474_v12 = vsel %vm545_vm5, %v1473_v53, %v1435_v58  ;;  %v1684_v50 = vsel %vm557_vm9, %v1683_v44, %v1682_v41  ;;  %v1586_v53 = vrot.slane %v1543_v42, 1  ;;  %v1483_v58 = vrot.slane %v1441_v48, 2 }
 0x1f6   :  { %v1673_v13 = vrot.slane %v1636_v60, 1  ;;  %v1476_v20 = vsel %vm548_vm6, %v1475_v59, %v1474_v12  ;;  %v1686_v59 = vsel %vm560_vm10, %v1685_v54, %v1684_v50  ;;  %v1585_v60 = vsel %vm560_vm10, %v1584_v55, %v1583_v52  ;;  %v1833_v12 = vld [vmem:[#allocation3 + $0x2d] sm:$0x1]  ;;  %v1730_v26 = vld [vmem:[#allocation3 + $0xc] sm:$0x1] }
 0x1f7   :  { %v1478_v32 = vsel %vm551_vm7, %v1477_v23, %v1476_v20  ;;  %v1688_v61 = vsel %vm563_vm11, %v1687_v51, %v1686_v59  ;;  %v1587_v62 = vsel %vm563_vm11, %v1586_v53, %v1585_v60  ;;  %v1863_v20 = vrot.slane %v1832_v4, 7  ;;  %v1831_v25 = vld [vmem:[#allocation3 + $0xd] sm:$0x1]  ;;  %v1941_v37 = vld [vmem:[#allocation3 + $0x9e] sm:$0x1] }
 0x1f8   :  { %v1674_v34 = vsel %vm563_vm11, %v1673_v13, %v1672_v1  ;;  %v1480_v47 = vsel %vm554_vm8, %v1479_v33, %v1478_v32  ;;  %v1732_v13 = vld [vmem:[#allocation3 + $0x2c] sm:$0x1]  ;;  %v1865_v22 = vrot.slane %v1833_v12, 6  ;;  %v1937_v33 = vld [vmem:[#allocation3 + $0x5e] sm:$0x1]  ;;  %v1763_v36 = vsel %vm545_vm5, %v1762_v19, %v1730_v26 }
 0x1f9   :  { %v1482_v56 = vsel %vm557_vm9, %v1481_v49, %v1480_v47  ;;  %v1764_v23 = vrot.slane %v1732_v13, 6  ;;  %v1734_v32 = vld [vmem:[#allocation3 + $0x4c] sm:$0x1]  ;;  %v2745_v44 = vld [vmem:[#allocation3 + $0xbe] sm:$0x1]  ;;  %v1984_v53 = vrot.slane %v2741_v38, 4 }
 0x1fa   :  { %v1484_v63 = vsel %vm560_vm10, %v1483_v58, %v1482_v56  ;;  %v1840_v45 = vld [vmem:[#allocation3 + $0x9d] sm:$0x1]  ;;  %v1739_v47 = vld [vmem:[#allocation3 + $0x9c] sm:$0x1]  ;;  %v1768_v48 = vrot.slane %v1734_v32, 4  ;;  %v1978_v58 = vrot.slane %v1941_v37, 7 }
 0x1fb   :  { %v1486_v0 = vsel %vm563_vm11, %v1485_v57, %v1484_v63  ;;  %v1765_v42 = vsel %vm548_vm6, %v1764_v23, %v1763_v36  ;;  %v2747_v46 = vld [vmem:[#allocation3 + $0xbd] sm:$0x1]  ;;  %v1942_v49 = vld [vmem:[#allocation3 + $0xae] sm:$0x1]  ;;  %v1841_v50 = vld [vmem:[#allocation3 + $0xad] sm:$0x1] }
 0x1fc   :  { %v1836_v52 = vld [vmem:[#allocation3 + $0x5d] sm:$0x1]  ;;  %v1740_v54 = vld [vmem:[#allocation3 + $0xac] sm:$0x1]  ;;  %v1735_v56 = vld [vmem:[#allocation3 + $0x5c] sm:$0x1]  ;;  %v1767_v57 = vsel %vm551_vm7, %v1766_v43, %v1765_v42 }
 0x1fd   :  { %v1877_v59 = vrot.slane %v1840_v45, 7  ;;  %v1741_v60 = vld [vmem:[#allocation3 + $0xbc] sm:$0x1]  ;;  %v1980_v63 = vrot.slane %v1942_v49, 6  ;;  %v1871_v2 = vrot.slane %v1836_v52, 3  ;;  %v1982_v4 = vrot.slane %v2745_v44, 5 }
 0x1fe   :  { %v1838_v10 = vld [vmem:[#allocation3 + $0x7d] sm:$0x1]  ;;  %v1770_v11 = vrot.slane %v1735_v56, 3  ;;  %v1780_v12 = vrot.slane %v1741_v60, 5  ;;  %v1938_v13 = vld [vmem:[#allocation3 + $0x6e] sm:$0x1]  ;;  %v1769_v18 = vsel %vm554_vm8, %v1768_v48, %v1767_v57 }
 0x1ff   :  { %v1843_v27 = vld [vmem:[#allocation3 + $0xcd] sm:$0x1]  ;;  %v1875_v32 = vrot.slane %v1838_v10, 1  ;;  %v1873_v36 = vrot.slane %v1837_v14, 2  ;;  %v1945_v45 = vld [vmem:[#allocation3 + $0xde] sm:$0x1] }
 0x200   :  { %v1771_v37 = vsel %vm557_vm9, %v1770_v11, %v1769_v18  ;;  %v1883_v42 = vrot.slane %v1843_v27, 4  ;;  %v1946_v52 = vld [vmem:[#allocation3 + $0xee] sm:$0x1]  ;;  %v1947_v57 = vld [vmem:[#allocation3 + $0xfe] sm:$0x1] }
 0x21c   :  { %1691 = vxpose.xlu1.b32.start [1/2] (short) (narrow) %v1674_v34, 48  ;;  %1590 = vxpose.xlu0.b32.start [1/2] (short) (narrow) %v1573_v35, 48  ;;  %v1967_v34 = vsel %vm548_vm6, %v1966_v17, %v1965_v24  ;;  %v1864_v35 = vsel %vm545_vm5, %v1863_v20, %v1831_v25  ;;  %v1737_v17 = vld [vmem:[#allocation3 + $0x7c] sm:$0x1]  ;;  %v1736_v25 = vld [vmem:[#allocation3 + $0x6c] sm:$0x1] }
 0x21d   :  { %1489 = vxpose.xlu2.b32.start [1/2] (short) (narrow) %v1472_v39, 48  ;;  %v1866_v41 = vsel %vm548_vm6, %v1865_v22, %v1864_v35  ;;  %v1969_v51 = vsel %vm551_vm7, %v1968_v28, %v1967_v34  ;;  %v1974_v35 = vrot.slane %v1938_v13, 2 }
 0x21e   :  { %v1868_v55 = vsel %vm551_vm7, %v1867_v30, %v1866_v41  ;;  %v1971_v9 = vsel %vm554_vm8, %v1970_v29, %v1969_v51  ;;  %v1976_v30 = vrot.slane %v1939_v8, 1  ;;  %v1988_v8 = vrot.slane %v1946_v52, 2  ;;  %v2044_v52 = vld [vmem:[#allocation3 + $0xbf] sm:$0x1] }
 0x21f   :  { %v1870_v16 = vsel %vm554_vm8, %v1869_v31, %v1868_v55  ;;  %v1743_v55 = vld [vmem:[#allocation3 + $0xdc] sm:$0x1] }
 0x220   :  { %v1872_v31 = vsel %vm557_vm9, %v1871_v2, %v1870_v16 }
 0x221   :  { %v1874_v44 = vsel %vm560_vm10, %v1873_v36, %v1872_v31  ;;  %v2033_v36 = vld [vmem:[#allocation3 + $0xf] sm:$0x1] }
 0x224   :  { %1692 = vxpose.xlu1.b32.end [2/2] (short) (narrow) %v1688_v61, 48  ;;  %1591 = vxpose.xlu0.b32.end [2/2] (short) (narrow) %v1587_v62, 48  ;;  %v1972_v61 = vrot.slane %v1937_v33, 3  ;;  %v1940_v62 = vld [vmem:[#allocation3 + $0x8e] sm:$0x1] }
 0x225   :  { %1490 = vxpose.xlu2.b32.end [2/2] (short) (narrow) %v1486_v0, 48  ;;  %v1839_v0 = vld [vmem:[#allocation3 + $0x8d] sm:$0x1]  ;;  %v1979_v20 = vsel %vm545_vm5, %v1978_v58, %v1940_v62  ;;  %v1742_v33 = vld [vmem:[#allocation3 + $0xcc] sm:$0x1] }
 0x226   :  { %v597_v1 = vpop.trf.xlu2  ;;  %v1878_v19 = vsel %vm545_vm5, %v1877_v59, %v1839_v0  ;;  %v1973_v24 = vsel %vm557_vm9, %v1972_v61, %v1971_v9  ;;  %v1981_v26 = vsel %vm548_vm6, %v1980_v63, %v1979_v20  ;;  %v1782_v48 = vrot.slane %v1742_v33, 4  ;;  %v1846_v59 = vld [vmem:[#allocation3 + $0xfd] sm:$0x1]  ;;  %v1745_v63 = vld [vmem:[#allocation3 + $0xfc] sm:$0x1] }
 0x227   :  { %613 = vst.msk [vmem:[%s3173_s5] sm:$0xff] %vm402_vm4, %v597_v1  ;;  %v1879_v1 = vrot.slane %v1841_v50, 6  ;;  %v1975_v43 = vsel %vm560_vm10, %v1974_v35, %v1973_v24  ;;  %v1876_v50 = vsel %vm563_vm11, %v1875_v32, %v1874_v44  ;;  %v1986_v61 = vrot.slane %v1945_v45, 3 }
 0x228   :  { %v1977_v49 = vsel %vm563_vm11, %v1976_v30, %v1975_v43  ;;  %v1788_v11 = vrot.slane %v1745_v63, 1  ;;  %v2035_v30 = vld [vmem:[#allocation3 + $0x2f] sm:$0x1] }
 0x229   :  { %v1880_v28 = vsel %vm548_vm6, %v1879_v1, %v1878_v19  ;;  %v2067_v32 = vrot.slane %v2035_v30, 6  ;;  %v2037_v43 = vld [vmem:[#allocation3 + $0x4f] sm:$0x1] }
 0x22a   :  { %v2045_v63 = vld [vmem:[#allocation3 + $0xcf] sm:$0x1] }
 0x22e   :  { %v598_v3 = vpop.trf.xlu2 }
 0x22f   :  { %614 = vst.msk [vmem:[%s3173_s5 + $0x8] sm:$0xff] %vm402_vm4, %v598_v3  ;;  %v1776_v3 = vrot.slane %v1739_v47, 7 }
 0x230   :  { %v798_v5 = vpop.trf.xlu1  ;;  %v697_v6 = vpop.trf.xlu0 }
 0x231   :  { %2174 = vst.msk [vmem:[%s3173_s5 + $0x60] sm:$0xff] %vm402_vm4, %v798_v5  ;;  %v1881_v5 = vrot.slane %v2747_v46, 5  ;;  %v1844_v46 = vld [vmem:[#allocation3 + $0xdd] sm:$0x1] }
 0x232   :  { %2168 = vst.msk [vmem:[%s3173_s5 + $0x30] sm:$0xff] %vm402_vm4, %v697_v6  ;;  %v1738_v6 = vld [vmem:[#allocation3 + $0x8c] sm:$0x1]  ;;  %v1885_v62 = vrot.slane %v1844_v46, 3 }
 0x233   :  { %v1777_v29 = vsel %vm545_vm5, %v1776_v3, %v1738_v6  ;;  %v1882_v41 = vsel %vm551_vm7, %v1881_v5, %v1880_v28  ;;  %v1784_v5 = vrot.slane %v1743_v55, 3 }
 0x234   :  { %v1884_v60 = vsel %vm554_vm8, %v1883_v42, %v1882_v41  ;;  %v2038_v41 = vld [vmem:[#allocation3 + $0x5f] sm:$0x1] }
 0x235   :  { %v1886_v6 = vsel %vm557_vm9, %v1885_v62, %v1884_v60 }
 0x236   :  { %v599_v7 = vpop.trf.xlu2 }
 0x237   :  { %615 = vst.msk [vmem:[%s3173_s5 + $0x10] sm:$0xff] %vm402_vm4, %v599_v7  ;;  %v1778_v7 = vrot.slane %v1740_v54, 6  ;;  %v1845_v54 = vld [vmem:[#allocation3 + $0xed] sm:$0x1] }
 0x238   :  { %v799_v15 = vpop.trf.xlu1  ;;  %v698_v39 = vpop.trf.xlu0  ;;  %v1887_v9 = vrot.slane %v1845_v54, 2 }
 0x239   :  { %2175 = vst.msk [vmem:[%s3173_s5 + $0x68] sm:$0xff] %vm402_vm4, %v799_v15  ;;  %v1779_v34 = vsel %vm548_vm6, %v1778_v7, %v1777_v29  ;;  %v1774_v15 = vrot.slane %v1737_v17, 1  ;;  %v1889_v7 = vrot.slane %v1846_v59, 1  ;;  %v2034_v29 = vld [vmem:[#allocation3 + $0x1f] sm:$0x1] }
 0x23a   :  { %2169 = vst.msk [vmem:[%s3173_s5 + $0x38] sm:$0xff] %vm402_vm4, %v698_v39  ;;  %v1772_v39 = vrot.slane %v1736_v25, 2  ;;  %v1781_v47 = vsel %vm551_vm7, %v1780_v12, %v1779_v34  ;;  %v1888_v14 = vsel %vm560_vm10, %v1887_v9, %v1886_v6  ;;  %v2065_v31 = vrot.slane %v2034_v29, 7 }
 0x23b   :  { %v1783_v0 = vsel %vm554_vm8, %v1782_v48, %v1781_v47  ;;  %v1890_v17 = vsel %vm563_vm11, %v1889_v7, %v1888_v14  ;;  %v2073_v48 = vrot.slane %v2038_v41, 3 }
 0x23c   :  { %v1773_v51 = vsel %vm560_vm10, %v1772_v39, %v1771_v37  ;;  %v1785_v10 = vsel %vm557_vm9, %v1784_v5, %v1783_v0  ;;  %v2036_v37 = vld [vmem:[#allocation3 + $0x3f] sm:$0x1]  ;;  %v2066_v39 = vsel %vm545_vm5, %v2065_v31, %v2033_v36  ;;  %v2083_v0 = vrot.slane %v2044_v52, 5 }
 0x23d   :  { %v1775_v56 = vsel %vm563_vm11, %v1774_v15, %v1773_v51  ;;  %v2042_v15 = vld [vmem:[#allocation3 + $0x9f] sm:$0x1]  ;;  %v2068_v42 = vsel %vm548_vm6, %v2067_v32, %v2066_v39  ;;  %v2069_v44 = vrot.slane %v2036_v37, 5  ;;  %v2071_v51 = vrot.slane %v2037_v43, 4 }
 0x23e   :  { %v600_v40 = vpop.trf.xlu2  ;;  %v2079_v45 = vrot.slane %v2042_v15, 7  ;;  %v2085_v5 = vrot.slane %v2045_v63, 4 }
 0x23f   :  { %616 = vst.msk [vmem:[%s3173_s5 + $0x18] sm:$0xff] %vm402_vm4, %v600_v40  ;;  %v1983_v40 = vsel %vm551_vm7, %v1982_v4, %v1981_v26  ;;  %v1744_v4 = vld [vmem:[#allocation3 + $0xec] sm:$0x1]  ;;  %v2070_v47 = vsel %vm551_vm7, %v2069_v44, %v2068_v42 }
 0x240   :  { %v800_v21 = vpop.trf.xlu1  ;;  %v699_v22 = vpop.trf.xlu0  ;;  %v1985_v58 = vsel %vm554_vm8, %v1984_v53, %v1983_v40  ;;  %v1990_v53 = vrot.slane %v1947_v57, 1  ;;  %v1786_v12 = vrot.slane %v1744_v4, 2  ;;  %v2043_v40 = vld [vmem:[#allocation3 + $0xaf] sm:$0x1]  ;;  %v2072_v59 = vsel %vm554_vm8, %v2071_v51, %v2070_v47  ;;  %v2046_v4 = vld [vmem:[#allocation3 + $0xdf] sm:$0x1] }
 0x241   :  { %2176 = vst.msk [vmem:[%s3173_s5 + $0x70] sm:$0xff] %vm402_vm4, %v800_v21  ;;  %v1987_v38 = vsel %vm557_vm9, %v1986_v61, %v1985_v58  ;;  %v2081_v46 = vrot.slane %v2043_v40, 6  ;;  %v2039_v57 = vld [vmem:[#allocation3 + $0x6f] sm:$0x1]  ;;  %v2074_v61 = vsel %vm557_vm9, %v2073_v48, %v2072_v59 }
 0x242   :  { %2170 = vst.msk [vmem:[%s3173_s5 + $0x40] sm:$0xff] %vm402_vm4, %v699_v22  ;;  %v1989_v13 = vsel %vm560_vm10, %v1988_v8, %v1987_v38  ;;  %v1787_v18 = vsel %vm560_vm10, %v1786_v12, %v1785_v10  ;;  %v2047_v10 = vld [vmem:[#allocation3 + $0xef] sm:$0x1] }
 0x243   :  { %v1991_v16 = vsel %vm563_vm11, %v1990_v53, %v1989_v13  ;;  %v1789_v20 = vsel %vm563_vm11, %v1788_v11, %v1787_v18  ;;  %v2048_v53 = vld [vmem:[#allocation3 + $0xff] sm:$0x1]  ;;  %v2087_v11 = vrot.slane %v2046_v4, 3  ;;  %v2089_v14 = vrot.slane %v2047_v10, 2 }
 0x244   :  { %v2091_v13 = vrot.slane %v2048_v53, 1 }
 0x246   :  { %v601_v23 = vpop.trf.xlu2 }
 0x247   :  { %617 = vst.msk [vmem:[%s3173_s5 + $0x20] sm:$0xff] %vm402_vm4, %v601_v23 }
 0x248   :  { %v801_v1 = vpop.trf.xlu1  ;;  %v700_v3 = vpop.trf.xlu0 }
 0x249   :  { %2177 = vst.msk [vmem:[%s3173_s5 + $0x78] sm:$0xff] %vm402_vm4, %v801_v1  ;;  %v2075_v1 = vrot.slane %v2039_v57, 2 }
 0x24a   :  { %2171 = vst.msk [vmem:[%s3173_s5 + $0x48] sm:$0xff] %vm402_vm4, %v700_v3 }
 0x24c   :  { %1994 = vxpose.xlu1.b32.start [1/2] (short) (narrow) %v1977_v49, 48  ;;  %1893 = vxpose.xlu0.b32.start [1/2] (short) (narrow) %v1876_v50, 48  ;;  %v2041_v49 = vld [vmem:[#allocation3 + $0x8f] sm:$0x1]  ;;  %v2040_v50 = vld [vmem:[#allocation3 + $0x7f] sm:$0x1] }
 0x24d   :  { %1792 = vxpose.xlu2.b32.start [1/2] (short) (narrow) %v1775_v56, 48  ;;  %v2080_v58 = vsel %vm545_vm5, %v2079_v45, %v2041_v49  ;;  %v2077_v62 = vrot.slane %v2040_v50, 1 }
 0x24e   :  { %v602_v2 = vpop.trf.xlu2  ;;  %v2082_v60 = vsel %vm548_vm6, %v2081_v46, %v2080_v58 }
 0x24f   :  { %618 = vst.msk [vmem:[%s3173_s5 + $0x28] sm:$0xff] %vm402_vm4, %v602_v2  ;;  %v2084_v3 = vsel %vm551_vm7, %v2083_v0, %v2082_v60  ;;  %v2076_v2 = vsel %vm560_vm10, %v2075_v1, %v2074_v61 }
 0x250   :  { %v802_v19 = vpop.trf.xlu1  ;;  %v701_v21 = vpop.trf.xlu0  ;;  %v2078_v38 = vsel %vm563_vm11, %v2077_v62, %v2076_v2  ;;  %v2086_v6 = vsel %vm554_vm8, %v2085_v5, %v2084_v3 }
 0x251   :  { %2178 = vst.msk [vmem:[%s3173_s5 + $0x80] sm:$0xff] %vm402_vm4, %v802_v19  ;;  %v2088_v12 = vsel %vm557_vm9, %v2087_v11, %v2086_v6 }
 0x252   :  { %2172 = vst.msk [vmem:[%s3173_s5 + $0x50] sm:$0xff] %vm402_vm4, %v701_v21 }
 0x254   :  { %1995 = vxpose.xlu1.b32.end [2/2] (short) (narrow) %v1991_v16, 48  ;;  %1894 = vxpose.xlu0.b32.end [2/2] (short) (narrow) %v1890_v17, 48  ;;  %v2090_v16 = vsel %vm560_vm10, %v2089_v14, %v2088_v12 }
 0x255   :  { %1793 = vxpose.xlu2.b32.end [2/2] (short) (narrow) %v1789_v20, 48  ;;  %v2092_v17 = vsel %vm563_vm11, %v2091_v13, %v2090_v16 }
 0x256   :  { %v899_v22 = vpop.trf.xlu2 }
 0x257   :  { %2180 = vst.msk [vmem:[%s3173_s5 + $0x90] sm:$0xff] %vm402_vm4, %v899_v22 }
 0x258   :  { %v803_v23 = vpop.trf.xlu1  ;;  %v702_v24 = vpop.trf.xlu0 }
 0x259   :  { %2179 = vst.msk [vmem:[%s3173_s5 + $0x88] sm:$0xff] %vm402_vm4, %v803_v23 }
 0x25a   :  { %2173 = vst.msk [vmem:[%s3173_s5 + $0x58] sm:$0xff] %vm402_vm4, %v702_v24 }
 0x25e   :  { %v900_v25 = vpop.trf.xlu2 }
 0x25f   :  { %2181 = vst.msk [vmem:[%s3173_s5 + $0x98] sm:$0xff] %vm402_vm4, %v900_v25 }
 0x260   :  { %v1101_v26 = vpop.trf.xlu1  ;;  %v1000_v27 = vpop.trf.xlu0 }
 0x261   :  { %2192 = vst.msk [vmem:[%s3173_s5 + $0xf0] sm:$0xff] %vm402_vm4, %v1101_v26 }
 0x262   :  { %2186 = vst.msk [vmem:[%s3173_s5 + $0xc0] sm:$0xff] %vm402_vm4, %v1000_v27 }
 0x266   :  { %v901_v28 = vpop.trf.xlu2 }
 0x267   :  { %2182 = vst.msk [vmem:[%s3173_s5 + $0xa0] sm:$0xff] %vm402_vm4, %v901_v28 }
 0x268   :  { %v1102_v33 = vpop.trf.xlu1  ;;  %v1001_v34 = vpop.trf.xlu0 }
 0x269   :  { %2193 = vst.msk [vmem:[%s3173_s5 + $0xf8] sm:$0xff] %vm402_vm4, %v1102_v33 }
 0x26a   :  { %2187 = vst.msk [vmem:[%s3173_s5 + $0xc8] sm:$0xff] %vm402_vm4, %v1001_v34 }
 0x26e   :  { %v902_v35 = vpop.trf.xlu2 }
 0x26f   :  { %2183 = vst.msk [vmem:[%s3173_s5 + $0xa8] sm:$0xff] %vm402_vm4, %v902_v35 }
 0x270   :  { %v1103_v54 = vpop.trf.xlu1  ;;  %v1002_v55 = vpop.trf.xlu0 }
 0x271   :  { %2194 = vst.msk [vmem:[%s3173_s5 + $0x100] sm:$0xff] %vm402_vm4, %v1103_v54 }
 0x272   :  { %2188 = vst.msk [vmem:[%s3173_s5 + $0xd0] sm:$0xff] %vm402_vm4, %v1002_v55 }
 0x276   :  { %v903_v56 = vpop.trf.xlu2 }
 0x277   :  { %2184 = vst.msk [vmem:[%s3173_s5 + $0xb0] sm:$0xff] %vm402_vm4, %v903_v56 }
 0x278   :  { %v1104_v7 = vpop.trf.xlu1  ;;  %v1003_v8 = vpop.trf.xlu0 }
 0x279   :  { %2195 = vst.msk [vmem:[%s3173_s5 + $0x108] sm:$0xff] %vm402_vm4, %v1104_v7 }
 0x27a   :  { %2189 = vst.msk [vmem:[%s3173_s5 + $0xd8] sm:$0xff] %vm402_vm4, %v1003_v8 }
 0x27d   :  { %2095 = vxpose.xlu2.b32.start [1/2] (short) (narrow) %v2078_v38, 48 }
 0x27e   :  { %v904_v9 = vpop.trf.xlu2 }
 0x27f   :  { %2185 = vst.msk [vmem:[%s3173_s5 + $0xb8] sm:$0xff] %vm402_vm4, %v904_v9 }
 0x280   :  { %v1105_v18 = vpop.trf.xlu1  ;;  %v1004_v20 = vpop.trf.xlu0 }
 0x281   :  { %2196 = vst.msk [vmem:[%s3173_s5 + $0x110] sm:$0xff] %vm402_vm4, %v1105_v18 }
 0x282   :  { %2190 = vst.msk [vmem:[%s3173_s5 + $0xe0] sm:$0xff] %vm402_vm4, %v1004_v20 }
 0x285   :  { %2096 = vxpose.xlu2.b32.end [2/2] (short) (narrow) %v2092_v17, 48 }
 0x286   :  { %v1202_v19 = vpop.trf.xlu2 }
 0x287   :  { %2198 = vst.msk [vmem:[%s3173_s5 + $0x120] sm:$0xff] %vm402_vm4, %v1202_v19 }
 0x288   :  { %v1106_v21 = vpop.trf.xlu1  ;;  %v1005_v22 = vpop.trf.xlu0 }
 0x289   :  { %2197 = vst.msk [vmem:[%s3173_s5 + $0x118] sm:$0xff] %vm402_vm4, %v1106_v21 }
 0x28a   :  { %2191 = vst.msk [vmem:[%s3173_s5 + $0xe8] sm:$0xff] %vm402_vm4, %v1005_v22 }
 0x28e   :  { %v1203_v23 = vpop.trf.xlu2 }
 0x28f   :  { %2199 = vst.msk [vmem:[%s3173_s5 + $0x128] sm:$0xff] %vm402_vm4, %v1203_v23 }
 0x290   :  { %v1404_v24 = vpop.trf.xlu1  ;;  %v1303_v25 = vpop.trf.xlu0 }
 0x291   :  { %2210 = vst.msk [vmem:[%s3173_s5 + $0x180] sm:$0xff] %vm402_vm4, %v1404_v24 }
 0x292   :  { %2204 = vst.msk [vmem:[%s3173_s5 + $0x150] sm:$0xff] %vm402_vm4, %v1303_v25 }
 0x296   :  { %v1204_v26 = vpop.trf.xlu2 }
 0x297   :  { %2200 = vst.msk [vmem:[%s3173_s5 + $0x130] sm:$0xff] %vm402_vm4, %v1204_v26 }
 0x298   :  { %v1405_v27 = vpop.trf.xlu1  ;;  %v1304_v28 = vpop.trf.xlu0 }
 0x299   :  { %2211 = vst.msk [vmem:[%s3173_s5 + $0x188] sm:$0xff] %vm402_vm4, %v1405_v27 }
 0x29a   :  { %2205 = vst.msk [vmem:[%s3173_s5 + $0x158] sm:$0xff] %vm402_vm4, %v1304_v28 }
 0x29e   :  { %v1205_v29 = vpop.trf.xlu2 }
 0x29f   :  { %2201 = vst.msk [vmem:[%s3173_s5 + $0x138] sm:$0xff] %vm402_vm4, %v1205_v29 }
 0x2a0   :  { %v1406_v30 = vpop.trf.xlu1  ;;  %v1305_v31 = vpop.trf.xlu0 }
 0x2a1   :  { %2212 = vst.msk [vmem:[%s3173_s5 + $0x190] sm:$0xff] %vm402_vm4, %v1406_v30 }
 0x2a2   :  { %2206 = vst.msk [vmem:[%s3173_s5 + $0x160] sm:$0xff] %vm402_vm4, %v1305_v31 }
 0x2a6   :  { %v1206_v32 = vpop.trf.xlu2 }
 0x2a7   :  { %2202 = vst.msk [vmem:[%s3173_s5 + $0x140] sm:$0xff] %vm402_vm4, %v1206_v32 }
 0x2a8   :  { %v1407_v33 = vpop.trf.xlu1  ;;  %v1306_v34 = vpop.trf.xlu0 }
 0x2a9   :  { %2213 = vst.msk [vmem:[%s3173_s5 + $0x198] sm:$0xff] %vm402_vm4, %v1407_v33 }
 0x2aa   :  { %2207 = vst.msk [vmem:[%s3173_s5 + $0x168] sm:$0xff] %vm402_vm4, %v1306_v34 }
 0x2ae   :  { %v1207_v35 = vpop.trf.xlu2 }
 0x2af   :  { %2203 = vst.msk [vmem:[%s3173_s5 + $0x148] sm:$0xff] %vm402_vm4, %v1207_v35 }
 0x2b0   :  { %v1408_v36 = vpop.trf.xlu1  ;;  %v1307_v37 = vpop.trf.xlu0 }
 0x2b1   :  { %2214 = vst.msk [vmem:[%s3173_s5 + $0x1a0] sm:$0xff] %vm402_vm4, %v1408_v36 }
 0x2b2   :  { %2208 = vst.msk [vmem:[%s3173_s5 + $0x170] sm:$0xff] %vm402_vm4, %v1307_v37 }
 0x2b6   :  { %v1505_v15 = vpop.trf.xlu2 }
 0x2b7   :  { %2216 = vst.msk [vmem:[%s3173_s5 + $0x1b0] sm:$0xff] %vm402_vm4, %v1505_v15 }
 0x2b8   :  { %v1409_v39 = vpop.trf.xlu1  ;;  %v1308_v40 = vpop.trf.xlu0 }
 0x2b9   :  { %2215 = vst.msk [vmem:[%s3173_s5 + $0x1a8] sm:$0xff] %vm402_vm4, %v1409_v39 }
 0x2ba   :  { %2209 = vst.msk [vmem:[%s3173_s5 + $0x178] sm:$0xff] %vm402_vm4, %v1308_v40 }
 0x2be   :  { %v1506_v41 = vpop.trf.xlu2 }
 0x2bf   :  { %2217 = vst.msk [vmem:[%s3173_s5 + $0x1b8] sm:$0xff] %vm402_vm4, %v1506_v41 }
 0x2c0   :  { %v1707_v42 = vpop.trf.xlu1  ;;  %v1606_v43 = vpop.trf.xlu0 }
 0x2c1   :  { %2228 = vst.msk [vmem:[%s3173_s5 + $0x210] sm:$0xff] %vm402_vm4, %v1707_v42 }
 0x2c2   :  { %2222 = vst.msk [vmem:[%s3173_s5 + $0x1e0] sm:$0xff] %vm402_vm4, %v1606_v43 }
 0x2c6   :  { %v1507_v44 = vpop.trf.xlu2 }
 0x2c7   :  { %2218 = vst.msk [vmem:[%s3173_s5 + $0x1c0] sm:$0xff] %vm402_vm4, %v1507_v44 }
 0x2c8   :  { %v1708_v45 = vpop.trf.xlu1  ;;  %v1607_v46 = vpop.trf.xlu0 }
 0x2c9   :  { %2229 = vst.msk [vmem:[%s3173_s5 + $0x218] sm:$0xff] %vm402_vm4, %v1708_v45 }
 0x2ca   :  { %2223 = vst.msk [vmem:[%s3173_s5 + $0x1e8] sm:$0xff] %vm402_vm4, %v1607_v46 }
 0x2ce   :  { %v1508_v47 = vpop.trf.xlu2 }
 0x2cf   :  { %2219 = vst.msk [vmem:[%s3173_s5 + $0x1c8] sm:$0xff] %vm402_vm4, %v1508_v47 }
 0x2d0   :  { %v1709_v48 = vpop.trf.xlu1  ;;  %v1608_v49 = vpop.trf.xlu0 }
 0x2d1   :  { %2230 = vst.msk [vmem:[%s3173_s5 + $0x220] sm:$0xff] %vm402_vm4, %v1709_v48 }
 0x2d2   :  { %2224 = vst.msk [vmem:[%s3173_s5 + $0x1f0] sm:$0xff] %vm402_vm4, %v1608_v49 }
 0x2d6   :  { %v1509_v50 = vpop.trf.xlu2 }
 0x2d7   :  { %2220 = vst.msk [vmem:[%s3173_s5 + $0x1d0] sm:$0xff] %vm402_vm4, %v1509_v50 }
 0x2d8   :  { %v1710_v51 = vpop.trf.xlu1  ;;  %v1609_v52 = vpop.trf.xlu0 }
 0x2d9   :  { %2231 = vst.msk [vmem:[%s3173_s5 + $0x228] sm:$0xff] %vm402_vm4, %v1710_v51 }
 0x2da   :  { %2225 = vst.msk [vmem:[%s3173_s5 + $0x1f8] sm:$0xff] %vm402_vm4, %v1609_v52 }
 0x2de   :  { %v1510_v54 = vpop.trf.xlu2 }
 0x2df   :  { %2221 = vst.msk [vmem:[%s3173_s5 + $0x1d8] sm:$0xff] %vm402_vm4, %v1510_v54 }
 0x2e0   :  { %v1711_v55 = vpop.trf.xlu1  ;;  %v1610_v56 = vpop.trf.xlu0 }
 0x2e1   :  { %2232 = vst.msk [vmem:[%s3173_s5 + $0x230] sm:$0xff] %vm402_vm4, %v1711_v55 }
 0x2e2   :  { %2226 = vst.msk [vmem:[%s3173_s5 + $0x200] sm:$0xff] %vm402_vm4, %v1610_v56 }
 0x2e6   :  { %v1808_v57 = vpop.trf.xlu2 }
 0x2e7   :  { %2234 = vst.msk [vmem:[%s3173_s5 + $0x240] sm:$0xff] %vm402_vm4, %v1808_v57 }
 0x2e8   :  { %v1712_v58 = vpop.trf.xlu1  ;;  %v1611_v59 = vpop.trf.xlu0 }
 0x2e9   :  { %2233 = vst.msk [vmem:[%s3173_s5 + $0x238] sm:$0xff] %vm402_vm4, %v1712_v58 }
 0x2ea   :  { %2227 = vst.msk [vmem:[%s3173_s5 + $0x208] sm:$0xff] %vm402_vm4, %v1611_v59 }
 0x2ee   :  { %v1809_v60 = vpop.trf.xlu2 }
 0x2ef   :  { %2235 = vst.msk [vmem:[%s3173_s5 + $0x248] sm:$0xff] %vm402_vm4, %v1809_v60 }
 0x2f0   :  { %v2010_v61 = vpop.trf.xlu1  ;;  %v1909_v62 = vpop.trf.xlu0 }
 0x2f1   :  { %2246 = vst.msk [vmem:[%s3173_s5 + $0x2a0] sm:$0xff] %vm402_vm4, %v2010_v61 }
 0x2f2   :  { %2240 = vst.msk [vmem:[%s3173_s5 + $0x270] sm:$0xff] %vm402_vm4, %v1909_v62 }
 0x2f6   :  { %v1810_v63 = vpop.trf.xlu2 }
 0x2f7   :  { %2236 = vst.msk [vmem:[%s3173_s5 + $0x250] sm:$0xff] %vm402_vm4, %v1810_v63 }
 0x2f8   :  { %v2011_v0 = vpop.trf.xlu1  ;;  %v1910_v1 = vpop.trf.xlu0 }
 0x2f9   :  { %2247 = vst.msk [vmem:[%s3173_s5 + $0x2a8] sm:$0xff] %vm402_vm4, %v2011_v0 }
 0x2fa   :  { %2241 = vst.msk [vmem:[%s3173_s5 + $0x278] sm:$0xff] %vm402_vm4, %v1910_v1 }
 0x2fe   :  { %v1811_v3 = vpop.trf.xlu2 }
 0x2ff   :  { %2237 = vst.msk [vmem:[%s3173_s5 + $0x258] sm:$0xff] %vm402_vm4, %v1811_v3 }
 0x300   :  { %v2012_v2 = vpop.trf.xlu1  ;;  %v1911_v4 = vpop.trf.xlu0 }
 0x301   :  { %2248 = vst.msk [vmem:[%s3173_s5 + $0x2b0] sm:$0xff] %vm402_vm4, %v2012_v2 }
 0x302   :  { %2242 = vst.msk [vmem:[%s3173_s5 + $0x280] sm:$0xff] %vm402_vm4, %v1911_v4 }
 0x306   :  { %v1812_v5 = vpop.trf.xlu2 }
 0x307   :  { %2238 = vst.msk [vmem:[%s3173_s5 + $0x260] sm:$0xff] %vm402_vm4, %v1812_v5 }
 0x308   :  { %v2013_v38 = vpop.trf.xlu1  ;;  %v1912_v53 = vpop.trf.xlu0 }
 0x309   :  { %2249 = vst.msk [vmem:[%s3173_s5 + $0x2b8] sm:$0xff] %vm402_vm4, %v2013_v38 }
 0x30a   :  { %2243 = vst.msk [vmem:[%s3173_s5 + $0x288] sm:$0xff] %vm402_vm4, %v1912_v53 }
 0x30e   :  { %v1813_v6 = vpop.trf.xlu2 }
 0x30f   :  { %2239 = vst.msk [vmem:[%s3173_s5 + $0x268] sm:$0xff] %vm402_vm4, %v1813_v6 }
 0x310   :  { %v2014_v7 = vpop.trf.xlu1  ;;  %v1913_v8 = vpop.trf.xlu0 }
 0x311   :  { %2250 = vst.msk [vmem:[%s3173_s5 + $0x2c0] sm:$0xff] %vm402_vm4, %v2014_v7 }
 0x312   :  { %2244 = vst.msk [vmem:[%s3173_s5 + $0x290] sm:$0xff] %vm402_vm4, %v1913_v8 }
 0x316   :  { %v2111_v9 = vpop.trf.xlu2 }
 0x317   :  { %2252 = vst.msk [vmem:[%s3173_s5 + $0x2d0] sm:$0xff] %vm402_vm4, %v2111_v9 }
 0x318   :  { %v2015_v10 = vpop.trf.xlu1  ;;  %v1914_v11 = vpop.trf.xlu0 }
 0x319   :  { %2251 = vst.msk [vmem:[%s3173_s5 + $0x2c8] sm:$0xff] %vm402_vm4, %v2015_v10 }
 0x31a   :  { %2245 = vst.msk [vmem:[%s3173_s5 + $0x298] sm:$0xff] %vm402_vm4, %v1914_v11 }
 0x31e   :  { %v2112_v12 = vpop.trf.xlu2 }
 0x31f   :  { %2253 = vst.msk [vmem:[%s3173_s5 + $0x2d8] sm:$0xff] %vm402_vm4, %v2112_v12 }
 0x326   :  { %v2113_v13 = vpop.trf.xlu2 }
 0x327   :  { %2254 = vst.msk [vmem:[%s3173_s5 + $0x2e0] sm:$0xff] %vm402_vm4, %v2113_v13 }
 0x32e   :  { %v2114_v14 = vpop.trf.xlu2 }
 0x32f   :  { %2255 = vst.msk [vmem:[%s3173_s5 + $0x2e8] sm:$0xff] %vm402_vm4, %v2114_v14 }
 0x336   :  { %v2115_v16 = vpop.trf.xlu2 }
 0x337   :  { %2256 = vst.msk [vmem:[%s3173_s5 + $0x2f0] sm:$0xff] %vm402_vm4, %v2115_v16 }
 0x33e   :  { %v2116_v17 = vpop.trf.xlu2 }
 0x33f   :  { %2257 = vst.msk [vmem:[%s3173_s5 + $0x2f8] sm:$0xff] %vm402_vm4, %v2116_v17 }
 0x340   :  { %2138 = vsyncpa [#allocation5], 1 }
 0x341   :  { %2139 = vsyncpa [#allocation7], 1 }

// kernel: model_forward.1
= control target key start
LH: loop header
LB: loop body
LE: loop exit
PB: predicated region body
PF: predicated region fallthrough
CT: control target
= control target key end

     0   :  { %10 = vsyncpa [#allocation5], 0  ;;  %s568_s0 = inlined_call_operand.vmem [shape: f32[3,768], index: 0, kind: input, shape index: {}]   ;;  %s569_s1 = inlined_call_operand.vmem [shape: f32[3,3], index: 1, kind: input, shape index: {}]   ;;  %s570_s2 = inlined_call_operand.vmem [shape: f32[3], index: 2, kind: input, shape index: {}]   ;;  %s571_s3 = inlined_call_operand.vmem [shape: f32[16,3], index: 3, kind: input, shape index: {}]   ;;  %s572_s4 = inlined_call_operand.vmem [shape: f32[16,1], index: 4, kind: input, shape index: {}]   ;;  %s573_s5 = inlined_call_operand.vmem [shape: f32[16,768], index: 5, kind: output, shape index: {}]  }
   0x1   :  { %s19_s20 = sshll.u32 %s569_s1, 4  ;;  %s20_s20 = int_to_ptr.vmem [resolvable:$true] %s19_s20 }
   0x2   :  { %11 = vsyncpa [#allocation7], 0  ;;  %s28_s23 = sshll.u32 %s570_s2, 4  ;;  %s452_s24 = smov [#allocation4]   ;;  %s29_s23 = int_to_ptr.vmem [resolvable:$true] %s28_s23 }
   0x3   :  { %22 = dma.vmem_to_smem %s20_s20, 64, %s452_s24, [#allocation5]  }
   0x4   :  { %s453_s25 = smov [#allocation6]  }
   0x5   :  { %31 = dma.vmem_to_smem %s29_s23, 16, %s453_s25, [#allocation7]  }
   0x6   :  { %448 = dma.done.wait [#allocation5], 64  }
   0x7   :  { %449 = vsyncadd [#allocation5], 4294967232 }
   0x8   :  { %450 = dma.done.wait [#allocation7], 16  }
   0x9   :  { %451 = vsyncadd [#allocation7], 4294967280 }
   0xa   :  { %44 = sfence }
   0xb   :  { %s48_s26 = sld [smem:[#allocation6]]  ;;  %v45_v0 = vld [vmem:[%s568_s0] sm:$0x77]  ;;  %v46_v1 = vld [vmem:[%s568_s0 + $0x8] sm:$0x77]  ;;  %v454_v35 = vmov 0  }
   0xc   :  { %s49_s27 = sld [smem:[#allocation4]]  ;;  %v47_v2 = vld [vmem:[%s568_s0 + $0x10] sm:$0x77]  ;;  %393 = vset.pattern.permute.xlu0 %v454_v35  ;;  %v110_v38 = vld [vmem:[%s572_s4] sm:$0xff]  ;;  %v111_v45 = vld [vmem:[%s572_s4 + $0x8] sm:$0xff]  ;;  %vm143_vm0 = vcmask 1042432  }
   0xd   :  { %s360_s28 = sld [smem:[#allocation4 + $0x1]]  ;;  %114 = vperm.xlu0 %393, %v110_v38   ;;  %v105_v50 = vld [vmem:[%s571_s3] sm:$0xff]  ;;  %vm136_vm1 = vcmask 23552   ;;  %v106_v51 = vld [vmem:[%s571_s3 + $0x8] sm:$0xff] }
   0xe   :  { %s361_s1 = sld [smem:[#allocation4 + $0x2]] }
   0xf   :  { %s362_s29 = sld [smem:[#allocation6 + $0x1]] }
  0x10   :  { %s363_s2 = sld [smem:[#allocation4 + $0x80]] }
  0x11   :  { %s364_s9 = sld [smem:[#allocation4 + $0x81]]  ;;  %v52_v4 = vstv %s48_s26 }
  0x12   :  { %v50_v3 = vstv %s49_s27  ;;  %s365_s12 = sld [smem:[#allocation4 + $0x82]] }
  0x13   :  { %v51_v5 = vmul.f32 %v50_v3, %v45_v0  ;;  %v55_v6 = vstv %s360_s28  ;;  %s366_s13 = sld [smem:[#allocation6 + $0x2]] }
  0x14   :  { %v56_v7 = vmul.f32 %v55_v6, %v46_v1  ;;  %v59_v8 = vstv %s361_s1  ;;  %s367_s14 = sld [smem:[#allocation4 + $0x100]] }
  0x15   :  { %v53_v9 = vadd.f32 %v52_v4, %v51_v5  ;;  %v60_v10 = vmul.f32 %v59_v8, %v47_v2  ;;  %s368_s15 = sld [smem:[#allocation4 + $0x101]]  ;;  %v71_v12 = vstv %s362_s29  ;;  %119 = vperm.xlu0 %393, %v111_v45  }
  0x16   :  { %v69_v11 = vstv %s363_s2  ;;  %s369_s16 = sld [smem:[#allocation4 + $0x102]] }
  0x17   :  { %v57_v13 = vadd.f32 %v56_v7, %v53_v9  ;;  %v70_v14 = vmul.f32 %v69_v11, %v45_v0  ;;  %v74_v15 = vstv %s364_s9 }
  0x18   :  { %v75_v16 = vmul.f32 %v74_v15, %v46_v1  ;;  %v78_v17 = vstv %s365_s12 }
  0x19   :  { %v61_v18 = vadd.f32 %v60_v10, %v57_v13  ;;  %v72_v19 = vadd.f32 %v71_v12, %v70_v14  ;;  %v79_v20 = vmul.f32 %v78_v17, %v47_v2  ;;  %v90_v22 = vstv %s366_s13 }
  0x1a   :  { %v88_v21 = vstv %s367_s14 }
  0x1b   :  { %v62_v23 = vmul.f32 0.5, %v61_v18  ;;  %v76_v24 = vadd.f32 %v75_v16, %v72_v19  ;;  %v89_v25 = vmul.f32 %v88_v21, %v45_v0  ;;  %v93_v26 = vstv %s368_s15 }
  0x1c   :  { %v94_v27 = vmul.f32 %v93_v26, %v46_v1  ;;  %v97_v28 = vstv %s369_s16 }
  0x1d   :  { %394 = vtanh.f32 %v62_v23  ;;  %v80_v29 = vadd.f32 %v79_v20, %v76_v24  ;;  %v91_v30 = vadd.f32 %v90_v22, %v89_v25  ;;  %v98_v31 = vmul.f32 %v97_v28, %v47_v2 }
  0x1f   :  { %v81_v32 = vmul.f32 0.5, %v80_v29  ;;  %v95_v33 = vadd.f32 %v94_v27, %v91_v30 }
  0x21   :  { %396 = vtanh.f32 %v81_v32  ;;  %v99_v34 = vadd.f32 %v98_v31, %v95_v33 }
  0x23   :  { %v395_v36 = vpop.eup %394  ;;  %v100_v37 = vmul.f32 0.5, %v99_v34 }
  0x24   :  { %v64_v39 = vmul.f32 0.5, %v395_v36 }
  0x25   :  { %398 = vtanh.f32 %v100_v37 }
  0x26   :  { %v65_v40 = vadd.f32 0.5, %v64_v39 }
  0x27   :  { %v397_v41 = vpop.eup %396 }
  0x28   :  { %66 = vst [vmem:[#allocation2 + $0x10] sm:$0x77] %v65_v40  ;;  %v83_v42 = vmul.f32 0.5, %v397_v41 }
  0x2a   :  { %v84_v43 = vadd.f32 0.5, %v83_v42 }
  0x2b   :  { %v399_v44 = vpop.eup %398 }
  0x2c   :  { %85 = vst [vmem:[#allocation2] sm:$0x77] %v84_v43  ;;  %v102_v46 = vmul.f32 0.5, %v399_v44 }
  0x2e   :  { %v103_v47 = vadd.f32 0.5, %v102_v46 }
  0x2f   :  { %v107_v48 = vld [vmem:[#allocation2 + $0x10] sm:$0x77] }
  0x30   :  { %125 = vst [vmem:[#allocation1] ss:$2 sm:$0xff] %v107_v48 }
  0x31   :  { %104 = vst [vmem:[#allocation2 + $0x8] sm:$0x77] %v103_v47 }
  0x33   :  { %v108_v49 = vld [vmem:[#allocation2] sm:$0x77] }
  0x34   :  { %127 = vst [vmem:[#allocation1 + $0x10] ss:$2 sm:$0xff] %v108_v49 }
  0x37   :  { %v130_v52 = vld.sshfl [vmem:[#allocation1] sm:$0xff pattern:$0x75316420]  ;;  %v131_v53 = vld.sshfl [vmem:[#allocation1 + $0x8] sm:$0xff pattern:$0x75316420] }
  0x38   :  { %370 = vmatpush.msk.msra.mxu0 %vm143_vm0, %v130_v52  ;;  %388 = vmatpush.msk.msra.mxu2 %vm143_vm0, %v130_v52  ;;  %v109_v54 = vld [vmem:[#allocation2 + $0x8] sm:$0x77] }
  0x39   :  { %373 = vmatpush.msk.msra.mxu1 %vm143_vm0, %v131_v53  ;;  %389 = vmatpush.msk.msra.mxu3 %vm143_vm0, %v131_v53  ;;  %129 = vst [vmem:[#allocation1 + $0x20] ss:$2 sm:$0xff] %v109_v54 }
  0x3a   :  { %371 = vmatmul.msk.f32.vlgmr.msra.gmra.mxu0 %vm136_vm1, %v105_v50  ;;  %372 = vmatmul.msk.f32.vlgmr.msra.gmra.mxu2 %vm136_vm1, %v106_v51 }
  0x3b   :  { %374 = vmatmul.msk.f32.vlgmr.msra.gmra.mxu1 %vm136_vm1, %v105_v50  ;;  %375 = vmatmul.msk.f32.vlgmr.msra.gmra.mxu3 %vm136_vm1, %v106_v51  ;;  %v132_v55 = vld.sshfl [vmem:[#allocation1 + $0x10] sm:$0xff pattern:$0x75316420]  ;;  %v133_v56 = vld.sshfl [vmem:[#allocation1 + $0x18] sm:$0xff pattern:$0x75316420] }
  0x3c   :  { %376 = vmatpush.msk.msrb.mxu2 %vm143_vm0, %v132_v55  ;;  %379 = vmatpush.msk.msrb.mxu3 %vm143_vm0, %v133_v56 }
  0x40   :  { %v134_v57 = vld.sshfl [vmem:[#allocation1 + $0x20] sm:$0xff pattern:$0x75316420]  ;;  %v135_v58 = vld.sshfl [vmem:[#allocation1 + $0x28] sm:$0xff pattern:$0x75316420] }
  0x41   :  { %382 = vmatpush.msk.msrb.mxu0 %vm143_vm0, %v134_v57  ;;  %385 = vmatpush.msk.msrb.mxu1 %vm143_vm0, %v135_v58 }
  0x42   :  { %377 = vmatmul.msk.f32.vlgmr.msrb.gmra.mxu2 %vm136_vm1, %v105_v50  ;;  %383 = vmatmul.msk.f32.vlgmr.msrb.gmra.mxu0 %vm136_vm1, %v105_v50 }
  0x43   :  { %380 = vmatmul.msk.f32.vlgmr.msrb.gmra.mxu3 %vm136_vm1, %v105_v50  ;;  %386 = vmatmul.msk.f32.vlgmr.msrb.gmra.mxu1 %vm136_vm1, %v105_v50 }
  0x4a   :  { %378 = vmatmul.msk.f32.gmra.mxu2 %vm136_vm1, %v106_v51  ;;  %384 = vmatmul.msk.f32.gmra.mxu0 %vm136_vm1, %v106_v51 }
  0x4b   :  { %381 = vmatmul.msk.f32.gmra.mxu3 %vm136_vm1, %v106_v51  ;;  %387 = vmatmul.msk.f32.gmra.mxu1 %vm136_vm1, %v106_v51 }
  0x7f   :  { %v115_v59 = vpop.permute.xlu0 %114 }
  0x87   :  { %v120_v2 = vpop.permute.xlu0 %119 }
  0xb7   :  { %v173_v60 = vpop.f32.mrf.mxu0 }
  0xb8   :  { %v174_v61 = vadd.f32 %v173_v60, %v115_v59  ;;  %v196_v62 = vpop.f32.mrf.mxu1 }
  0xb9   :  { %v197_v63 = vadd.f32 %v196_v62, %v115_v59 }
  0xba   :  { %v294_v0 = vmul.f32 0.5, %v174_v61 }
  0xbb   :  { %v295_v1 = vmul.f32 0.5, %v197_v63 }
  0xbc   :  { %400 = vtanh.f32 %v294_v0 }
  0xbd   :  { %402 = vtanh.f32 %v295_v1  ;;  %v176_v3 = vpop.f32.mrf.mxu2 }
  0xbe   :  { %v177_v4 = vadd.f32 %v176_v3, %v120_v2  ;;  %v199_v5 = vpop.f32.mrf.mxu3 }
  0xbf   :  { %v200_v6 = vadd.f32 %v199_v5, %v120_v2  ;;  %v265_v7 = vpop.f32.mrf.mxu0 }
  0xc0   :  { %v300_v8 = vmul.f32 0.5, %v177_v4  ;;  %v266_v9 = vadd.f32 %v265_v7, %v115_v59  ;;  %v288_v10 = vpop.f32.mrf.mxu1 }
  0xc1   :  { %v301_v11 = vmul.f32 0.5, %v200_v6  ;;  %v289_v12 = vadd.f32 %v288_v10, %v115_v59 }
  0xc2   :  { %v401_v13 = vpop.eup %400  ;;  %404 = vtanh.f32 %v300_v8  ;;  %v298_v14 = vmul.f32 0.5, %v266_v9 }
  0xc3   :  { %v403_v15 = vpop.eup %402  ;;  %v318_v16 = vmul.f32 0.5, %v401_v13  ;;  %406 = vtanh.f32 %v301_v11  ;;  %v299_v17 = vmul.f32 0.5, %v289_v12 }
  0xc4   :  { %v319_v18 = vmul.f32 0.5, %v403_v15  ;;  %408 = vtanh.f32 %v298_v14 }
  0xc5   :  { %v330_v19 = vadd.f32 0.5, %v318_v16  ;;  %410 = vtanh.f32 %v299_v17  ;;  %v219_v20 = vpop.f32.mrf.mxu2 }
  0xc6   :  { %v331_v21 = vadd.f32 0.5, %v319_v18  ;;  %v220_v22 = vadd.f32 %v219_v20, %v115_v59  ;;  %v242_v23 = vpop.f32.mrf.mxu3 }
  0xc7   :  { %342 = vst [vmem:[%s573_s5] sm:$0xff] %v330_v19  ;;  %v243_v24 = vadd.f32 %v242_v23, %v115_v59  ;;  %v268_v25 = vpop.f32.mrf.mxu0 }
  0xc8   :  { %v405_v26 = vpop.eup %404  ;;  %343 = vst [vmem:[%s573_s5 + $0x8] sm:$0xff] %v331_v21  ;;  %v296_v27 = vmul.f32 0.5, %v220_v22  ;;  %v269_v28 = vadd.f32 %v268_v25, %v120_v2  ;;  %v291_v29 = vpop.f32.mrf.mxu1 }
  0xc9   :  { %v407_v30 = vpop.eup %406  ;;  %v324_v31 = vmul.f32 0.5, %v405_v26  ;;  %v297_v32 = vmul.f32 0.5, %v243_v24  ;;  %v292_v33 = vadd.f32 %v291_v29, %v120_v2 }
  0xca   :  { %v409_v34 = vpop.eup %408  ;;  %v325_v35 = vmul.f32 0.5, %v407_v30  ;;  %412 = vtanh.f32 %v296_v27  ;;  %v304_v36 = vmul.f32 0.5, %v269_v28 }
  0xcb   :  { %v411_v37 = vpop.eup %410  ;;  %v336_v38 = vadd.f32 0.5, %v324_v31  ;;  %v322_v39 = vmul.f32 0.5, %v409_v34  ;;  %414 = vtanh.f32 %v297_v32  ;;  %v305_v40 = vmul.f32 0.5, %v292_v33 }
  0xcc   :  { %v337_v41 = vadd.f32 0.5, %v325_v35  ;;  %v323_v42 = vmul.f32 0.5, %v411_v37  ;;  %416 = vtanh.f32 %v304_v36 }
  0xcd   :  { %348 = vst [vmem:[%s573_s5 + $0x30] sm:$0xff] %v336_v38  ;;  %v334_v43 = vadd.f32 0.5, %v322_v39  ;;  %418 = vtanh.f32 %v305_v40  ;;  %v222_v44 = vpop.f32.mrf.mxu2 }
  0xce   :  { %349 = vst [vmem:[%s573_s5 + $0x38] sm:$0xff] %v337_v41  ;;  %v335_v45 = vadd.f32 0.5, %v323_v42  ;;  %v223_v46 = vadd.f32 %v222_v44, %v120_v2  ;;  %v245_v47 = vpop.f32.mrf.mxu3 }
  0xcf   :  { %346 = vst [vmem:[%s573_s5 + $0x20] sm:$0xff] %v334_v43  ;;  %v246_v48 = vadd.f32 %v245_v47, %v120_v2 }
  0xd0   :  { %v413_v49 = vpop.eup %412  ;;  %347 = vst [vmem:[%s573_s5 + $0x28] sm:$0xff] %v335_v45  ;;  %v302_v50 = vmul.f32 0.5, %v223_v46 }
  0xd1   :  { %v415_v51 = vpop.eup %414  ;;  %v320_v52 = vmul.f32 0.5, %v413_v49  ;;  %v303_v53 = vmul.f32 0.5, %v246_v48 }
  0xd2   :  { %v417_v54 = vpop.eup %416  ;;  %v321_v55 = vmul.f32 0.5, %v415_v51  ;;  %420 = vtanh.f32 %v302_v50 }
  0xd3   :  { %v419_v56 = vpop.eup %418  ;;  %v332_v57 = vadd.f32 0.5, %v320_v52  ;;  %v328_v58 = vmul.f32 0.5, %v417_v54  ;;  %422 = vtanh.f32 %v303_v53 }
  0xd4   :  { %v333_v59 = vadd.f32 0.5, %v321_v55  ;;  %v329_v60 = vmul.f32 0.5, %v419_v56 }
  0xd5   :  { %344 = vst [vmem:[%s573_s5 + $0x10] sm:$0xff] %v332_v57  ;;  %v340_v61 = vadd.f32 0.5, %v328_v58 }
  0xd6   :  { %345 = vst [vmem:[%s573_s5 + $0x18] sm:$0xff] %v333_v59  ;;  %v341_v62 = vadd.f32 0.5, %v329_v60 }
  0xd7   :  { %352 = vst [vmem:[%s573_s5 + $0x50] sm:$0xff] %v340_v61 }
  0xd8   :  { %v421_v63 = vpop.eup %420  ;;  %353 = vst [vmem:[%s573_s5 + $0x58] sm:$0xff] %v341_v62 }
  0xd9   :  { %v423_v0 = vpop.eup %422  ;;  %v326_v1 = vmul.f32 0.5, %v421_v63 }
  0xda   :  { %v327_v2 = vmul.f32 0.5, %v423_v0 }
  0xdb   :  { %v338_v3 = vadd.f32 0.5, %v326_v1 }
  0xdc   :  { %v339_v4 = vadd.f32 0.5, %v327_v2 }
  0xdd   :  { %350 = vst [vmem:[%s573_s5 + $0x40] sm:$0xff] %v338_v3 }
  0xde   :  { %351 = vst [vmem:[%s573_s5 + $0x48] sm:$0xff] %v339_v4 }
  0xdf   :  { %358 = vsyncpa [#allocation5], 1 }
  0xe0   :  { %359 = vsyncpa [#allocation7], 1 }

</bundles_post_ra>
